<compile_context>
chip_gen: v5e
topology: v5e:2x2
jax: 0.10.0
libtpu: 0.0.40
codegen_flags: <defaults>
</compile_context>

<pallas_src>
import jax
import jax.numpy as jnp
import numpy as np
from jax.experimental import pallas as pl
from jax.experimental.pallas import tpu as pltpu


_ACTS = {
    'sin': jnp.sin,
    'tanh': jnp.tanh,
    'log': lambda v: jnp.log(v * v),          # torch.log(torch.pow(s, 2))
    'relu': lambda v: jnp.maximum(v, 0.0),
    'sigmoid': jax.nn.sigmoid,
}


def _round_up(x, m):
    return ((x + m - 1) // m) * m


def _apply_plan(h, plan):
    """Apply a layer's static activation plan to h (B, L).

    `plan` maps activation name -> list of (start, end) column spans.  Only the
    activations actually present in the layer are evaluated; columns not covered by
    any span (unknown names, zero-padded columns) pass through unchanged (identity).
    """
    if not plan:
        return h
    n_cols = h.shape[-1]
    # Fast path: one activation covering every column -> no mask needed.
    if len(plan) == 1:
        (name, spans), = plan.items()
        if spans == [(0, n_cols)]:
            return _ACTS[name](h)
    col = jax.lax.broadcasted_iota(jnp.int32, h.shape, dimension=1)
    out = h
    for name, spans in plan.items():
        mask = None
        for (s, e) in spans:
            m = (col >= s) & (col < e)
            mask = m if mask is None else (mask | m)
        out = jnp.where(mask, _ACTS[name](h), out)
    return out


def _make_kernel(num_layers, plans, chunk):
    def kernel(*refs):
        # refs = [x] + [trans_i, res_i, alpha_i]*L  |  [h_out]  |  [state_i]*L
        x_ref = refs[0]
        w_refs = refs[1:1 + 3 * num_layers]
        out_ref = refs[1 + 3 * num_layers]
        state_refs = refs[2 + 3 * num_layers:]

        # New batch shard (or very first chunk): reset the recurrent states.
        @pl.when(pl.program_id(1) == 0)
        def _init():
            for s in state_refs:
                s[...] = jnp.zeros_like(s)

        bshard = state_refs[0].shape[0]
        # Hoist the alpha broadcasts out of the unrolled time loop.
        alphas = [jnp.broadcast_to(w_refs[3 * i + 2][...],
                                   (bshard, w_refs[3 * i + 2].shape[1]))
                  for i in range(num_layers)]

        for tt in range(chunk):                                   # static unrolled
            h = x_ref[tt]                                         # (B_shard, din_p)
            for i in range(num_layers):
                h = jnp.dot(h, w_refs[3 * i][...],                # @ transitions[i]
                            preferred_element_type=jnp.float32)
                h = h + state_refs[i][...]                        # + batch_states[i]
                h = jnp.dot(h, w_refs[3 * i + 1][...],            # @ reservoirs[i]
                            preferred_element_type=jnp.float32)
                h = _apply_plan(h, plans[i])                      # split + activations
                h = alphas[i] * h                                 # NodesLayer
                state_refs[i][...] = h                            # batch_states[i] = h
            out_ref[tt] = h                                       # lane-dense store
    return kernel


def mixed_reservoir_forward(x, params, reservoir_sizes, distributions, dist_order,
                            *, time_chunk=16, batch_shards=None):
    B, S, d_in = x.shape
    num_layers = len(reservoir_sizes)
    l_last = reservoir_sizes[-1]

    # ---- padded problem dimensions ------------------------------------------------
    if batch_shards is None:
        batch_shards = 2 if B >= 16 else 1       # v7x: shard batch over 2 TensorCores
    B_pad = _round_up(B, 8 * batch_shards)
    B_shard = B_pad // batch_shards
    din_p = _round_up(d_in, 128)
    sizes_p = [_round_up(l, 128) for l in reservoir_sizes]
    T = max(1, min(time_chunk, S))
    S_pad = _round_up(S, T)
    num_chunks = S_pad // T

    # ---- inputs: time-major, zero-padded ------------------------------------------
    x_tm = jnp.transpose(x.astype(jnp.float32), (1, 0, 2))        # (S, B, d_in)
    x_tm = jnp.pad(x_tm, ((0, S_pad - S), (0, B_pad - B), (0, din_p - d_in)))

    inputs = [x_tm]
    in_specs = [pl.BlockSpec((T, B_shard, din_p), lambda b, t: (t, b, 0))]

    plans = []
    last, last_p = d_in, din_p
    for i, l in enumerate(reservoir_sizes):
        L = sizes_p[i]
        trans = jnp.pad(params['transitions'][i].astype(jnp.float32),
                        ((0, last_p - last), (0, L - l)))
        res = jnp.pad(params['reservoirs'][i].astype(jnp.float32),
                      ((0, L - l), (0, L - l)))
        alpha = jnp.pad(params['alphas'][i].astype(jnp.float32),
                        (0, L - l)).reshape(1, L)

        inputs += [trans, res, alpha]
        in_specs += [
            pl.BlockSpec((last_p, L), lambda b, t: (0, 0)),   # time-invariant weights
            pl.BlockSpec((L, L), lambda b, t: (0, 0)),
            pl.BlockSpec((1, L), lambda b, t: (0, 0)),
        ]

        # Static activation plan: {name: [(start, end), ...]} in padded column space.
        # Uncovered columns (unknown names, zero padding) keep identity.
        plan = {}
        off = 0
        for j, seg in enumerate(distributions[i]):
            name = dist_order[j] if j < len(dist_order) else None
            if name in _ACTS:
                plan.setdefault(name, []).append((off, off + seg))
            off += seg
        plans.append(plan)
        last, last_p = l, L

    L_last = sizes_p[-1]
    out_specs = pl.BlockSpec((T, B_shard, L_last), lambda b, t: (t, b, 0))
    scratch_shapes = [pltpu.VMEM((B_shard, Lp), jnp.float32) for Lp in sizes_p]

    h_tm = pl.pallas_call(
        _make_kernel(num_layers, plans, T),
        out_shape=jax.ShapeDtypeStruct((S_pad, B_pad, L_last), jnp.float32),
        grid_spec=pltpu.PrefetchScalarGridSpec(
            num_scalar_prefetch=0,
            grid=(batch_shards, num_chunks),
            in_specs=in_specs,
            out_specs=out_specs,
            scratch_shapes=scratch_shapes),
        compiler_params=pltpu.CompilerParams(
            dimension_semantics=("parallel", "arbitrary"),   # batch || ; time recurrent
            vmem_limit_bytes=64 * 1024 * 1024),
    )(*inputs)

    # Final nn.Linear, batched over every (batch, time) position in plain XLA: one
    # (B*S, last) @ (last, out) matmul instead of S tiny, masked (B, 4) stores.
    h = jnp.transpose(h_tm[:S, :B, :l_last], (1, 0, 2))           # (B, S, last)
    w = params['linear_w'].astype(jnp.float32)
    bias = params['linear_b'].astype(jnp.float32)
    return h @ w + bias


def init_params(key, input_size, output_size, reservoir_sizes):
    params = {'transitions': [], 'reservoirs': [], 'alphas': []}
    last = input_size
    for l in reservoir_sizes:
        key, k1, k2, k3 = jax.random.split(key, 4)
        params['alphas'].append(jax.random.uniform(k1, (l,), jnp.float32))                    # torch.rand(l)
        params['reservoirs'].append(jax.random.normal(k2, (l, l), jnp.float32) / np.sqrt(l))  # N(0, 1/sqrt(l))
        params['transitions'].append(jax.random.uniform(k3, (last, l), jnp.float32))          # torch.rand((last, l))
        last = l
    key, kw, kb = jax.random.split(key, 3)
    bound = 1.0 / np.sqrt(last)
    params['linear_w'] = jax.random.uniform(kw, (last, output_size), jnp.float32, -bound, bound)
    params['linear_b'] = jax.random.uniform(kb, (output_size,), jnp.float32, -bound, bound)
    return params


def reference_forward(x, params, reservoir_sizes, distributions, dist_order):
    """Pure-JAX reference mirroring the PyTorch forward (in float32)."""
    B, S, _ = x.shape
    states = [jnp.zeros((B, l), jnp.float32) for l in reservoir_sizes]
    outs = []
    for t in range(S):
        h = x[:, t, :].astype(jnp.float32)
        for i, l in enumerate(reservoir_sizes):
            h = h @ params['transitions'][i]
            h = h + states[i]
            h = h @ params['reservoirs'][i]
            segs, off = [], 0
            for j, seg in enumerate(distributions[i]):
                s = h[:, off:off + seg]; off += seg
                name = dist_order[j]
                if name == 'sin':       segs.append(jnp.sin(s))
                elif name == 'tanh':    segs.append(jnp.tanh(s))
                elif name == 'log':     segs.append(jnp.log(s ** 2))
                elif name == 'relu':    segs.append(jax.nn.relu(s))
                elif name == 'sigmoid': segs.append(jax.nn.sigmoid(s))
                else:                   segs.append(s)
            h = jnp.concatenate(segs, axis=1)
            h = params['alphas'][i] * h
            states[i] = h
        outs.append(h @ params['linear_w'] + params['linear_b'])
    return jnp.stack(outs, axis=1)


if __name__ == "__main__":
    input_size, output_size = 8, 4
    reservoir_sizes = [32, 32]
    distributions = [[16, 16], [8, 24]]            # layer0: sin/tanh, layer1: sin/tanh
    dist_order = ['sin', 'tanh', 'log', 'relu', 'sigmoid']
    B, S = 2, 8

    key = jax.random.PRNGKey(0)
    k_x, k_p = jax.random.split(key)
    x = jax.random.uniform(k_x, (B, S, input_size), jnp.float32)
    params = init_params(k_p, input_size, output_size, reservoir_sizes)

    out = mixed_reservoir_forward(x, params, reservoir_sizes, distributions, dist_order)
    out = jax.block_until_ready(out)

    ref = reference_forward(x, params, reservoir_sizes, distributions, dist_order)
    assert out.shape == (B, S, output_size)
    assert np.allclose(np.asarray(out), np.asarray(ref), rtol=2e-3, atol=2e-3), \
        "Pallas output does not match JAX reference"

    print("KERNEL_OK")
</pallas_src>

<mosaic_0001>
module attributes {stable_mosaic.version = 11 : i64} {
  func.func @kernel(%arg0: i32, %arg1: i32, %arg2: memref<8x8x128xf32, #tpu.memory_space<vmem>>, %arg3: memref<128x128xf32, #tpu.memory_space<vmem>>, %arg4: memref<128x128xf32, #tpu.memory_space<vmem>>, %arg5: memref<1x128xf32, #tpu.memory_space<vmem>>, %arg6: memref<128x128xf32, #tpu.memory_space<vmem>>, %arg7: memref<128x128xf32, #tpu.memory_space<vmem>>, %arg8: memref<1x128xf32, #tpu.memory_space<vmem>>, %arg9: memref<8x8x128xf32, #tpu.memory_space<vmem>>, %arg10: memref<8x128xf32, #tpu.memory_space<vmem>>, %arg11: memref<8x128xf32, #tpu.memory_space<vmem>>) attributes {dimension_semantics = [#tpu.dimension_semantics<parallel>, #tpu.dimension_semantics<arbitrary>], iteration_bounds = array<i64: 1, 1>, scalar_prefetch = 0 : i64, scratch_operands = 2 : i64, tpu.core_type = #tpu.core_type<tc>, window_params = [{transform_indices = @transform_0, window_bounds = array<i64: 8, 8, 128>}, {pipeline_mode = #tpu.pipeline_mode<synchronous>, transform_indices = @transform_1, window_bounds = array<i64: 128, 128>}, {pipeline_mode = #tpu.pipeline_mode<synchronous>, transform_indices = @transform_2, window_bounds = array<i64: 128, 128>}, {pipeline_mode = #tpu.pipeline_mode<synchronous>, transform_indices = @transform_3, window_bounds = array<i64: 1, 128>}, {pipeline_mode = #tpu.pipeline_mode<synchronous>, transform_indices = @transform_4, window_bounds = array<i64: 128, 128>}, {pipeline_mode = #tpu.pipeline_mode<synchronous>, transform_indices = @transform_5, window_bounds = array<i64: 128, 128>}, {pipeline_mode = #tpu.pipeline_mode<synchronous>, transform_indices = @transform_6, window_bounds = array<i64: 1, 128>}, {transform_indices = @transform_7, window_bounds = array<i64: 8, 8, 128>}]} {
    %c0_i32 = arith.constant 0 : i32
    %0 = arith.cmpi eq, %arg1, %c0_i32 : i32
    %1 = arith.extui %0 : i1 to i32
    %c0_i32_0 = arith.constant 0 : i32
    %2 = arith.cmpi ne, %1, %c0_i32_0 : i32
    scf.if %2 {
      %cst_265 = arith.constant 0.000000e+00 : f32
      %417 = vector.broadcast %cst_265 : f32 to vector<8x128xf32>
      %c0_266 = arith.constant 0 : index
      %c0_267 = arith.constant 0 : index
      %418 = vector.load %arg10[%c0_266, %c0_267] : memref<8x128xf32, #tpu.memory_space<vmem>>, vector<8x128xf32>
      tpu.vector_store %arg10[%c0_266, %c0_267], %417 {strides = array<i32>} : memref<8x128xf32, #tpu.memory_space<vmem>>, vector<8x128xf32>,
      %cst_268 = arith.constant 0.000000e+00 : f32
      %419 = vector.broadcast %cst_268 : f32 to vector<8x128xf32>
      %c0_269 = arith.constant 0 : index
      %c0_270 = arith.constant 0 : index
      %420 = vector.load %arg11[%c0_269, %c0_270] : memref<8x128xf32, #tpu.memory_space<vmem>>, vector<8x128xf32>
      tpu.vector_store %arg11[%c0_269, %c0_270], %419 {strides = array<i32>} : memref<8x128xf32, #tpu.memory_space<vmem>>, vector<8x128xf32>,
    } else {
    }
    %c0 = arith.constant 0 : index
    %c0_1 = arith.constant 0 : index
    %3 = vector.load %arg5[%c0, %c0_1] : memref<1x128xf32, #tpu.memory_space<vmem>>, vector<1x128xf32>
    %4 = vector.shape_cast %3 : vector<1x128xf32> to vector<1x128xf32>
    %5 = vector.broadcast %4 : vector<1x128xf32> to vector<8x128xf32>
    %c0_2 = arith.constant 0 : index
    %c0_3 = arith.constant 0 : index
    %6 = vector.load %arg8[%c0_2, %c0_3] : memref<1x128xf32, #tpu.memory_space<vmem>>, vector<1x128xf32>
    %7 = vector.shape_cast %6 : vector<1x128xf32> to vector<1x128xf32>
    %8 = vector.broadcast %7 : vector<1x128xf32> to vector<8x128xf32>
    %c0_4 = arith.constant 0 : index
    %c0_5 = arith.constant 0 : index
    %c0_6 = arith.constant 0 : index
    %9 = vector.load %arg2[%c0_4, %c0_5, %c0_6] : memref<8x8x128xf32, #tpu.memory_space<vmem>>, vector<1x8x128xf32>
    %10 = vector.shape_cast %9 : vector<1x8x128xf32> to vector<8x128xf32>
    %c0_7 = arith.constant 0 : index
    %c0_8 = arith.constant 0 : index
    %11 = vector.load %arg3[%c0_7, %c0_8] : memref<128x128xf32, #tpu.memory_space<vmem>>, vector<128x128xf32>
    %cst = arith.constant dense<0.000000e+00> : vector<8x128xf32>
    %12 = tpu.matmul %10, %11, %cst {dimension_numbers = #tpu.dot_dimension_numbers<[1], [0], [0], [1], [0, 0, 1, 1], [], []>} : vector<8x128xf32>, vector<128x128xf32>, vector<8x128xf32> -> vector<8x128xf32>
    %c0_9 = arith.constant 0 : index
    %c0_10 = arith.constant 0 : index
    %13 = vector.load %arg10[%c0_9, %c0_10] : memref<8x128xf32, #tpu.memory_space<vmem>>, vector<8x128xf32>
    %14 = arith.addf %12, %13 : vector<8x128xf32>
    %c0_11 = arith.constant 0 : index
    %c0_12 = arith.constant 0 : index
    %15 = vector.load %arg4[%c0_11, %c0_12] : memref<128x128xf32, #tpu.memory_space<vmem>>, vector<128x128xf32>
    %cst_13 = arith.constant dense<0.000000e+00> : vector<8x128xf32>
    %16 = tpu.matmul %14, %15, %cst_13 {dimension_numbers = #tpu.dot_dimension_numbers<[1], [0], [0], [1], [0, 0, 1, 1], [], []>} : vector<8x128xf32>, vector<128x128xf32>, vector<8x128xf32> -> vector<8x128xf32>
    %17 = tpu.iota {dimensions = array<i32: 1>} : vector<8x128xi32>
    %c0_i32_14 = arith.constant 0 : i32
    %18 = vector.broadcast %c0_i32_14 : i32 to vector<8x128xi32>
    %19 = arith.cmpi sge, %17, %18 : vector<8x128xi32>
    %c16_i32 = arith.constant 16 : i32
    %20 = vector.broadcast %c16_i32 : i32 to vector<8x128xi32>
    %21 = arith.cmpi slt, %17, %20 : vector<8x128xi32>
    %22 = arith.andi %19, %21 : vector<8x128xi1>
    %23 = math.sin %16 : vector<8x128xf32>
    %24 = arith.select %22, %23, %16 : vector<8x128xi1>, vector<8x128xf32>
    %c16_i32_15 = arith.constant 16 : i32
    %25 = vector.broadcast %c16_i32_15 : i32 to vector<8x128xi32>
    %26 = arith.cmpi sge, %17, %25 : vector<8x128xi32>
    %c32_i32 = arith.constant 32 : i32
    %27 = vector.broadcast %c32_i32 : i32 to vector<8x128xi32>
    %28 = arith.cmpi slt, %17, %27 : vector<8x128xi32>
    %29 = arith.andi %26, %28 : vector<8x128xi1>
    %30 = math.tanh %16 : vector<8x128xf32>
    %31 = arith.select %29, %30, %24 : vector<8x128xi1>, vector<8x128xf32>
    %32 = arith.mulf %5, %31 : vector<8x128xf32>
    %c0_16 = arith.constant 0 : index
    %c0_17 = arith.constant 0 : index
    %33 = vector.load %arg10[%c0_16, %c0_17] : memref<8x128xf32, #tpu.memory_space<vmem>>, vector<8x128xf32>
    tpu.vector_store %arg10[%c0_16, %c0_17], %32 {strides = array<i32>} : memref<8x128xf32, #tpu.memory_space<vmem>>, vector<8x128xf32>,
    %c0_18 = arith.constant 0 : index
    %c0_19 = arith.constant 0 : index
    %34 = vector.load %arg6[%c0_18, %c0_19] : memref<128x128xf32, #tpu.memory_space<vmem>>, vector<128x128xf32>
    %cst_20 = arith.constant dense<0.000000e+00> : vector<8x128xf32>
    %35 = tpu.matmul %32, %34, %cst_20 {dimension_numbers = #tpu.dot_dimension_numbers<[1], [0], [0], [1], [0, 0, 1, 1], [], []>} : vector<8x128xf32>, vector<128x128xf32>, vector<8x128xf32> -> vector<8x128xf32>
    %c0_21 = arith.constant 0 : index
    %c0_22 = arith.constant 0 : index
    %36 = vector.load %arg11[%c0_21, %c0_22] : memref<8x128xf32, #tpu.memory_space<vmem>>, vector<8x128xf32>
    %37 = arith.addf %35, %36 : vector<8x128xf32>
    %c0_23 = arith.constant 0 : index
    %c0_24 = arith.constant 0 : index
    %38 = vector.load %arg7[%c0_23, %c0_24] : memref<128x128xf32, #tpu.memory_space<vmem>>, vector<128x128xf32>
    %cst_25 = arith.constant dense<0.000000e+00> : vector<8x128xf32>
    %39 = tpu.matmul %37, %38, %cst_25 {dimension_numbers = #tpu.dot_dimension_numbers<[1], [0], [0], [1], [0, 0, 1, 1], [], []>} : vector<8x128xf32>, vector<128x128xf32>, vector<8x128xf32> -> vector<8x128xf32>
    %40 = tpu.iota {dimensions = array<i32: 1>} : vector<8x128xi32>
    %c0_i32_26 = arith.constant 0 : i32
    %41 = vector.broadcast %c0_i32_26 : i32 to vector<8x128xi32>
    %42 = arith.cmpi sge, %40, %41 : vector<8x128xi32>
    %c8_i32 = arith.constant 8 : i32
    %43 = vector.broadcast %c8_i32 : i32 to vector<8x128xi32>
    %44 = arith.cmpi slt, %40, %43 : vector<8x128xi32>
    %45 = arith.andi %42, %44 : vector<8x128xi1>
    %46 = math.sin %39 : vector<8x128xf32>
    %47 = arith.select %45, %46, %39 : vector<8x128xi1>, vector<8x128xf32>
    %c8_i32_27 = arith.constant 8 : i32
    %48 = vector.broadcast %c8_i32_27 : i32 to vector<8x128xi32>
    %49 = arith.cmpi sge, %40, %48 : vector<8x128xi32>
    %c32_i32_28 = arith.constant 32 : i32
    %50 = vector.broadcast %c32_i32_28 : i32 to vector<8x128xi32>
    %51 = arith.cmpi slt, %40, %50 : vector<8x128xi32>
    %52 = arith.andi %49, %51 : vector<8x128xi1>
    %53 = math.tanh %39 : vector<8x128xf32>
    %54 = arith.select %52, %53, %47 : vector<8x128xi1>, vector<8x128xf32>
    %55 = arith.mulf %8, %54 : vector<8x128xf32>
    %c0_29 = arith.constant 0 : index
    %c0_30 = arith.constant 0 : index
    %56 = vector.load %arg11[%c0_29, %c0_30] : memref<8x128xf32, #tpu.memory_space<vmem>>, vector<8x128xf32>
    tpu.vector_store %arg11[%c0_29, %c0_30], %55 {strides = array<i32>} : memref<8x128xf32, #tpu.memory_space<vmem>>, vector<8x128xf32>,
    %c0_31 = arith.constant 0 : index
    %c0_32 = arith.constant 0 : index
    %c0_33 = arith.constant 0 : index
    %57 = vector.load %arg9[%c0_31, %c0_32, %c0_33] : memref<8x8x128xf32, #tpu.memory_space<vmem>>, vector<1x8x128xf32>
    %58 = vector.shape_cast %57 : vector<1x8x128xf32> to vector<8x128xf32>
    %59 = vector.shape_cast %55 : vector<8x128xf32> to vector<1x8x128xf32>
    tpu.vector_store %arg9[%c0_31, %c0_32, %c0_33], %59 {strides = array<i32>} : memref<8x8x128xf32, #tpu.memory_space<vmem>>, vector<1x8x128xf32>,
    %c1 = arith.constant 1 : index
    %c0_34 = arith.constant 0 : index
    %c0_35 = arith.constant 0 : index
    %60 = vector.load %arg2[%c1, %c0_34, %c0_35] : memref<8x8x128xf32, #tpu.memory_space<vmem>>, vector<1x8x128xf32>
    %61 = vector.shape_cast %60 : vector<1x8x128xf32> to vector<8x128xf32>
    %c0_36 = arith.constant 0 : index
    %c0_37 = arith.constant 0 : index
    %62 = vector.load %arg3[%c0_36, %c0_37] : memref<128x128xf32, #tpu.memory_space<vmem>>, vector<128x128xf32>
    %cst_38 = arith.constant dense<0.000000e+00> : vector<8x128xf32>
    %63 = tpu.matmul %61, %62, %cst_38 {dimension_numbers = #tpu.dot_dimension_numbers<[1], [0], [0], [1], [0, 0, 1, 1], [], []>} : vector<8x128xf32>, vector<128x128xf32>, vector<8x128xf32> -> vector<8x128xf32>
    %c0_39 = arith.constant 0 : index
    %c0_40 = arith.constant 0 : index
    %64 = vector.load %arg10[%c0_39, %c0_40] : memref<8x128xf32, #tpu.memory_space<vmem>>, vector<8x128xf32>
    %65 = arith.addf %63, %64 : vector<8x128xf32>
    %c0_41 = arith.constant 0 : index
    %c0_42 = arith.constant 0 : index
    %66 = vector.load %arg4[%c0_41, %c0_42] : memref<128x128xf32, #tpu.memory_space<vmem>>, vector<128x128xf32>
    %cst_43 = arith.constant dense<0.000000e+00> : vector<8x128xf32>
    %67 = tpu.matmul %65, %66, %cst_43 {dimension_numbers = #tpu.dot_dimension_numbers<[1], [0], [0], [1], [0, 0, 1, 1], [], []>} : vector<8x128xf32>, vector<128x128xf32>, vector<8x128xf32> -> vector<8x128xf32>
    %68 = tpu.iota {dimensions = array<i32: 1>} : vector<8x128xi32>
    %c0_i32_44 = arith.constant 0 : i32
    %69 = vector.broadcast %c0_i32_44 : i32 to vector<8x128xi32>
    %70 = arith.cmpi sge, %68, %69 : vector<8x128xi32>
    %c16_i32_45 = arith.constant 16 : i32
    %71 = vector.broadcast %c16_i32_45 : i32 to vector<8x128xi32>
    %72 = arith.cmpi slt, %68, %71 : vector<8x128xi32>
    %73 = arith.andi %70, %72 : vector<8x128xi1>
    %74 = math.sin %67 : vector<8x128xf32>
    %75 = arith.select %73, %74, %67 : vector<8x128xi1>, vector<8x128xf32>
    %c16_i32_46 = arith.constant 16 : i32
    %76 = vector.broadcast %c16_i32_46 : i32 to vector<8x128xi32>
    %77 = arith.cmpi sge, %68, %76 : vector<8x128xi32>
    %c32_i32_47 = arith.constant 32 : i32
    %78 = vector.broadcast %c32_i32_47 : i32 to vector<8x128xi32>
    %79 = arith.cmpi slt, %68, %78 : vector<8x128xi32>
    %80 = arith.andi %77, %79 : vector<8x128xi1>
    %81 = math.tanh %67 : vector<8x128xf32>
    %82 = arith.select %80, %81, %75 : vector<8x128xi1>, vector<8x128xf32>
    %83 = arith.mulf %5, %82 : vector<8x128xf32>
    %c0_48 = arith.constant 0 : index
    %c0_49 = arith.constant 0 : index
    %84 = vector.load %arg10[%c0_48, %c0_49] : memref<8x128xf32, #tpu.memory_space<vmem>>, vector<8x128xf32>
    tpu.vector_store %arg10[%c0_48, %c0_49], %83 {strides = array<i32>} : memref<8x128xf32, #tpu.memory_space<vmem>>, vector<8x128xf32>,
    %c0_50 = arith.constant 0 : index
    %c0_51 = arith.constant 0 : index
    %85 = vector.load %arg6[%c0_50, %c0_51] : memref<128x128xf32, #tpu.memory_space<vmem>>, vector<128x128xf32>
    %cst_52 = arith.constant dense<0.000000e+00> : vector<8x128xf32>
    %86 = tpu.matmul %83, %85, %cst_52 {dimension_numbers = #tpu.dot_dimension_numbers<[1], [0], [0], [1], [0, 0, 1, 1], [], []>} : vector<8x128xf32>, vector<128x128xf32>, vector<8x128xf32> -> vector<8x128xf32>
    %c0_53 = arith.constant 0 : index
    %c0_54 = arith.constant 0 : index
    %87 = vector.load %arg11[%c0_53, %c0_54] : memref<8x128xf32, #tpu.memory_space<vmem>>, vector<8x128xf32>
    %88 = arith.addf %86, %87 : vector<8x128xf32>
    %c0_55 = arith.constant 0 : index
    %c0_56 = arith.constant 0 : index
    %89 = vector.load %arg7[%c0_55, %c0_56] : memref<128x128xf32, #tpu.memory_space<vmem>>, vector<128x128xf32>
    %cst_57 = arith.constant dense<0.000000e+00> : vector<8x128xf32>
    %90 = tpu.matmul %88, %89, %cst_57 {dimension_numbers = #tpu.dot_dimension_numbers<[1], [0], [0], [1], [0, 0, 1, 1], [], []>} : vector<8x128xf32>, vector<128x128xf32>, vector<8x128xf32> -> vector<8x128xf32>
    %91 = tpu.iota {dimensions = array<i32: 1>} : vector<8x128xi32>
    %c0_i32_58 = arith.constant 0 : i32
    %92 = vector.broadcast %c0_i32_58 : i32 to vector<8x128xi32>
    %93 = arith.cmpi sge, %91, %92 : vector<8x128xi32>
    %c8_i32_59 = arith.constant 8 : i32
    %94 = vector.broadcast %c8_i32_59 : i32 to vector<8x128xi32>
    %95 = arith.cmpi slt, %91, %94 : vector<8x128xi32>
    %96 = arith.andi %93, %95 : vector<8x128xi1>
    %97 = math.sin %90 : vector<8x128xf32>
    %98 = arith.select %96, %97, %90 : vector<8x128xi1>, vector<8x128xf32>
    %c8_i32_60 = arith.constant 8 : i32
    %99 = vector.broadcast %c8_i32_60 : i32 to vector<8x128xi32>
    %100 = arith.cmpi sge, %91, %99 : vector<8x128xi32>
    %c32_i32_61 = arith.constant 32 : i32
    %101 = vector.broadcast %c32_i32_61 : i32 to vector<8x128xi32>
    %102 = arith.cmpi slt, %91, %101 : vector<8x128xi32>
    %103 = arith.andi %100, %102 : vector<8x128xi1>
    %104 = math.tanh %90 : vector<8x128xf32>
    %105 = arith.select %103, %104, %98 : vector<8x128xi1>, vector<8x128xf32>
    %106 = arith.mulf %8, %105 : vector<8x128xf32>
    %c0_62 = arith.constant 0 : index
    %c0_63 = arith.constant 0 : index
    %107 = vector.load %arg11[%c0_62, %c0_63] : memref<8x128xf32, #tpu.memory_space<vmem>>, vector<8x128xf32>
    tpu.vector_store %arg11[%c0_62, %c0_63], %106 {strides = array<i32>} : memref<8x128xf32, #tpu.memory_space<vmem>>, vector<8x128xf32>,
    %c1_64 = arith.constant 1 : index
    %c0_65 = arith.constant 0 : index
    %c0_66 = arith.constant 0 : index
    %108 = vector.load %arg9[%c1_64, %c0_65, %c0_66] : memref<8x8x128xf32, #tpu.memory_space<vmem>>, vector<1x8x128xf32>
    %109 = vector.shape_cast %108 : vector<1x8x128xf32> to vector<8x128xf32>
    %110 = vector.shape_cast %106 : vector<8x128xf32> to vector<1x8x128xf32>
    tpu.vector_store %arg9[%c1_64, %c0_65, %c0_66], %110 {strides = array<i32>} : memref<8x8x128xf32, #tpu.memory_space<vmem>>, vector<1x8x128xf32>,
    %c2 = arith.constant 2 : index
    %c0_67 = arith.constant 0 : index
    %c0_68 = arith.constant 0 : index
    %111 = vector.load %arg2[%c2, %c0_67, %c0_68] : memref<8x8x128xf32, #tpu.memory_space<vmem>>, vector<1x8x128xf32>
    %112 = vector.shape_cast %111 : vector<1x8x128xf32> to vector<8x128xf32>
    %c0_69 = arith.constant 0 : index
    %c0_70 = arith.constant 0 : index
    %113 = vector.load %arg3[%c0_69, %c0_70] : memref<128x128xf32, #tpu.memory_space<vmem>>, vector<128x128xf32>
    %cst_71 = arith.constant dense<0.000000e+00> : vector<8x128xf32>
    %114 = tpu.matmul %112, %113, %cst_71 {dimension_numbers = #tpu.dot_dimension_numbers<[1], [0], [0], [1], [0, 0, 1, 1], [], []>} : vector<8x128xf32>, vector<128x128xf32>, vector<8x128xf32> -> vector<8x128xf32>
    %c0_72 = arith.constant 0 : index
    %c0_73 = arith.constant 0 : index
    %115 = vector.load %arg10[%c0_72, %c0_73] : memref<8x128xf32, #tpu.memory_space<vmem>>, vector<8x128xf32>
    %116 = arith.addf %114, %115 : vector<8x128xf32>
    %c0_74 = arith.constant 0 : index
    %c0_75 = arith.constant 0 : index
    %117 = vector.load %arg4[%c0_74, %c0_75] : memref<128x128xf32, #tpu.memory_space<vmem>>, vector<128x128xf32>
    %cst_76 = arith.constant dense<0.000000e+00> : vector<8x128xf32>
    %118 = tpu.matmul %116, %117, %cst_76 {dimension_numbers = #tpu.dot_dimension_numbers<[1], [0], [0], [1], [0, 0, 1, 1], [], []>} : vector<8x128xf32>, vector<128x128xf32>, vector<8x128xf32> -> vector<8x128xf32>
    %119 = tpu.iota {dimensions = array<i32: 1>} : vector<8x128xi32>
    %c0_i32_77 = arith.constant 0 : i32
    %120 = vector.broadcast %c0_i32_77 : i32 to vector<8x128xi32>
    %121 = arith.cmpi sge, %119, %120 : vector<8x128xi32>
    %c16_i32_78 = arith.constant 16 : i32
    %122 = vector.broadcast %c16_i32_78 : i32 to vector<8x128xi32>
    %123 = arith.cmpi slt, %119, %122 : vector<8x128xi32>
    %124 = arith.andi %121, %123 : vector<8x128xi1>
    %125 = math.sin %118 : vector<8x128xf32>
    %126 = arith.select %124, %125, %118 : vector<8x128xi1>, vector<8x128xf32>
    %c16_i32_79 = arith.constant 16 : i32
    %127 = vector.broadcast %c16_i32_79 : i32 to vector<8x128xi32>
    %128 = arith.cmpi sge, %119, %127 : vector<8x128xi32>
    %c32_i32_80 = arith.constant 32 : i32
    %129 = vector.broadcast %c32_i32_80 : i32 to vector<8x128xi32>
    %130 = arith.cmpi slt, %119, %129 : vector<8x128xi32>
    %131 = arith.andi %128, %130 : vector<8x128xi1>
    %132 = math.tanh %118 : vector<8x128xf32>
    %133 = arith.select %131, %132, %126 : vector<8x128xi1>, vector<8x128xf32>
    %134 = arith.mulf %5, %133 : vector<8x128xf32>
    %c0_81 = arith.constant 0 : index
    %c0_82 = arith.constant 0 : index
    %135 = vector.load %arg10[%c0_81, %c0_82] : memref<8x128xf32, #tpu.memory_space<vmem>>, vector<8x128xf32>
    tpu.vector_store %arg10[%c0_81, %c0_82], %134 {strides = array<i32>} : memref<8x128xf32, #tpu.memory_space<vmem>>, vector<8x128xf32>,
    %c0_83 = arith.constant 0 : index
    %c0_84 = arith.constant 0 : index
    %136 = vector.load %arg6[%c0_83, %c0_84] : memref<128x128xf32, #tpu.memory_space<vmem>>, vector<128x128xf32>
    %cst_85 = arith.constant dense<0.000000e+00> : vector<8x128xf32>
    %137 = tpu.matmul %134, %136, %cst_85 {dimension_numbers = #tpu.dot_dimension_numbers<[1], [0], [0], [1], [0, 0, 1, 1], [], []>} : vector<8x128xf32>, vector<128x128xf32>, vector<8x128xf32> -> vector<8x128xf32>
    %c0_86 = arith.constant 0 : index
    %c0_87 = arith.constant 0 : index
    %138 = vector.load %arg11[%c0_86, %c0_87] : memref<8x128xf32, #tpu.memory_space<vmem>>, vector<8x128xf32>
    %139 = arith.addf %137, %138 : vector<8x128xf32>
    %c0_88 = arith.constant 0 : index
    %c0_89 = arith.constant 0 : index
    %140 = vector.load %arg7[%c0_88, %c0_89] : memref<128x128xf32, #tpu.memory_space<vmem>>, vector<128x128xf32>
    %cst_90 = arith.constant dense<0.000000e+00> : vector<8x128xf32>
    %141 = tpu.matmul %139, %140, %cst_90 {dimension_numbers = #tpu.dot_dimension_numbers<[1], [0], [0], [1], [0, 0, 1, 1], [], []>} : vector<8x128xf32>, vector<128x128xf32>, vector<8x128xf32> -> vector<8x128xf32>
    %142 = tpu.iota {dimensions = array<i32: 1>} : vector<8x128xi32>
    %c0_i32_91 = arith.constant 0 : i32
    %143 = vector.broadcast %c0_i32_91 : i32 to vector<8x128xi32>
    %144 = arith.cmpi sge, %142, %143 : vector<8x128xi32>
    %c8_i32_92 = arith.constant 8 : i32
    %145 = vector.broadcast %c8_i32_92 : i32 to vector<8x128xi32>
    %146 = arith.cmpi slt, %142, %145 : vector<8x128xi32>
    %147 = arith.andi %144, %146 : vector<8x128xi1>
    %148 = math.sin %141 : vector<8x128xf32>
    %149 = arith.select %147, %148, %141 : vector<8x128xi1>, vector<8x128xf32>
    %c8_i32_93 = arith.constant 8 : i32
    %150 = vector.broadcast %c8_i32_93 : i32 to vector<8x128xi32>
    %151 = arith.cmpi sge, %142, %150 : vector<8x128xi32>
    %c32_i32_94 = arith.constant 32 : i32
    %152 = vector.broadcast %c32_i32_94 : i32 to vector<8x128xi32>
    %153 = arith.cmpi slt, %142, %152 : vector<8x128xi32>
    %154 = arith.andi %151, %153 : vector<8x128xi1>
    %155 = math.tanh %141 : vector<8x128xf32>
    %156 = arith.select %154, %155, %149 : vector<8x128xi1>, vector<8x128xf32>
    %157 = arith.mulf %8, %156 : vector<8x128xf32>
    %c0_95 = arith.constant 0 : index
    %c0_96 = arith.constant 0 : index
    %158 = vector.load %arg11[%c0_95, %c0_96] : memref<8x128xf32, #tpu.memory_space<vmem>>, vector<8x128xf32>
    tpu.vector_store %arg11[%c0_95, %c0_96], %157 {strides = array<i32>} : memref<8x128xf32, #tpu.memory_space<vmem>>, vector<8x128xf32>,
    %c2_97 = arith.constant 2 : index
    %c0_98 = arith.constant 0 : index
    %c0_99 = arith.constant 0 : index
    %159 = vector.load %arg9[%c2_97, %c0_98, %c0_99] : memref<8x8x128xf32, #tpu.memory_space<vmem>>, vector<1x8x128xf32>
    %160 = vector.shape_cast %159 : vector<1x8x128xf32> to vector<8x128xf32>
    %161 = vector.shape_cast %157 : vector<8x128xf32> to vector<1x8x128xf32>
    tpu.vector_store %arg9[%c2_97, %c0_98, %c0_99], %161 {strides = array<i32>} : memref<8x8x128xf32, #tpu.memory_space<vmem>>, vector<1x8x128xf32>,
    %c3 = arith.constant 3 : index
    %c0_100 = arith.constant 0 : index
    %c0_101 = arith.constant 0 : index
    %162 = vector.load %arg2[%c3, %c0_100, %c0_101] : memref<8x8x128xf32, #tpu.memory_space<vmem>>, vector<1x8x128xf32>
    %163 = vector.shape_cast %162 : vector<1x8x128xf32> to vector<8x128xf32>
    %c0_102 = arith.constant 0 : index
    %c0_103 = arith.constant 0 : index
    %164 = vector.load %arg3[%c0_102, %c0_103] : memref<128x128xf32, #tpu.memory_space<vmem>>, vector<128x128xf32>
    %cst_104 = arith.constant dense<0.000000e+00> : vector<8x128xf32>
    %165 = tpu.matmul %163, %164, %cst_104 {dimension_numbers = #tpu.dot_dimension_numbers<[1], [0], [0], [1], [0, 0, 1, 1], [], []>} : vector<8x128xf32>, vector<128x128xf32>, vector<8x128xf32> -> vector<8x128xf32>
    %c0_105 = arith.constant 0 : index
    %c0_106 = arith.constant 0 : index
    %166 = vector.load %arg10[%c0_105, %c0_106] : memref<8x128xf32, #tpu.memory_space<vmem>>, vector<8x128xf32>
    %167 = arith.addf %165, %166 : vector<8x128xf32>
    %c0_107 = arith.constant 0 : index
    %c0_108 = arith.constant 0 : index
    %168 = vector.load %arg4[%c0_107, %c0_108] : memref<128x128xf32, #tpu.memory_space<vmem>>, vector<128x128xf32>
    %cst_109 = arith.constant dense<0.000000e+00> : vector<8x128xf32>
    %169 = tpu.matmul %167, %168, %cst_109 {dimension_numbers = #tpu.dot_dimension_numbers<[1], [0], [0], [1], [0, 0, 1, 1], [], []>} : vector<8x128xf32>, vector<128x128xf32>, vector<8x128xf32> -> vector<8x128xf32>
    %170 = tpu.iota {dimensions = array<i32: 1>} : vector<8x128xi32>
    %c0_i32_110 = arith.constant 0 : i32
    %171 = vector.broadcast %c0_i32_110 : i32 to vector<8x128xi32>
    %172 = arith.cmpi sge, %170, %171 : vector<8x128xi32>
    %c16_i32_111 = arith.constant 16 : i32
    %173 = vector.broadcast %c16_i32_111 : i32 to vector<8x128xi32>
    %174 = arith.cmpi slt, %170, %173 : vector<8x128xi32>
    %175 = arith.andi %172, %174 : vector<8x128xi1>
    %176 = math.sin %169 : vector<8x128xf32>
    %177 = arith.select %175, %176, %169 : vector<8x128xi1>, vector<8x128xf32>
    %c16_i32_112 = arith.constant 16 : i32
    %178 = vector.broadcast %c16_i32_112 : i32 to vector<8x128xi32>
    %179 = arith.cmpi sge, %170, %178 : vector<8x128xi32>
    %c32_i32_113 = arith.constant 32 : i32
    %180 = vector.broadcast %c32_i32_113 : i32 to vector<8x128xi32>
    %181 = arith.cmpi slt, %170, %180 : vector<8x128xi32>
    %182 = arith.andi %179, %181 : vector<8x128xi1>
    %183 = math.tanh %169 : vector<8x128xf32>
    %184 = arith.select %182, %183, %177 : vector<8x128xi1>, vector<8x128xf32>
    %185 = arith.mulf %5, %184 : vector<8x128xf32>
    %c0_114 = arith.constant 0 : index
    %c0_115 = arith.constant 0 : index
    %186 = vector.load %arg10[%c0_114, %c0_115] : memref<8x128xf32, #tpu.memory_space<vmem>>, vector<8x128xf32>
    tpu.vector_store %arg10[%c0_114, %c0_115], %185 {strides = array<i32>} : memref<8x128xf32, #tpu.memory_space<vmem>>, vector<8x128xf32>,
    %c0_116 = arith.constant 0 : index
    %c0_117 = arith.constant 0 : index
    %187 = vector.load %arg6[%c0_116, %c0_117] : memref<128x128xf32, #tpu.memory_space<vmem>>, vector<128x128xf32>
    %cst_118 = arith.constant dense<0.000000e+00> : vector<8x128xf32>
    %188 = tpu.matmul %185, %187, %cst_118 {dimension_numbers = #tpu.dot_dimension_numbers<[1], [0], [0], [1], [0, 0, 1, 1], [], []>} : vector<8x128xf32>, vector<128x128xf32>, vector<8x128xf32> -> vector<8x128xf32>
    %c0_119 = arith.constant 0 : index
    %c0_120 = arith.constant 0 : index
    %189 = vector.load %arg11[%c0_119, %c0_120] : memref<8x128xf32, #tpu.memory_space<vmem>>, vector<8x128xf32>
    %190 = arith.addf %188, %189 : vector<8x128xf32>
    %c0_121 = arith.constant 0 : index
    %c0_122 = arith.constant 0 : index
    %191 = vector.load %arg7[%c0_121, %c0_122] : memref<128x128xf32, #tpu.memory_space<vmem>>, vector<128x128xf32>
    %cst_123 = arith.constant dense<0.000000e+00> : vector<8x128xf32>
    %192 = tpu.matmul %190, %191, %cst_123 {dimension_numbers = #tpu.dot_dimension_numbers<[1], [0], [0], [1], [0, 0, 1, 1], [], []>} : vector<8x128xf32>, vector<128x128xf32>, vector<8x128xf32> -> vector<8x128xf32>
    %193 = tpu.iota {dimensions = array<i32: 1>} : vector<8x128xi32>
    %c0_i32_124 = arith.constant 0 : i32
    %194 = vector.broadcast %c0_i32_124 : i32 to vector<8x128xi32>
    %195 = arith.cmpi sge, %193, %194 : vector<8x128xi32>
    %c8_i32_125 = arith.constant 8 : i32
    %196 = vector.broadcast %c8_i32_125 : i32 to vector<8x128xi32>
    %197 = arith.cmpi slt, %193, %196 : vector<8x128xi32>
    %198 = arith.andi %195, %197 : vector<8x128xi1>
    %199 = math.sin %192 : vector<8x128xf32>
    %200 = arith.select %198, %199, %192 : vector<8x128xi1>, vector<8x128xf32>
    %c8_i32_126 = arith.constant 8 : i32
    %201 = vector.broadcast %c8_i32_126 : i32 to vector<8x128xi32>
    %202 = arith.cmpi sge, %193, %201 : vector<8x128xi32>
    %c32_i32_127 = arith.constant 32 : i32
    %203 = vector.broadcast %c32_i32_127 : i32 to vector<8x128xi32>
    %204 = arith.cmpi slt, %193, %203 : vector<8x128xi32>
    %205 = arith.andi %202, %204 : vector<8x128xi1>
    %206 = math.tanh %192 : vector<8x128xf32>
    %207 = arith.select %205, %206, %200 : vector<8x128xi1>, vector<8x128xf32>
    %208 = arith.mulf %8, %207 : vector<8x128xf32>
    %c0_128 = arith.constant 0 : index
    %c0_129 = arith.constant 0 : index
    %209 = vector.load %arg11[%c0_128, %c0_129] : memref<8x128xf32, #tpu.memory_space<vmem>>, vector<8x128xf32>
    tpu.vector_store %arg11[%c0_128, %c0_129], %208 {strides = array<i32>} : memref<8x128xf32, #tpu.memory_space<vmem>>, vector<8x128xf32>,
    %c3_130 = arith.constant 3 : index
    %c0_131 = arith.constant 0 : index
    %c0_132 = arith.constant 0 : index
    %210 = vector.load %arg9[%c3_130, %c0_131, %c0_132] : memref<8x8x128xf32, #tpu.memory_space<vmem>>, vector<1x8x128xf32>
    %211 = vector.shape_cast %210 : vector<1x8x128xf32> to vector<8x128xf32>
    %212 = vector.shape_cast %208 : vector<8x128xf32> to vector<1x8x128xf32>
    tpu.vector_store %arg9[%c3_130, %c0_131, %c0_132], %212 {strides = array<i32>} : memref<8x8x128xf32, #tpu.memory_space<vmem>>, vector<1x8x128xf32>,
    %c4 = arith.constant 4 : index
    %c0_133 = arith.constant 0 : index
    %c0_134 = arith.constant 0 : index
    %213 = vector.load %arg2[%c4, %c0_133, %c0_134] : memref<8x8x128xf32, #tpu.memory_space<vmem>>, vector<1x8x128xf32>
    %214 = vector.shape_cast %213 : vector<1x8x128xf32> to vector<8x128xf32>
    %c0_135 = arith.constant 0 : index
    %c0_136 = arith.constant 0 : index
    %215 = vector.load %arg3[%c0_135, %c0_136] : memref<128x128xf32, #tpu.memory_space<vmem>>, vector<128x128xf32>
    %cst_137 = arith.constant dense<0.000000e+00> : vector<8x128xf32>
    %216 = tpu.matmul %214, %215, %cst_137 {dimension_numbers = #tpu.dot_dimension_numbers<[1], [0], [0], [1], [0, 0, 1, 1], [], []>} : vector<8x128xf32>, vector<128x128xf32>, vector<8x128xf32> -> vector<8x128xf32>
    %c0_138 = arith.constant 0 : index
    %c0_139 = arith.constant 0 : index
    %217 = vector.load %arg10[%c0_138, %c0_139] : memref<8x128xf32, #tpu.memory_space<vmem>>, vector<8x128xf32>
    %218 = arith.addf %216, %217 : vector<8x128xf32>
    %c0_140 = arith.constant 0 : index
    %c0_141 = arith.constant 0 : index
    %219 = vector.load %arg4[%c0_140, %c0_141] : memref<128x128xf32, #tpu.memory_space<vmem>>, vector<128x128xf32>
    %cst_142 = arith.constant dense<0.000000e+00> : vector<8x128xf32>
    %220 = tpu.matmul %218, %219, %cst_142 {dimension_numbers = #tpu.dot_dimension_numbers<[1], [0], [0], [1], [0, 0, 1, 1], [], []>} : vector<8x128xf32>, vector<128x128xf32>, vector<8x128xf32> -> vector<8x128xf32>
    %221 = tpu.iota {dimensions = array<i32: 1>} : vector<8x128xi32>
    %c0_i32_143 = arith.constant 0 : i32
    %222 = vector.broadcast %c0_i32_143 : i32 to vector<8x128xi32>
    %223 = arith.cmpi sge, %221, %222 : vector<8x128xi32>
    %c16_i32_144 = arith.constant 16 : i32
    %224 = vector.broadcast %c16_i32_144 : i32 to vector<8x128xi32>
    %225 = arith.cmpi slt, %221, %224 : vector<8x128xi32>
    %226 = arith.andi %223, %225 : vector<8x128xi1>
    %227 = math.sin %220 : vector<8x128xf32>
    %228 = arith.select %226, %227, %220 : vector<8x128xi1>, vector<8x128xf32>
    %c16_i32_145 = arith.constant 16 : i32
    %229 = vector.broadcast %c16_i32_145 : i32 to vector<8x128xi32>
    %230 = arith.cmpi sge, %221, %229 : vector<8x128xi32>
    %c32_i32_146 = arith.constant 32 : i32
    %231 = vector.broadcast %c32_i32_146 : i32 to vector<8x128xi32>
    %232 = arith.cmpi slt, %221, %231 : vector<8x128xi32>
    %233 = arith.andi %230, %232 : vector<8x128xi1>
    %234 = math.tanh %220 : vector<8x128xf32>
    %235 = arith.select %233, %234, %228 : vector<8x128xi1>, vector<8x128xf32>
    %236 = arith.mulf %5, %235 : vector<8x128xf32>
    %c0_147 = arith.constant 0 : index
    %c0_148 = arith.constant 0 : index
    %237 = vector.load %arg10[%c0_147, %c0_148] : memref<8x128xf32, #tpu.memory_space<vmem>>, vector<8x128xf32>
    tpu.vector_store %arg10[%c0_147, %c0_148], %236 {strides = array<i32>} : memref<8x128xf32, #tpu.memory_space<vmem>>, vector<8x128xf32>,
    %c0_149 = arith.constant 0 : index
    %c0_150 = arith.constant 0 : index
    %238 = vector.load %arg6[%c0_149, %c0_150] : memref<128x128xf32, #tpu.memory_space<vmem>>, vector<128x128xf32>
    %cst_151 = arith.constant dense<0.000000e+00> : vector<8x128xf32>
    %239 = tpu.matmul %236, %238, %cst_151 {dimension_numbers = #tpu.dot_dimension_numbers<[1], [0], [0], [1], [0, 0, 1, 1], [], []>} : vector<8x128xf32>, vector<128x128xf32>, vector<8x128xf32> -> vector<8x128xf32>
    %c0_152 = arith.constant 0 : index
    %c0_153 = arith.constant 0 : index
    %240 = vector.load %arg11[%c0_152, %c0_153] : memref<8x128xf32, #tpu.memory_space<vmem>>, vector<8x128xf32>
    %241 = arith.addf %239, %240 : vector<8x128xf32>
    %c0_154 = arith.constant 0 : index
    %c0_155 = arith.constant 0 : index
    %242 = vector.load %arg7[%c0_154, %c0_155] : memref<128x128xf32, #tpu.memory_space<vmem>>, vector<128x128xf32>
    %cst_156 = arith.constant dense<0.000000e+00> : vector<8x128xf32>
    %243 = tpu.matmul %241, %242, %cst_156 {dimension_numbers = #tpu.dot_dimension_numbers<[1], [0], [0], [1], [0, 0, 1, 1], [], []>} : vector<8x128xf32>, vector<128x128xf32>, vector<8x128xf32> -> vector<8x128xf32>
    %244 = tpu.iota {dimensions = array<i32: 1>} : vector<8x128xi32>
    %c0_i32_157 = arith.constant 0 : i32
    %245 = vector.broadcast %c0_i32_157 : i32 to vector<8x128xi32>
    %246 = arith.cmpi sge, %244, %245 : vector<8x128xi32>
    %c8_i32_158 = arith.constant 8 : i32
    %247 = vector.broadcast %c8_i32_158 : i32 to vector<8x128xi32>
    %248 = arith.cmpi slt, %244, %247 : vector<8x128xi32>
    %249 = arith.andi %246, %248 : vector<8x128xi1>
    %250 = math.sin %243 : vector<8x128xf32>
    %251 = arith.select %249, %250, %243 : vector<8x128xi1>, vector<8x128xf32>
    %c8_i32_159 = arith.constant 8 : i32
    %252 = vector.broadcast %c8_i32_159 : i32 to vector<8x128xi32>
    %253 = arith.cmpi sge, %244, %252 : vector<8x128xi32>
    %c32_i32_160 = arith.constant 32 : i32
    %254 = vector.broadcast %c32_i32_160 : i32 to vector<8x128xi32>
    %255 = arith.cmpi slt, %244, %254 : vector<8x128xi32>
    %256 = arith.andi %253, %255 : vector<8x128xi1>
    %257 = math.tanh %243 : vector<8x128xf32>
    %258 = arith.select %256, %257, %251 : vector<8x128xi1>, vector<8x128xf32>
    %259 = arith.mulf %8, %258 : vector<8x128xf32>
    %c0_161 = arith.constant 0 : index
    %c0_162 = arith.constant 0 : index
    %260 = vector.load %arg11[%c0_161, %c0_162] : memref<8x128xf32, #tpu.memory_space<vmem>>, vector<8x128xf32>
    tpu.vector_store %arg11[%c0_161, %c0_162], %259 {strides = array<i32>} : memref<8x128xf32, #tpu.memory_space<vmem>>, vector<8x128xf32>,
    %c4_163 = arith.constant 4 : index
    %c0_164 = arith.constant 0 : index
    %c0_165 = arith.constant 0 : index
    %261 = vector.load %arg9[%c4_163, %c0_164, %c0_165] : memref<8x8x128xf32, #tpu.memory_space<vmem>>, vector<1x8x128xf32>
    %262 = vector.shape_cast %261 : vector<1x8x128xf32> to vector<8x128xf32>
    %263 = vector.shape_cast %259 : vector<8x128xf32> to vector<1x8x128xf32>
    tpu.vector_store %arg9[%c4_163, %c0_164, %c0_165], %263 {strides = array<i32>} : memref<8x8x128xf32, #tpu.memory_space<vmem>>, vector<1x8x128xf32>,
    %c5 = arith.constant 5 : index
    %c0_166 = arith.constant 0 : index
    %c0_167 = arith.constant 0 : index
    %264 = vector.load %arg2[%c5, %c0_166, %c0_167] : memref<8x8x128xf32, #tpu.memory_space<vmem>>, vector<1x8x128xf32>
    %265 = vector.shape_cast %264 : vector<1x8x128xf32> to vector<8x128xf32>
    %c0_168 = arith.constant 0 : index
    %c0_169 = arith.constant 0 : index
    %266 = vector.load %arg3[%c0_168, %c0_169] : memref<128x128xf32, #tpu.memory_space<vmem>>, vector<128x128xf32>
    %cst_170 = arith.constant dense<0.000000e+00> : vector<8x128xf32>
    %267 = tpu.matmul %265, %266, %cst_170 {dimension_numbers = #tpu.dot_dimension_numbers<[1], [0], [0], [1], [0, 0, 1, 1], [], []>} : vector<8x128xf32>, vector<128x128xf32>, vector<8x128xf32> -> vector<8x128xf32>
    %c0_171 = arith.constant 0 : index
    %c0_172 = arith.constant 0 : index
    %268 = vector.load %arg10[%c0_171, %c0_172] : memref<8x128xf32, #tpu.memory_space<vmem>>, vector<8x128xf32>
    %269 = arith.addf %267, %268 : vector<8x128xf32>
    %c0_173 = arith.constant 0 : index
    %c0_174 = arith.constant 0 : index
    %270 = vector.load %arg4[%c0_173, %c0_174] : memref<128x128xf32, #tpu.memory_space<vmem>>, vector<128x128xf32>
    %cst_175 = arith.constant dense<0.000000e+00> : vector<8x128xf32>
    %271 = tpu.matmul %269, %270, %cst_175 {dimension_numbers = #tpu.dot_dimension_numbers<[1], [0], [0], [1], [0, 0, 1, 1], [], []>} : vector<8x128xf32>, vector<128x128xf32>, vector<8x128xf32> -> vector<8x128xf32>
    %272 = tpu.iota {dimensions = array<i32: 1>} : vector<8x128xi32>
    %c0_i32_176 = arith.constant 0 : i32
    %273 = vector.broadcast %c0_i32_176 : i32 to vector<8x128xi32>
    %274 = arith.cmpi sge, %272, %273 : vector<8x128xi32>
    %c16_i32_177 = arith.constant 16 : i32
    %275 = vector.broadcast %c16_i32_177 : i32 to vector<8x128xi32>
    %276 = arith.cmpi slt, %272, %275 : vector<8x128xi32>
    %277 = arith.andi %274, %276 : vector<8x128xi1>
    %278 = math.sin %271 : vector<8x128xf32>
    %279 = arith.select %277, %278, %271 : vector<8x128xi1>, vector<8x128xf32>
    %c16_i32_178 = arith.constant 16 : i32
    %280 = vector.broadcast %c16_i32_178 : i32 to vector<8x128xi32>
    %281 = arith.cmpi sge, %272, %280 : vector<8x128xi32>
    %c32_i32_179 = arith.constant 32 : i32
    %282 = vector.broadcast %c32_i32_179 : i32 to vector<8x128xi32>
    %283 = arith.cmpi slt, %272, %282 : vector<8x128xi32>
    %284 = arith.andi %281, %283 : vector<8x128xi1>
    %285 = math.tanh %271 : vector<8x128xf32>
    %286 = arith.select %284, %285, %279 : vector<8x128xi1>, vector<8x128xf32>
    %287 = arith.mulf %5, %286 : vector<8x128xf32>
    %c0_180 = arith.constant 0 : index
    %c0_181 = arith.constant 0 : index
    %288 = vector.load %arg10[%c0_180, %c0_181] : memref<8x128xf32, #tpu.memory_space<vmem>>, vector<8x128xf32>
    tpu.vector_store %arg10[%c0_180, %c0_181], %287 {strides = array<i32>} : memref<8x128xf32, #tpu.memory_space<vmem>>, vector<8x128xf32>,
    %c0_182 = arith.constant 0 : index
    %c0_183 = arith.constant 0 : index
    %289 = vector.load %arg6[%c0_182, %c0_183] : memref<128x128xf32, #tpu.memory_space<vmem>>, vector<128x128xf32>
    %cst_184 = arith.constant dense<0.000000e+00> : vector<8x128xf32>
    %290 = tpu.matmul %287, %289, %cst_184 {dimension_numbers = #tpu.dot_dimension_numbers<[1], [0], [0], [1], [0, 0, 1, 1], [], []>} : vector<8x128xf32>, vector<128x128xf32>, vector<8x128xf32> -> vector<8x128xf32>
    %c0_185 = arith.constant 0 : index
    %c0_186 = arith.constant 0 : index
    %291 = vector.load %arg11[%c0_185, %c0_186] : memref<8x128xf32, #tpu.memory_space<vmem>>, vector<8x128xf32>
    %292 = arith.addf %290, %291 : vector<8x128xf32>
    %c0_187 = arith.constant 0 : index
    %c0_188 = arith.constant 0 : index
    %293 = vector.load %arg7[%c0_187, %c0_188] : memref<128x128xf32, #tpu.memory_space<vmem>>, vector<128x128xf32>
    %cst_189 = arith.constant dense<0.000000e+00> : vector<8x128xf32>
    %294 = tpu.matmul %292, %293, %cst_189 {dimension_numbers = #tpu.dot_dimension_numbers<[1], [0], [0], [1], [0, 0, 1, 1], [], []>} : vector<8x128xf32>, vector<128x128xf32>, vector<8x128xf32> -> vector<8x128xf32>
    %295 = tpu.iota {dimensions = array<i32: 1>} : vector<8x128xi32>
    %c0_i32_190 = arith.constant 0 : i32
    %296 = vector.broadcast %c0_i32_190 : i32 to vector<8x128xi32>
    %297 = arith.cmpi sge, %295, %296 : vector<8x128xi32>
    %c8_i32_191 = arith.constant 8 : i32
    %298 = vector.broadcast %c8_i32_191 : i32 to vector<8x128xi32>
    %299 = arith.cmpi slt, %295, %298 : vector<8x128xi32>
    %300 = arith.andi %297, %299 : vector<8x128xi1>
    %301 = math.sin %294 : vector<8x128xf32>
    %302 = arith.select %300, %301, %294 : vector<8x128xi1>, vector<8x128xf32>
    %c8_i32_192 = arith.constant 8 : i32
    %303 = vector.broadcast %c8_i32_192 : i32 to vector<8x128xi32>
    %304 = arith.cmpi sge, %295, %303 : vector<8x128xi32>
    %c32_i32_193 = arith.constant 32 : i32
    %305 = vector.broadcast %c32_i32_193 : i32 to vector<8x128xi32>
    %306 = arith.cmpi slt, %295, %305 : vector<8x128xi32>
    %307 = arith.andi %304, %306 : vector<8x128xi1>
    %308 = math.tanh %294 : vector<8x128xf32>
    %309 = arith.select %307, %308, %302 : vector<8x128xi1>, vector<8x128xf32>
    %310 = arith.mulf %8, %309 : vector<8x128xf32>
    %c0_194 = arith.constant 0 : index
    %c0_195 = arith.constant 0 : index
    %311 = vector.load %arg11[%c0_194, %c0_195] : memref<8x128xf32, #tpu.memory_space<vmem>>, vector<8x128xf32>
    tpu.vector_store %arg11[%c0_194, %c0_195], %310 {strides = array<i32>} : memref<8x128xf32, #tpu.memory_space<vmem>>, vector<8x128xf32>,
    %c5_196 = arith.constant 5 : index
    %c0_197 = arith.constant 0 : index
    %c0_198 = arith.constant 0 : index
    %312 = vector.load %arg9[%c5_196, %c0_197, %c0_198] : memref<8x8x128xf32, #tpu.memory_space<vmem>>, vector<1x8x128xf32>
    %313 = vector.shape_cast %312 : vector<1x8x128xf32> to vector<8x128xf32>
    %314 = vector.shape_cast %310 : vector<8x128xf32> to vector<1x8x128xf32>
    tpu.vector_store %arg9[%c5_196, %c0_197, %c0_198], %314 {strides = array<i32>} : memref<8x8x128xf32, #tpu.memory_space<vmem>>, vector<1x8x128xf32>,
    %c6 = arith.constant 6 : index
    %c0_199 = arith.constant 0 : index
    %c0_200 = arith.constant 0 : index
    %315 = vector.load %arg2[%c6, %c0_199, %c0_200] : memref<8x8x128xf32, #tpu.memory_space<vmem>>, vector<1x8x128xf32>
    %316 = vector.shape_cast %315 : vector<1x8x128xf32> to vector<8x128xf32>
    %c0_201 = arith.constant 0 : index
    %c0_202 = arith.constant 0 : index
    %317 = vector.load %arg3[%c0_201, %c0_202] : memref<128x128xf32, #tpu.memory_space<vmem>>, vector<128x128xf32>
    %cst_203 = arith.constant dense<0.000000e+00> : vector<8x128xf32>
    %318 = tpu.matmul %316, %317, %cst_203 {dimension_numbers = #tpu.dot_dimension_numbers<[1], [0], [0], [1], [0, 0, 1, 1], [], []>} : vector<8x128xf32>, vector<128x128xf32>, vector<8x128xf32> -> vector<8x128xf32>
    %c0_204 = arith.constant 0 : index
    %c0_205 = arith.constant 0 : index
    %319 = vector.load %arg10[%c0_204, %c0_205] : memref<8x128xf32, #tpu.memory_space<vmem>>, vector<8x128xf32>
    %320 = arith.addf %318, %319 : vector<8x128xf32>
    %c0_206 = arith.constant 0 : index
    %c0_207 = arith.constant 0 : index
    %321 = vector.load %arg4[%c0_206, %c0_207] : memref<128x128xf32, #tpu.memory_space<vmem>>, vector<128x128xf32>
    %cst_208 = arith.constant dense<0.000000e+00> : vector<8x128xf32>
    %322 = tpu.matmul %320, %321, %cst_208 {dimension_numbers = #tpu.dot_dimension_numbers<[1], [0], [0], [1], [0, 0, 1, 1], [], []>} : vector<8x128xf32>, vector<128x128xf32>, vector<8x128xf32> -> vector<8x128xf32>
    %323 = tpu.iota {dimensions = array<i32: 1>} : vector<8x128xi32>
    %c0_i32_209 = arith.constant 0 : i32
    %324 = vector.broadcast %c0_i32_209 : i32 to vector<8x128xi32>
    %325 = arith.cmpi sge, %323, %324 : vector<8x128xi32>
    %c16_i32_210 = arith.constant 16 : i32
    %326 = vector.broadcast %c16_i32_210 : i32 to vector<8x128xi32>
    %327 = arith.cmpi slt, %323, %326 : vector<8x128xi32>
    %328 = arith.andi %325, %327 : vector<8x128xi1>
    %329 = math.sin %322 : vector<8x128xf32>
    %330 = arith.select %328, %329, %322 : vector<8x128xi1>, vector<8x128xf32>
    %c16_i32_211 = arith.constant 16 : i32
    %331 = vector.broadcast %c16_i32_211 : i32 to vector<8x128xi32>
    %332 = arith.cmpi sge, %323, %331 : vector<8x128xi32>
    %c32_i32_212 = arith.constant 32 : i32
    %333 = vector.broadcast %c32_i32_212 : i32 to vector<8x128xi32>
    %334 = arith.cmpi slt, %323, %333 : vector<8x128xi32>
    %335 = arith.andi %332, %334 : vector<8x128xi1>
    %336 = math.tanh %322 : vector<8x128xf32>
    %337 = arith.select %335, %336, %330 : vector<8x128xi1>, vector<8x128xf32>
    %338 = arith.mulf %5, %337 : vector<8x128xf32>
    %c0_213 = arith.constant 0 : index
    %c0_214 = arith.constant 0 : index
    %339 = vector.load %arg10[%c0_213, %c0_214] : memref<8x128xf32, #tpu.memory_space<vmem>>, vector<8x128xf32>
    tpu.vector_store %arg10[%c0_213, %c0_214], %338 {strides = array<i32>} : memref<8x128xf32, #tpu.memory_space<vmem>>, vector<8x128xf32>,
    %c0_215 = arith.constant 0 : index
    %c0_216 = arith.constant 0 : index
    %340 = vector.load %arg6[%c0_215, %c0_216] : memref<128x128xf32, #tpu.memory_space<vmem>>, vector<128x128xf32>
    %cst_217 = arith.constant dense<0.000000e+00> : vector<8x128xf32>
    %341 = tpu.matmul %338, %340, %cst_217 {dimension_numbers = #tpu.dot_dimension_numbers<[1], [0], [0], [1], [0, 0, 1, 1], [], []>} : vector<8x128xf32>, vector<128x128xf32>, vector<8x128xf32> -> vector<8x128xf32>
    %c0_218 = arith.constant 0 : index
    %c0_219 = arith.constant 0 : index
    %342 = vector.load %arg11[%c0_218, %c0_219] : memref<8x128xf32, #tpu.memory_space<vmem>>, vector<8x128xf32>
    %343 = arith.addf %341, %342 : vector<8x128xf32>
    %c0_220 = arith.constant 0 : index
    %c0_221 = arith.constant 0 : index
    %344 = vector.load %arg7[%c0_220, %c0_221] : memref<128x128xf32, #tpu.memory_space<vmem>>, vector<128x128xf32>
    %cst_222 = arith.constant dense<0.000000e+00> : vector<8x128xf32>
    %345 = tpu.matmul %343, %344, %cst_222 {dimension_numbers = #tpu.dot_dimension_numbers<[1], [0], [0], [1], [0, 0, 1, 1], [], []>} : vector<8x128xf32>, vector<128x128xf32>, vector<8x128xf32> -> vector<8x128xf32>
    %346 = tpu.iota {dimensions = array<i32: 1>} : vector<8x128xi32>
    %c0_i32_223 = arith.constant 0 : i32
    %347 = vector.broadcast %c0_i32_223 : i32 to vector<8x128xi32>
    %348 = arith.cmpi sge, %346, %347 : vector<8x128xi32>
    %c8_i32_224 = arith.constant 8 : i32
    %349 = vector.broadcast %c8_i32_224 : i32 to vector<8x128xi32>
    %350 = arith.cmpi slt, %346, %349 : vector<8x128xi32>
    %351 = arith.andi %348, %350 : vector<8x128xi1>
    %352 = math.sin %345 : vector<8x128xf32>
    %353 = arith.select %351, %352, %345 : vector<8x128xi1>, vector<8x128xf32>
    %c8_i32_225 = arith.constant 8 : i32
    %354 = vector.broadcast %c8_i32_225 : i32 to vector<8x128xi32>
    %355 = arith.cmpi sge, %346, %354 : vector<8x128xi32>
    %c32_i32_226 = arith.constant 32 : i32
    %356 = vector.broadcast %c32_i32_226 : i32 to vector<8x128xi32>
    %357 = arith.cmpi slt, %346, %356 : vector<8x128xi32>
    %358 = arith.andi %355, %357 : vector<8x128xi1>
    %359 = math.tanh %345 : vector<8x128xf32>
    %360 = arith.select %358, %359, %353 : vector<8x128xi1>, vector<8x128xf32>
    %361 = arith.mulf %8, %360 : vector<8x128xf32>
    %c0_227 = arith.constant 0 : index
    %c0_228 = arith.constant 0 : index
    %362 = vector.load %arg11[%c0_227, %c0_228] : memref<8x128xf32, #tpu.memory_space<vmem>>, vector<8x128xf32>
    tpu.vector_store %arg11[%c0_227, %c0_228], %361 {strides = array<i32>} : memref<8x128xf32, #tpu.memory_space<vmem>>, vector<8x128xf32>,
    %c6_229 = arith.constant 6 : index
    %c0_230 = arith.constant 0 : index
    %c0_231 = arith.constant 0 : index
    %363 = vector.load %arg9[%c6_229, %c0_230, %c0_231] : memref<8x8x128xf32, #tpu.memory_space<vmem>>, vector<1x8x128xf32>
    %364 = vector.shape_cast %363 : vector<1x8x128xf32> to vector<8x128xf32>
    %365 = vector.shape_cast %361 : vector<8x128xf32> to vector<1x8x128xf32>
    tpu.vector_store %arg9[%c6_229, %c0_230, %c0_231], %365 {strides = array<i32>} : memref<8x8x128xf32, #tpu.memory_space<vmem>>, vector<1x8x128xf32>,
    %c7 = arith.constant 7 : index
    %c0_232 = arith.constant 0 : index
    %c0_233 = arith.constant 0 : index
    %366 = vector.load %arg2[%c7, %c0_232, %c0_233] : memref<8x8x128xf32, #tpu.memory_space<vmem>>, vector<1x8x128xf32>
    %367 = vector.shape_cast %366 : vector<1x8x128xf32> to vector<8x128xf32>
    %c0_234 = arith.constant 0 : index
    %c0_235 = arith.constant 0 : index
    %368 = vector.load %arg3[%c0_234, %c0_235] : memref<128x128xf32, #tpu.memory_space<vmem>>, vector<128x128xf32>
    %cst_236 = arith.constant dense<0.000000e+00> : vector<8x128xf32>
    %369 = tpu.matmul %367, %368, %cst_236 {dimension_numbers = #tpu.dot_dimension_numbers<[1], [0], [0], [1], [0, 0, 1, 1], [], []>} : vector<8x128xf32>, vector<128x128xf32>, vector<8x128xf32> -> vector<8x128xf32>
    %c0_237 = arith.constant 0 : index
    %c0_238 = arith.constant 0 : index
    %370 = vector.load %arg10[%c0_237, %c0_238] : memref<8x128xf32, #tpu.memory_space<vmem>>, vector<8x128xf32>
    %371 = arith.addf %369, %370 : vector<8x128xf32>
    %c0_239 = arith.constant 0 : index
    %c0_240 = arith.constant 0 : index
    %372 = vector.load %arg4[%c0_239, %c0_240] : memref<128x128xf32, #tpu.memory_space<vmem>>, vector<128x128xf32>
    %cst_241 = arith.constant dense<0.000000e+00> : vector<8x128xf32>
    %373 = tpu.matmul %371, %372, %cst_241 {dimension_numbers = #tpu.dot_dimension_numbers<[1], [0], [0], [1], [0, 0, 1, 1], [], []>} : vector<8x128xf32>, vector<128x128xf32>, vector<8x128xf32> -> vector<8x128xf32>
    %374 = tpu.iota {dimensions = array<i32: 1>} : vector<8x128xi32>
    %c0_i32_242 = arith.constant 0 : i32
    %375 = vector.broadcast %c0_i32_242 : i32 to vector<8x128xi32>
    %376 = arith.cmpi sge, %374, %375 : vector<8x128xi32>
    %c16_i32_243 = arith.constant 16 : i32
    %377 = vector.broadcast %c16_i32_243 : i32 to vector<8x128xi32>
    %378 = arith.cmpi slt, %374, %377 : vector<8x128xi32>
    %379 = arith.andi %376, %378 : vector<8x128xi1>
    %380 = math.sin %373 : vector<8x128xf32>
    %381 = arith.select %379, %380, %373 : vector<8x128xi1>, vector<8x128xf32>
    %c16_i32_244 = arith.constant 16 : i32
    %382 = vector.broadcast %c16_i32_244 : i32 to vector<8x128xi32>
    %383 = arith.cmpi sge, %374, %382 : vector<8x128xi32>
    %c32_i32_245 = arith.constant 32 : i32
    %384 = vector.broadcast %c32_i32_245 : i32 to vector<8x128xi32>
    %385 = arith.cmpi slt, %374, %384 : vector<8x128xi32>
    %386 = arith.andi %383, %385 : vector<8x128xi1>
    %387 = math.tanh %373 : vector<8x128xf32>
    %388 = arith.select %386, %387, %381 : vector<8x128xi1>, vector<8x128xf32>
    %389 = arith.mulf %5, %388 : vector<8x128xf32>
    %c0_246 = arith.constant 0 : index
    %c0_247 = arith.constant 0 : index
    %390 = vector.load %arg10[%c0_246, %c0_247] : memref<8x128xf32, #tpu.memory_space<vmem>>, vector<8x128xf32>
    tpu.vector_store %arg10[%c0_246, %c0_247], %389 {strides = array<i32>} : memref<8x128xf32, #tpu.memory_space<vmem>>, vector<8x128xf32>,
    %c0_248 = arith.constant 0 : index
    %c0_249 = arith.constant 0 : index
    %391 = vector.load %arg6[%c0_248, %c0_249] : memref<128x128xf32, #tpu.memory_space<vmem>>, vector<128x128xf32>
    %cst_250 = arith.constant dense<0.000000e+00> : vector<8x128xf32>
    %392 = tpu.matmul %389, %391, %cst_250 {dimension_numbers = #tpu.dot_dimension_numbers<[1], [0], [0], [1], [0, 0, 1, 1], [], []>} : vector<8x128xf32>, vector<128x128xf32>, vector<8x128xf32> -> vector<8x128xf32>
    %c0_251 = arith.constant 0 : index
    %c0_252 = arith.constant 0 : index
    %393 = vector.load %arg11[%c0_251, %c0_252] : memref<8x128xf32, #tpu.memory_space<vmem>>, vector<8x128xf32>
    %394 = arith.addf %392, %393 : vector<8x128xf32>
    %c0_253 = arith.constant 0 : index
    %c0_254 = arith.constant 0 : index
    %395 = vector.load %arg7[%c0_253, %c0_254] : memref<128x128xf32, #tpu.memory_space<vmem>>, vector<128x128xf32>
    %cst_255 = arith.constant dense<0.000000e+00> : vector<8x128xf32>
    %396 = tpu.matmul %394, %395, %cst_255 {dimension_numbers = #tpu.dot_dimension_numbers<[1], [0], [0], [1], [0, 0, 1, 1], [], []>} : vector<8x128xf32>, vector<128x128xf32>, vector<8x128xf32> -> vector<8x128xf32>
    %397 = tpu.iota {dimensions = array<i32: 1>} : vector<8x128xi32>
    %c0_i32_256 = arith.constant 0 : i32
    %398 = vector.broadcast %c0_i32_256 : i32 to vector<8x128xi32>
    %399 = arith.cmpi sge, %397, %398 : vector<8x128xi32>
    %c8_i32_257 = arith.constant 8 : i32
    %400 = vector.broadcast %c8_i32_257 : i32 to vector<8x128xi32>
    %401 = arith.cmpi slt, %397, %400 : vector<8x128xi32>
    %402 = arith.andi %399, %401 : vector<8x128xi1>
    %403 = math.sin %396 : vector<8x128xf32>
    %404 = arith.select %402, %403, %396 : vector<8x128xi1>, vector<8x128xf32>
    %c8_i32_258 = arith.constant 8 : i32
    %405 = vector.broadcast %c8_i32_258 : i32 to vector<8x128xi32>
    %406 = arith.cmpi sge, %397, %405 : vector<8x128xi32>
    %c32_i32_259 = arith.constant 32 : i32
    %407 = vector.broadcast %c32_i32_259 : i32 to vector<8x128xi32>
    %408 = arith.cmpi slt, %397, %407 : vector<8x128xi32>
    %409 = arith.andi %406, %408 : vector<8x128xi1>
    %410 = math.tanh %396 : vector<8x128xf32>
    %411 = arith.select %409, %410, %404 : vector<8x128xi1>, vector<8x128xf32>
    %412 = arith.mulf %8, %411 : vector<8x128xf32>
    %c0_260 = arith.constant 0 : index
    %c0_261 = arith.constant 0 : index
    %413 = vector.load %arg11[%c0_260, %c0_261] : memref<8x128xf32, #tpu.memory_space<vmem>>, vector<8x128xf32>
    tpu.vector_store %arg11[%c0_260, %c0_261], %412 {strides = array<i32>} : memref<8x128xf32, #tpu.memory_space<vmem>>, vector<8x128xf32>,
    %c7_262 = arith.constant 7 : index
    %c0_263 = arith.constant 0 : index
    %c0_264 = arith.constant 0 : index
    %414 = vector.load %arg9[%c7_262, %c0_263, %c0_264] : memref<8x8x128xf32, #tpu.memory_space<vmem>>, vector<1x8x128xf32>
    %415 = vector.shape_cast %414 : vector<1x8x128xf32> to vector<8x128xf32>
    %416 = vector.shape_cast %412 : vector<8x128xf32> to vector<1x8x128xf32>
    tpu.vector_store %arg9[%c7_262, %c0_263, %c0_264], %416 {strides = array<i32>} : memref<8x8x128xf32, #tpu.memory_space<vmem>>, vector<1x8x128xf32>,
    return
  }
  func.func @transform_0(%arg0: i32, %arg1: i32) -> (i32, i32, i32) {
    %c0_i32 = arith.constant 0 : i32
    %c0_i32_0 = arith.constant 0 : i32
    return %arg1, %arg0, %c0_i32 : i32, i32, i32
  }
  func.func @transform_1(%arg0: i32, %arg1: i32) -> (i32, i32) {
    %c0_i32 = arith.constant 0 : i32
    %c0_i32_0 = arith.constant 0 : i32
    %c0_i32_1 = arith.constant 0 : i32
    return %c0_i32, %c0_i32_0 : i32, i32
  }
  func.func @transform_2(%arg0: i32, %arg1: i32) -> (i32, i32) {
    %c0_i32 = arith.constant 0 : i32
    %c0_i32_0 = arith.constant 0 : i32
    %c0_i32_1 = arith.constant 0 : i32
    return %c0_i32, %c0_i32_0 : i32, i32
  }
  func.func @transform_3(%arg0: i32, %arg1: i32) -> (i32, i32) {
    %c0_i32 = arith.constant 0 : i32
    %c0_i32_0 = arith.constant 0 : i32
    %c0_i32_1 = arith.constant 0 : i32
    return %c0_i32, %c0_i32_0 : i32, i32
  }
  func.func @transform_4(%arg0: i32, %arg1: i32) -> (i32, i32) {
    %c0_i32 = arith.constant 0 : i32
    %c0_i32_0 = arith.constant 0 : i32
    %c0_i32_1 = arith.constant 0 : i32
    return %c0_i32, %c0_i32_0 : i32, i32
  }
  func.func @transform_5(%arg0: i32, %arg1: i32) -> (i32, i32) {
    %c0_i32 = arith.constant 0 : i32
    %c0_i32_0 = arith.constant 0 : i32
    %c0_i32_1 = arith.constant 0 : i32
    return %c0_i32, %c0_i32_0 : i32, i32
  }
  func.func @transform_6(%arg0: i32, %arg1: i32) -> (i32, i32) {
    %c0_i32 = arith.constant 0 : i32
    %c0_i32_0 = arith.constant 0 : i32
    %c0_i32_1 = arith.constant 0 : i32
    return %c0_i32, %c0_i32_0 : i32, i32
  }
  func.func @transform_7(%arg0: i32, %arg1: i32) -> (i32, i32, i32) {
    %c0_i32 = arith.constant 0 : i32
    %c0_i32_0 = arith.constant 0 : i32
    return %arg1, %arg0, %c0_i32 : i32, i32, i32
  }
}

</mosaic_0001>

<bundles_post_ra>
// kernel: tpu_custom_call.1
= control target key start
LH: loop header
LB: loop body
LE: loop exit
PB: predicated region body
PF: predicated region fallthrough
CT: control target
= control target key end

     0   :  { %12 = vsyncpa [#allocation5], 0  ;;  %s6499_s0 = inlined_call_operand.hbm [shape: f32[8,8,128], index: 0, kind: input, shape index: {}]   ;;  %s6500_s1 = inlined_call_operand.hbm [shape: f32[128,128], index: 1, kind: input, shape index: {}]   ;;  %s6501_s2 = inlined_call_operand.hbm [shape: f32[128,128], index: 2, kind: input, shape index: {}]   ;;  %s6502_s3 = inlined_call_operand.vmem [shape: f32[1,128], index: 3, kind: input, shape index: {}]   ;;  %s6503_s4 = inlined_call_operand.hbm [shape: f32[128,128], index: 4, kind: input, shape index: {}]   ;;  %s6504_s5 = inlined_call_operand.hbm [shape: f32[128,128], index: 5, kind: input, shape index: {}]   ;;  %s6505_s6 = inlined_call_operand.vmem [shape: f32[1,128], index: 6, kind: input, shape index: {}]   ;;  %s6506_s7 = inlined_call_operand.hbm [shape: f32[8,8,128], index: 7, kind: output, shape index: {}]  }
   0x1   :  { %13 = vsyncpa [#allocation8], 0 }
   0x2   :  { %14 = vsyncpa [#allocation11], 0 }
   0x3   :  { %15 = vsyncpa [#allocation6], 0  ;;  %s33_s26 = sshll.u32 %s6500_s1, 4  ;;  %s4165_s27 = smov [#allocation7]   ;;  %s34_s26 = int_to_ptr.hbm [resolvable:$true] %s33_s26 }
   0x4   :  { %s35_s28 = sshll.u32 %s4165_s27, 4  ;;  %s61_s8 = sshll.u32 %s6503_s4, 4  ;;  %s36_s28 = int_to_ptr.vmem [resolvable:$true] %s35_s28  ;;  %s62_s8 = int_to_ptr.hbm [resolvable:$true] %s61_s8 }
   0x5   :  { %s4166_s9 = smov 128   ;;  %s4167_s10 = smov 8  }
   0x6   :  { %41 = dma.hbm_to_vmem [thread:$0]  %s34_s26, 2048, %s36_s28, [#allocation8], %s4166_s9, %s4166_s9, %s4167_s10  }
   0x7   :  { %s4168_s11 = smov [#allocation10]   ;;  %s20_s1 = sshll.u32 %s6499_s0, 4  ;;  %s21_s1 = int_to_ptr.hbm [resolvable:$true] %s20_s1 }
   0x8   :  { %s63_s12 = sshll.u32 %s4168_s11, 4  ;;  %s46_s16 = sshll.u32 %s6501_s2, 4  ;;  %s64_s12 = int_to_ptr.vmem [resolvable:$true] %s63_s12  ;;  %s47_s16 = int_to_ptr.hbm [resolvable:$true] %s46_s16 }
   0x9   :  { %69 = dma.hbm_to_vmem [thread:$0]  %s62_s8, 2048, %s64_s12, [#allocation11], %s4166_s9, %s4166_s9, %s4167_s10  }
   0xa   :  { %s4169_s17 = smov [#allocation4]   ;;  %s4170_s19 = smov [#allocation9]  }
   0xb   :  { %s22_s18 = sshll.u32 %s4169_s17, 4  ;;  %s48_s0 = sshll.u32 %s4170_s19, 4  ;;  %s23_s18 = int_to_ptr.vmem [resolvable:$true] %s22_s18  ;;  %s49_s0 = int_to_ptr.vmem [resolvable:$true] %s48_s0 }
   0xc   :  { %28 = dma.hbm_to_vmem [thread:$0]  %s21_s1, 1024, %s23_s18, [#allocation5], %s4166_s9, %s4166_s9, %s4167_s10  }
   0xd   :  { %s74_s22 = sshll.u32 %s6504_s5, 4  ;;  %s4171_s2 = smov [#allocation12]   ;;  %s75_s22 = int_to_ptr.hbm [resolvable:$true] %s74_s22 }
   0xe   :  { %54 = dma.hbm_to_vmem [thread:$0]  %s47_s16, 2048, %s49_s0, [#allocation8], %s4166_s9, %s4166_s9, %s4167_s10  }
   0xf   :  { %s76_s23 = sshll.u32 %s4171_s2, 4  ;;  %s77_s23 = int_to_ptr.vmem [resolvable:$true] %s76_s23 }
  0x10   :  { %82 = dma.hbm_to_vmem [thread:$0]  %s75_s22, 2048, %s77_s23, [#allocation11], %s4166_s9, %s4166_s9, %s4167_s10  }
  0x11   :  { %4157 = dma.done.wait [#allocation5], 1024  }
  0x12   :  { %4158 = vsyncadd [#allocation5], 4294966272 }
  0x13   :  { %4159 = dma.done.wait [#allocation8], 4096  }
  0x14   :  { %4160 = vsyncadd [#allocation8], 4294963200 }
  0x15   :  { %4161 = dma.done.wait [#allocation11], 4096  }
  0x16   :  { %4162 = vsyncadd [#allocation11], 4294963200  ;;  %v4250_v0 = vld [vmem:[#allocation7 + $0x78] sm:$0xff]  ;;  %v4252_v1 = vld [vmem:[#allocation7 + $0x70] sm:$0xff]  ;;  %v4172_v47 = vmov 683565275  }
  0x17   :  { %137 = vmatpush.msra.mxu0 %v4250_v0  ;;  %v4255_v2 = vld [vmem:[#allocation7 + $0x68] sm:$0xff]  ;;  %v4258_v3 = vld [vmem:[#allocation7 + $0x60] sm:$0xff]  ;;  %v4261_v4 = vld [vmem:[#allocation9 + $0x78] sm:$0xff]  ;;  %v6515_v49 = vmov 2475754826   ;;  %s3895_s18 = sshll.u32 %s6506_s7, 4  ;;  %s3896_s18 = int_to_ptr.hbm [resolvable:$true] %s3895_s18 }
  0x18   :  { %v4263_v5 = vld [vmem:[#allocation7 + $0x58] sm:$0xff]  ;;  %173 = vmatpush.msra.mxu1 %v4261_v4  ;;  %v4266_v6 = vld [vmem:[#allocation9 + $0x70] sm:$0xff]  ;;  %v4269_v7 = vld [vmem:[#allocation9 + $0x68] sm:$0xff]  ;;  %v6513_v52 = vmov 2131351028  }
  0x19   :  { %138 = vmatpush.msra.mxu0 %v4252_v1  ;;  %v4271_v8 = vld [vmem:[#allocation7 + $0x50] sm:$0xff]  ;;  %v4275_v9 = vld [vmem:[#allocation9 + $0x60] sm:$0xff]  ;;  %v4277_v10 = vld [vmem:[#allocation7 + $0x48] sm:$0xff]  ;;  %v6511_v55 = vmov 2102212464  }
  0x1a   :  { %174 = vmatpush.msra.mxu1 %v4266_v6  ;;  %v4281_v11 = vld [vmem:[#allocation9 + $0x58] sm:$0xff]  ;;  %v4283_v12 = vld [vmem:[#allocation7 + $0x40] sm:$0xff]  ;;  %v4287_v13 = vld [vmem:[#allocation9 + $0x50] sm:$0xff]  ;;  %v6509_v58 = vmov 920167782  }
  0x1b   :  { %139 = vmatpush.msra.mxu0 %v4255_v2  ;;  %v127_v14 = vld [vmem:[#allocation7 + $0x38] sm:$0xff]  ;;  %v4291_v15 = vld [vmem:[#allocation9 + $0x48] sm:$0xff]  ;;  %v126_v16 = vld [vmem:[#allocation7 + $0x30] sm:$0xff]  ;;  %v6507_v61 = vmov 1326507024  }
  0x1c   :  { %175 = vmatpush.msra.mxu1 %v4269_v7  ;;  %v4294_v17 = vld [vmem:[#allocation9 + $0x40] sm:$0xff]  ;;  %v125_v18 = vld [vmem:[#allocation7 + $0x28] sm:$0xff]  ;;  %v4297_v19 = vld [vmem:[#allocation9 + $0x38] sm:$0xff] }
  0x1d   :  { %140 = vmatpush.msra.mxu0 %v4258_v3  ;;  %v124_v20 = vld [vmem:[#allocation7 + $0x20] sm:$0xff]  ;;  %v4300_v21 = vld [vmem:[#allocation9 + $0x30] sm:$0xff]  ;;  %v123_v22 = vld [vmem:[#allocation7 + $0x18] sm:$0xff] }
  0x1e   :  { %176 = vmatpush.msra.mxu1 %v4275_v9  ;;  %v4303_v23 = vld [vmem:[#allocation9 + $0x28] sm:$0xff]  ;;  %v122_v24 = vld [vmem:[#allocation7 + $0x10] sm:$0xff]  ;;  %v161_v25 = vld [vmem:[#allocation9 + $0x20] sm:$0xff] }
  0x1f   :  { %141 = vmatpush.msra.mxu0 %v4263_v5  ;;  %v121_v26 = vld [vmem:[#allocation7 + $0x8] sm:$0xff]  ;;  %v160_v27 = vld [vmem:[#allocation9 + $0x18] sm:$0xff]  ;;  %v120_v28 = vld [vmem:[#allocation7] sm:$0xff] }
  0x20   :  { %177 = vmatpush.msra.mxu1 %v4281_v11  ;;  %v119_v29 = vld [vmem:[#allocation4] sm:$0xff]  ;;  %v159_v30 = vld [vmem:[#allocation9 + $0x10] sm:$0xff]  ;;  %v158_v31 = vld [vmem:[#allocation9 + $0x8] sm:$0xff] }
  0x21   :  { %142 = vmatpush.msra.mxu0 %v4271_v8  ;;  %v157_v32 = vld [vmem:[#allocation9] sm:$0xff]  ;;  %v600_v33 = vld [vmem:[#allocation4 + $0x8] sm:$0xff] }
  0x22   :  { %178 = vmatpush.msra.mxu1 %v4287_v13 }
  0x23   :  { %143 = vmatpush.msra.mxu0 %v4277_v10 }
  0x24   :  { %179 = vmatpush.msra.mxu1 %v4291_v15 }
  0x25   :  { %144 = vmatpush.msra.mxu0 %v4283_v12 }
  0x26   :  { %180 = vmatpush.msra.mxu1 %v4294_v17 }
  0x27   :  { %145 = vmatpush.msra.mxu0 %v127_v14 }
  0x28   :  { %181 = vmatpush.msra.mxu1 %v4297_v19 }
  0x29   :  { %146 = vmatpush.msra.mxu0 %v126_v16 }
  0x2a   :  { %182 = vmatpush.msra.mxu1 %v4300_v21 }
  0x2b   :  { %147 = vmatpush.msra.mxu0 %v125_v18 }
  0x2c   :  { %183 = vmatpush.msra.mxu1 %v4303_v23 }
  0x2d   :  { %148 = vmatpush.msra.mxu0 %v124_v20 }
  0x2e   :  { %184 = vmatpush.msra.mxu1 %v161_v25 }
  0x2f   :  { %149 = vmatpush.msra.mxu0 %v123_v22 }
  0x30   :  { %185 = vmatpush.msra.mxu1 %v160_v27 }
  0x31   :  { %150 = vmatpush.msra.mxu0 %v122_v24 }
  0x32   :  { %186 = vmatpush.msra.mxu1 %v159_v30 }
  0x33   :  { %151 = vmatpush.msra.mxu0 %v121_v26 }
  0x34   :  { %187 = vmatpush.msra.mxu1 %v158_v31 }
  0x35   :  { %152 = vmatpush.msra.mxu0 %v120_v28 }
  0x36   :  { %153 = vmatmul.f32.vlgmr.msra.gmra.mxu0 %v119_v29  ;;  %188 = vmatpush.msra.mxu1 %v157_v32 }
  0x37   :  { %618 = vmatpush.msrb.mxu0 %v4250_v0 }
  0x38   :  { %654 = vmatpush.msrb.mxu1 %v4261_v4 }
  0x39   :  { %619 = vmatpush.msrb.mxu0 %v4252_v1 }
  0x3a   :  { %655 = vmatpush.msrb.mxu1 %v4266_v6 }
  0x3b   :  { %620 = vmatpush.msrb.mxu0 %v4255_v2 }
  0x3c   :  { %656 = vmatpush.msrb.mxu1 %v4269_v7 }
  0x3d   :  { %621 = vmatpush.msrb.mxu0 %v4258_v3 }
  0x3e   :  { %657 = vmatpush.msrb.mxu1 %v4275_v9 }
  0x3f   :  { %622 = vmatpush.msrb.mxu0 %v4263_v5 }
  0x40   :  { %658 = vmatpush.msrb.mxu1 %v4281_v11 }
  0x41   :  { %623 = vmatpush.msrb.mxu0 %v4271_v8 }
  0x42   :  { %659 = vmatpush.msrb.mxu1 %v4287_v13 }
  0x43   :  { %624 = vmatpush.msrb.mxu0 %v4277_v10 }
  0x44   :  { %660 = vmatpush.msrb.mxu1 %v4291_v15 }
  0x45   :  { %625 = vmatpush.msrb.mxu0 %v4283_v12 }
  0x46   :  { %661 = vmatpush.msrb.mxu1 %v4294_v17 }
  0x47   :  { %626 = vmatpush.msrb.mxu0 %v127_v14 }
  0x48   :  { %662 = vmatpush.msrb.mxu1 %v4297_v19 }
  0x49   :  { %627 = vmatpush.msrb.mxu0 %v126_v16 }
  0x4a   :  { %663 = vmatpush.msrb.mxu1 %v4300_v21 }
  0x4b   :  { %628 = vmatpush.msrb.mxu0 %v125_v18 }
  0x4c   :  { %664 = vmatpush.msrb.mxu1 %v4303_v23 }
  0x4d   :  { %629 = vmatpush.msrb.mxu0 %v124_v20 }
  0x4e   :  { %665 = vmatpush.msrb.mxu1 %v161_v25 }
  0x4f   :  { %630 = vmatpush.msrb.mxu0 %v123_v22 }
  0x50   :  { %666 = vmatpush.msrb.mxu1 %v160_v27 }
  0x51   :  { %631 = vmatpush.msrb.mxu0 %v122_v24 }
  0x52   :  { %667 = vmatpush.msrb.mxu1 %v159_v30 }
  0x53   :  { %632 = vmatpush.msrb.mxu0 %v121_v26 }
  0x54   :  { %668 = vmatpush.msrb.mxu1 %v158_v31  ;;  %v4178_v31 = vmov 0  }
  0x55   :  { %633 = vmatpush.msrb.mxu0 %v120_v28 }
  0x56   :  { %634 = vmatmul.f32.vlgmr.msrb.gmra.mxu0 %v600_v33  ;;  %669 = vmatpush.msrb.mxu1 %v157_v32 }
  0x57   :  { %1088 = vmatpush.msra.mxu0 %v4250_v0 }
  0x59   :  { %1089 = vmatpush.msra.mxu0 %v4252_v1 }
  0x5b   :  { %1090 = vmatpush.msra.mxu0 %v4255_v2 }
  0x5d   :  { %1091 = vmatpush.msra.mxu0 %v4258_v3 }
  0x5f   :  { %1092 = vmatpush.msra.mxu0 %v4263_v5 }
  0x61   :  { %1093 = vmatpush.msra.mxu0 %v4271_v8 }
  0x63   :  { %1094 = vmatpush.msra.mxu0 %v4277_v10 }
  0x65   :  { %1095 = vmatpush.msra.mxu0 %v4283_v12 }
  0x67   :  { %1096 = vmatpush.msra.mxu0 %v127_v14 }
  0x69   :  { %1097 = vmatpush.msra.mxu0 %v126_v16 }
  0x6b   :  { %1098 = vmatpush.msra.mxu0 %v125_v18 }
  0x6d   :  { %1099 = vmatpush.msra.mxu0 %v124_v20 }
  0x6f   :  { %1100 = vmatpush.msra.mxu0 %v123_v22 }
  0x71   :  { %1101 = vmatpush.msra.mxu0 %v122_v24 }
  0x73   :  { %1102 = vmatpush.msra.mxu0 %v121_v26 }
  0x75   :  { %1103 = vmatpush.msra.mxu0 %v120_v28 }
  0xb3   :  { %v154_v34 = vpop.f32.mrf.mxu0 }
  0xb4   :  { %189 = vmatmul.f32.vlgmr.msra.gmra.mxu1 %v154_v34 }
  0xb5   :  { %1124 = vmatpush.msra.mxu1 %v4261_v4 }
  0xb7   :  { %1125 = vmatpush.msra.mxu1 %v4266_v6 }
  0xb9   :  { %1126 = vmatpush.msra.mxu1 %v4269_v7 }
  0xbb   :  { %1127 = vmatpush.msra.mxu1 %v4275_v9 }
  0xbd   :  { %1128 = vmatpush.msra.mxu1 %v4281_v11 }
  0xbf   :  { %1129 = vmatpush.msra.mxu1 %v4287_v13 }
  0xc1   :  { %1130 = vmatpush.msra.mxu1 %v4291_v15 }
  0xc3   :  { %1131 = vmatpush.msra.mxu1 %v4294_v17 }
 0x131   :  { %v4342_v35 = vpop.f32.mrf.mxu1 }
 0x132   :  { %v201_v36 = vand.u32 2139095040, %v4342_v35  ;;  %v198_v39 = vand.u32 2147483647, %v4342_v35  ;;  %vm200_vm12 = vcmp.lt.s32.totalorder %v4342_v35, 0  ;;  %3975 = vtanh.f32 %v4342_v35 }
 0x134   :  { %v202_v37 = vshrl.u32 %v201_v36, 23  ;;  %v205_v41 = vand.u32 8388607, %v198_v39  ;;  %vm4461_vm13 = vcmp.le.f32.partialorder %v198_v39, 0.7853982  ;;  %v4476_v39 = vld [vmem:[#allocation12 + $0x58] sm:$0xff] }
 0x136   :  { %v3910_v38 = vadd.s32 4294967169, %v202_v37  ;;  %v206_v45 = vor.u32 8388608, %v205_v41 }
 0x138   :  { %v208_v40 = vadd.s32 1, %v3910_v38  ;;  %v4368_v4 = vshll.u32 %v206_v45, 8 }
 0x13a   :  { %vm209_vm0 = vcmp.gt.s32.totalorder %v208_v40, 0  ;;  %v247_v13 = vand.u32 65535, %v4368_v4  ;;  %v248_v14 = vshrl.u32 %v4368_v4, 16 }
 0x13b   :  { %v210_v42 = vsel %vm209_vm0, %v208_v40, 0 }
 0x13c   :  { %v212_v43 = vand.u32 31, %v210_v42  ;;  %v4350_v46 = vshrl.u32 %v210_v42, 5 }
 0x13e   :  { %v4348_v44 = vsub.s32 32, %v212_v43  ;;  %v215_v48 = vshll.u32 %v4172_v47, %v212_v43  ;;  %v218_v50 = vshll.u32 %v6515_v49, %v212_v43  ;;  %v221_v54 = vshll.u32 %v6513_v52, %v212_v43 }
 0x13f   :  { %v224_v57 = vshll.u32 %v6511_v55, %v212_v43  ;;  %v227_v60 = vshll.u32 %v6509_v58, %v212_v43  ;;  %vm230_vm1 = vcmp.lt.s32.totalorder %v4350_v46, 1  ;;  %vm233_vm2 = vcmp.lt.s32.totalorder %v4350_v46, 4 }
 0x140   :  { %v216_v51 = vshrl.u32 %v6515_v49, %v4348_v44  ;;  %v219_v53 = vshrl.u32 %v6513_v52, %v4348_v44  ;;  %v222_v56 = vshrl.u32 %v6511_v55, %v4348_v44  ;;  %v225_v59 = vshrl.u32 %v6509_v58, %v4348_v44 }
 0x141   :  { %v228_v62 = vshrl.u32 %v6507_v61, %v4348_v44  ;;  %vm232_vm3 = vcmp.lt.s32.totalorder %v4350_v46, 3  ;;  %vm231_vm4 = vcmp.lt.s32.totalorder %v4350_v46, 2  ;;  %v214_v42 = vshrl.u32 %v4172_v47, %v4348_v44  ;;  %v4411_v46 = vld [vmem:[#allocation10 + $0x58] sm:$0xff] }
 0x142   :  { %v217_v63 = vor.u32 %v216_v51, %v215_v48  ;;  %v220_v0 = vor.u32 %v219_v53, %v218_v50  ;;  %v223_v1 = vor.u32 %v222_v56, %v221_v54  ;;  %v226_v2 = vor.u32 %v225_v59, %v224_v57 }
 0x143   :  { %v229_v3 = vor.u32 %v228_v62, %v227_v60 }
 0x144   :  { %v238_v5 = vsel %vm230_vm1, %v217_v63, %v220_v0  ;;  %v242_v6 = vsel %vm230_vm1, %v220_v0, %v223_v1  ;;  %v239_v7 = vsel %vm233_vm2, %v226_v2, 920167782  ;;  %v235_v38 = vsel %vm233_vm2, %v223_v1, 2102212464 }
 0x145   :  { %v243_v8 = vsel %vm233_vm2, %v229_v3, 1326507024  ;;  %v240_v9 = vsel %vm232_vm3, %v223_v1, %v239_v7  ;;  %v234_v53 = vsel %vm230_vm1, %v214_v42, %v217_v63  ;;  %v236_v54 = vsel %vm232_vm3, %v220_v0, %v235_v38  ;;  %v375_v7 = vld [vmem:[#allocation10 + $0x70] sm:$0xff]  ;;  %v4406_v0 = vld [vmem:[#allocation10 + $0x68] sm:$0xff] }
 0x146   :  { %v244_v10 = vsel %vm232_vm3, %v226_v2, %v243_v8  ;;  %v241_v11 = vsel %vm231_vm4, %v238_v5, %v240_v9  ;;  %v237_v44 = vsel %vm231_vm4, %v234_v53, %v236_v54  ;;  %v376_v5 = vld [vmem:[#allocation10 + $0x78] sm:$0xff]  ;;  %v4457_v53 = vld [vmem:[#allocation12 + $0x68] sm:$0xff] }
 0x147   :  { %v245_v12 = vsel %vm231_vm4, %v242_v6, %v244_v10  ;;  %v271_v17 = vand.u32 65535, %v241_v11  ;;  %v272_v18 = vshrl.u32 %v241_v11, 16  ;;  %v291_v6 = vmul.u32 %v4368_v4, %v237_v44  ;;  %378 = vmatpush.msra.mxu2 %v376_v5  ;;  %v4409_v10 = vld [vmem:[#allocation10 + $0x60] sm:$0xff] }
 0x148   :  { %v249_v15 = vand.u32 65535, %v245_v12  ;;  %v250_v16 = vshrl.u32 %v245_v12, 16  ;;  %v4416_v12 = vld [vmem:[#allocation10 + $0x50] sm:$0xff]  ;;  %vm341_vm4 = vweird.f32 %v4342_v35 }
 0x149   :  { %v274_v21 = vmul.u32 %v272_v18, %v247_v13  ;;  %v275_v22 = vmul.u32 %v271_v17, %v248_v14  ;;  %v273_v26 = vmul.u32 %v271_v17, %v247_v13  ;;  %v276_v30 = vmul.u32 %v272_v18, %v248_v14  ;;  %379 = vmatpush.msra.mxu2 %v375_v7  ;;  %v4426_v17 = vld [vmem:[#allocation10 + $0x38] sm:$0xff] }
 0x14a   :  { %v252_v19 = vmul.u32 %v250_v16, %v247_v13  ;;  %v253_v20 = vmul.u32 %v249_v15, %v248_v14  ;;  %v251_v23 = vmul.u32 %v249_v15, %v247_v13  ;;  %v254_v25 = vmul.u32 %v250_v16, %v248_v14  ;;  %v4420_v13 = vld [vmem:[#allocation10 + $0x48] sm:$0xff]  ;;  %v4423_v15 = vld [vmem:[#allocation10 + $0x40] sm:$0xff] }
 0x14b   :  { %v277_v27 = vshll.u32 %v274_v21, 16  ;;  %v279_v33 = vshll.u32 %v275_v22, 16  ;;  %v278_v50 = vshrl.u32 %v274_v21, 16  ;;  %v280_v59 = vshrl.u32 %v275_v22, 16  ;;  %380 = vmatpush.msra.mxu2 %v4406_v0  ;;  %v4432_v22 = vld [vmem:[#allocation10 + $0x28] sm:$0xff] }
 0x14c   :  { %v255_v24 = vshll.u32 %v252_v19, 16  ;;  %v257_v28 = vshll.u32 %v253_v20, 16  ;;  %v256_v43 = vshrl.u32 %v252_v19, 16  ;;  %v258_v56 = vshrl.u32 %v253_v20, 16  ;;  %v4429_v20 = vld [vmem:[#allocation10 + $0x30] sm:$0xff] }
 0x14d   :  { %vm281_vm6 = vc.u32 %v273_v26, %v277_v27  ;;  %v283_v34 = vadd.s32 %v277_v27, %v273_v26  ;;  %381 = vmatpush.msra.mxu2 %v4409_v10 }
 0x14e   :  { %vm259_vm5 = vc.u32 %v251_v23, %v255_v24  ;;  %v261_v29 = vadd.s32 %v255_v24, %v251_v23  ;;  %v282_v37 = vsel %vm281_vm6, 1, %v4178_v31  ;;  %v4435_v23 = vld [vmem:[#allocation10 + $0x20] sm:$0xff] }
 0x14f   :  { %v260_v32 = vsel %vm259_vm5, 1, %v4178_v31  ;;  %v284_v41 = vadd.s32 %v282_v37, %v276_v30  ;;  %vm285_vm8 = vc.u32 %v283_v34, %v279_v33  ;;  %v287_v1 = vadd.s32 %v283_v34, %v279_v33  ;;  %382 = vmatpush.msra.mxu2 %v4411_v46  ;;  %v4441_v33 = vld [vmem:[#allocation10 + $0x10] sm:$0xff]  ;;  %v4444_v37 = vld [vmem:[#allocation10 + $0x8] sm:$0xff] }
 0x150   :  { %v262_v36 = vadd.s32 %v260_v32, %v254_v25  ;;  %vm263_vm7 = vc.u32 %v261_v29, %v257_v28  ;;  %v286_v48 = vsel %vm285_vm8, 1, %v4178_v31  ;;  %v4438_v28 = vld [vmem:[#allocation10 + $0x18] sm:$0xff] }
 0x151   :  { %v264_v40 = vsel %vm263_vm7, 1, %v4178_v31  ;;  %v288_v51 = vadd.s32 %v286_v48, %v284_v41  ;;  %383 = vmatpush.msra.mxu2 %v4416_v12  ;;  %v1070_v48 = vld [vmem:[#allocation4 + $0x10] sm:$0xff] }
 0x152   :  { %v266_v45 = vadd.s32 %v264_v40, %v262_v36  ;;  %v4447_v40 = vld [vmem:[#allocation10] sm:$0xff]  ;;  %1104 = vmatmul.f32.vlgmr.msra.gmra.mxu0 %v1070_v48 }
 0x153   :  { %v289_v60 = vadd.s32 %v288_v51, %v278_v50  ;;  %384 = vmatpush.msra.mxu2 %v4420_v13  ;;  %v4453_v50 = vld [vmem:[#allocation12 + $0x70] sm:$0xff] }
 0x154   :  { %v267_v57 = vadd.s32 %v266_v45, %v256_v43  ;;  %v4451_v45 = vld [vmem:[#allocation12 + $0x78] sm:$0xff] }
 0x155   :  { %v290_v2 = vadd.s32 %v289_v60, %v280_v59  ;;  %385 = vmatpush.msra.mxu2 %v4423_v15  ;;  %414 = vmatpush.msra.mxu3 %v4451_v45  ;;  %v4472_v60 = vld [vmem:[#allocation12 + $0x60] sm:$0xff] }
 0x156   :  { %v268_v62 = vadd.s32 %v267_v57, %v258_v56 }
 0x157   :  { %v294_v3 = vadd.s32 1, %v290_v2  ;;  %386 = vmatpush.msra.mxu2 %v4426_v17  ;;  %415 = vmatpush.msra.mxu3 %v4453_v50 }
 0x158   :  { %vm293_vm9 = vc.u32 %v268_v62, %v287_v1  ;;  %v292_v25 = vadd.s32 %v287_v1, %v268_v62 }
 0x159   :  { %v295_v63 = vsel %vm293_vm9, %v294_v3, %v290_v2  ;;  %387 = vmatpush.msra.mxu2 %v4429_v20  ;;  %416 = vmatpush.msra.mxu3 %v4457_v53  ;;  %v4483_v3 = vld [vmem:[#allocation12 + $0x50] sm:$0xff] }
 0x15a   :  { %v296_v8 = vadd.s32 %v295_v63, %v291_v6  ;;  %v4487_v63 = vld [vmem:[#allocation12 + $0x48] sm:$0xff] }
 0x15b   :  { %388 = vmatpush.msra.mxu2 %v4432_v22  ;;  %417 = vmatpush.msra.mxu3 %v4472_v60 }
 0x15c   :  { %v297_v9 = vadd.s32 536870912, %v296_v8 }
 0x15d   :  { %389 = vmatpush.msra.mxu2 %v4435_v23  ;;  %418 = vmatpush.msra.mxu3 %v4476_v39 }
 0x15e   :  { %v4413_v11 = vshrl.u32 %v297_v9, 30  ;;  %v4493_v9 = vld [vmem:[#allocation12 + $0x40] sm:$0xff] }
 0x15f   :  { %390 = vmatpush.msra.mxu2 %v4438_v28  ;;  %419 = vmatpush.msra.mxu3 %v4483_v3 }
 0x160   :  { %v299_v4 = vshll.u32 %v4413_v11, 30  ;;  %v322_v59 = vsub.s32 4, %v4413_v11 }
 0x161   :  { %391 = vmatpush.msra.mxu2 %v4441_v33  ;;  %420 = vmatpush.msra.mxu3 %v4487_v63 }
 0x162   :  { %v300_v14 = vsub.s32 %v296_v8, %v299_v4  ;;  %v323_v2 = vsel %vm200_vm12, %v322_v59, %v4413_v11 }
 0x163   :  { %392 = vmatpush.msra.mxu2 %v4444_v37  ;;  %421 = vmatpush.msra.mxu3 %v4493_v9 }
 0x164   :  { %vm301_vm10 = vcmp.lt.s32.totalorder %v300_v14, 0  ;;  %v302_v16 = vsub.s32 0, %v300_v14 }
 0x165   :  { %393 = vmatpush.msra.mxu2 %v4447_v40 }
 0x166   :  { %v303_v18 = vsel %vm301_vm10, %v302_v16, %v300_v14 }
 0x167   :  { %v304_v19 = vclz %v303_v18  ;;  %851 = vmatpush.msrb.mxu2 %v376_v5  ;;  %v404_v18 = vld [vmem:[#allocation12 + $0x30] sm:$0xff] }
 0x169   :  { %v3911_v21 = vadd.s32 4294967294, %v304_v19  ;;  %852 = vmatpush.msrb.mxu2 %v375_v7  ;;  %v325_v7 = vsel %vm4461_vm13, 0, %v323_v2 }
 0x16a   :  { %v342_v4 = vadd.s32 3, %v325_v7 }
 0x16b   :  { %vm3912_vm11 = vcmp.lt.s32.totalorder %v3911_v21, 0  ;;  %853 = vmatpush.msrb.mxu2 %v4406_v0 }
 0x16c   :  { %v307_v24 = vsel %vm3912_vm11, 0, %v3911_v21 }
 0x16d   :  { %v308_v26 = vsub.s32 32, %v307_v24  ;;  %v312_v27 = vsub.s32 4294967266, %v307_v24  ;;  %v309_v29 = vshll.u32 %v300_v14, %v307_v24  ;;  %854 = vmatpush.msrb.mxu2 %v4409_v10  ;;  %v193_v10 = vlaneseq  ;;  %v4497_v14 = vld [vmem:[#allocation12 + $0x38] sm:$0xff] }
 0x16e   :  { %422 = vmatpush.msra.mxu3 %v4497_v14  ;;  %v343_v24 = vand.u32 3, %v342_v4 }
 0x16f   :  { %v310_v30 = vshrl.u32 %v292_v25, %v308_v26  ;;  %v313_v32 = vadd.s32 127, %v312_v27  ;;  %855 = vmatpush.msrb.mxu2 %v4411_v46  ;;  %v4502_v19 = vand.u32 127, %v193_v10  ;;  %v403_v25 = vld [vmem:[#allocation12 + $0x28] sm:$0xff] }
 0x170   :  { %423 = vmatpush.msra.mxu3 %v404_v18  ;;  %vm345_vm0 = vcmp.eq.s32.totalorder %v343_v24, 0  ;;  %vm348_vm1 = vcmp.eq.s32.totalorder %v343_v24, 2  ;;  %vm344_vm3 = vcmp.lt.s32.totalorder %v343_v24, 2 }
 0x171   :  { %v311_v34 = vor.u32 %v310_v30, %v309_v29  ;;  %v314_v36 = vshll.u32 %v313_v32, 23  ;;  %856 = vmatpush.msrb.mxu2 %v4416_v12  ;;  %vm354_vm14 = vcmp.ge.s32.totalorder %v4502_v19, 16  ;;  %vm355_vm15 = vcmp.lt.s32.totalorder %v4502_v19, 32 }
 0x172   :  { %424 = vmatpush.msra.mxu3 %v403_v25  ;;  %vm196_vm2 = vcmp.lt.s32.totalorder %v4502_v19, 16  ;;  %vm4522_vm5 = vmand %vm354_vm14, %vm355_vm15 }
 0x173   :  { %v315_v38 = vor.u32 4788187, %v314_v36  ;;  %v318_v42 = vcvt.s32.f32 %v311_v34  ;;  %857 = vmatpush.msrb.mxu2 %v4420_v13  ;;  %v400_v34 = vld [vmem:[#allocation12 + $0x10] sm:$0xff] }
 0x175   :  { %v316_v41 = vand.u32 2147483647, %v315_v38  ;;  %858 = vmatpush.msrb.mxu2 %v4423_v15  ;;  %v402_v15 = vld [vmem:[#allocation12 + $0x20] sm:$0xff]  ;;  %v3976_v38 = vpop.eup %3975 }
 0x176   :  { %425 = vmatpush.msra.mxu3 %v402_v15 }
 0x177   :  { %v319_v43 = vmul.f32 %v318_v42, %v316_v41  ;;  %859 = vmatpush.msrb.mxu2 %v4426_v17  ;;  %v401_v17 = vld [vmem:[#allocation12 + $0x18] sm:$0xff] }
 0x178   :  { %426 = vmatpush.msra.mxu3 %v401_v17 }
 0x179   :  { %v320_v51 = vxor.u32 2147483648, %v319_v43  ;;  %860 = vmatpush.msrb.mxu2 %v4429_v20 }
 0x17a   :  { %427 = vmatpush.msra.mxu3 %v400_v34 }
 0x17b   :  { %v321_v56 = vsel %vm200_vm12, %v320_v51, %v319_v43  ;;  %861 = vmatpush.msrb.mxu2 %v4432_v22  ;;  %v4515_v22 = vld [vmem:[%s6502_s3] ss:$0 sm:$0xff]  ;;  %v635_v43 = vpop.f32.mrf.mxu0 }
 0x17c   :  { %v324_v57 = vsel %vm4461_vm13, %v4342_v35, %v321_v56 }
 0x17d   :  { %v326_v62 = vmul.f32 %v324_v57, %v324_v57  ;;  %862 = vmatpush.msrb.mxu2 %v4435_v23 }
 0x17f   :  { %v327_v1 = vmul.f32 -0.001358992, %v326_v62  ;;  %v334_v44 = vmul.f32 -0.00019511016, %v326_v62  ;;  %863 = vmatpush.msrb.mxu2 %v4438_v28  ;;  %v4536_v28 = vld [vmem:[#allocation12 + $0x8] sm:$0xff] }
 0x180   :  { %428 = vmatpush.msra.mxu3 %v4536_v28 }
 0x181   :  { %v328_v5 = vadd.f32 0.041655596, %v327_v1  ;;  %v335_v6 = vadd.f32 0.008332121, %v334_v44  ;;  %864 = vmatpush.msrb.mxu2 %v4441_v33 }
 0x183   :  { %v329_v8 = vmul.f32 %v328_v5, %v326_v62  ;;  %v336_v0 = vmul.f32 %v335_v6, %v326_v62  ;;  %865 = vmatpush.msrb.mxu2 %v4444_v37 }
 0x185   :  { %v330_v46 = vadd.f32 -0.4999988, %v329_v8  ;;  %v337_v11 = vadd.f32 -0.16666654, %v336_v0  ;;  %866 = vmatpush.msrb.mxu2 %v4447_v40 }
 0x187   :  { %v331_v12 = vmul.f32 %v330_v46, %v326_v62  ;;  %v338_v16 = vmul.f32 %v337_v11, %v326_v62 }
 0x189   :  { %v332_v13 = vadd.f32 1.0, %v331_v12  ;;  %v339_v21 = vadd.f32 1.0, %v338_v16 }
 0x18b   :  { %v340_v26 = vmul.f32 %v339_v21, %v324_v57  ;;  %v349_v27 = vxor.u32 2147483648, %v332_v13 }
 0x18d   :  { %v346_v29 = vxor.u32 2147483648, %v340_v26  ;;  %v350_v30 = vsel %vm348_vm1, %v349_v27, %v340_v26 }
 0x18f   :  { %v347_v20 = vsel %vm345_vm0, %v332_v13, %v346_v29 }
 0x190   :  { %v351_v32 = vsel %vm344_vm3, %v347_v20, %v350_v30 }
 0x191   :  { %v352_v36 = vsel %vm341_vm4, nan, %v351_v32 }
 0x192   :  { %v353_v41 = vsel %vm196_vm2, %v352_v36, %v4342_v35  ;;  %v4539_v35 = vld [vmem:[#allocation12] sm:$0xff] }
 0x193   :  { %v358_v42 = vsel %vm4522_vm5, %v3976_v38, %v353_v41  ;;  %429 = vmatpush.msra.mxu3 %v4539_v35 }
 0x194   :  { %v359_v48 = vmul.f32 %v4515_v22, %v358_v42 }
 0x195   :  { %887 = vmatpush.msrb.mxu3 %v4451_v45 }
 0x196   :  { %v636_v51 = vadd.f32 %v635_v43, %v359_v48  ;;  %394 = vmatmul.f32.vlgmr.msra.gmra.mxu2 %v359_v48 }
 0x197   :  { %888 = vmatpush.msrb.mxu3 %v4453_v50 }
 0x198   :  { %670 = vmatmul.f32.vlgmr.msrb.gmra.mxu1 %v636_v51 }
 0x199   :  { %889 = vmatpush.msrb.mxu3 %v4457_v53 }
 0x19b   :  { %890 = vmatpush.msrb.mxu3 %v4472_v60 }
 0x19d   :  { %891 = vmatpush.msrb.mxu3 %v4476_v39 }
 0x19f   :  { %892 = vmatpush.msrb.mxu3 %v4483_v3 }
 0x1a1   :  { %893 = vmatpush.msrb.mxu3 %v4487_v63 }
 0x1a3   :  { %894 = vmatpush.msrb.mxu3 %v4493_v9 }
 0x1a5   :  { %895 = vmatpush.msrb.mxu3 %v4497_v14 }
 0x1a7   :  { %896 = vmatpush.msrb.mxu3 %v404_v18 }
 0x1a9   :  { %897 = vmatpush.msrb.mxu3 %v403_v25 }
 0x215   :  { %v4551_v33 = vpop.f32.mrf.mxu1 }
 0x216   :  { %v677_v37 = vand.u32 2139095040, %v4551_v33  ;;  %v674_v53 = vand.u32 2147483647, %v4551_v33  ;;  %vm676_vm4 = vcmp.lt.s32.totalorder %v4551_v33, 0  ;;  %3977 = vtanh.f32 %v4551_v33 }
 0x218   :  { %v678_v40 = vshrl.u32 %v677_v37, 23  ;;  %v681_v56 = vand.u32 8388607, %v674_v53 }
 0x219   :  { %v395_v45 = vpop.f32.mrf.mxu2 }
 0x21a   :  { %v3916_v50 = vadd.s32 4294967169, %v678_v40  ;;  %430 = vmatmul.f32.vlgmr.msra.gmra.mxu3 %v395_v45  ;;  %v682_v62 = vor.u32 8388608, %v681_v56 }
 0x21c   :  { %v684_v54 = vadd.s32 1, %v3916_v50  ;;  %v4570_v14 = vshll.u32 %v682_v62, 8 }
 0x21e   :  { %vm685_vm6 = vcmp.gt.s32.totalorder %v684_v54, 0  ;;  %v723_v27 = vand.u32 65535, %v4570_v14  ;;  %v724_v15 = vshrl.u32 %v4570_v14, 16 }
 0x21f   :  { %v686_v57 = vsel %vm685_vm6, %v684_v54, 0  ;;  %vm675_vm6 = vcmp.le.f32.partialorder %v674_v53, 0.7853982 }
 0x220   :  { %v688_v59 = vand.u32 31, %v686_v57  ;;  %v4557_v39 = vshrl.u32 %v686_v57, 5 }
 0x222   :  { %v689_v60 = vsub.s32 32, %v688_v59  ;;  %v691_v1 = vshll.u32 %v4172_v47, %v688_v59  ;;  %v694_v44 = vshll.u32 %v6515_v49, %v688_v59  ;;  %v697_v5 = vshll.u32 %v6513_v52, %v688_v59 }
 0x223   :  { %v700_v63 = vshll.u32 %v6511_v55, %v688_v59  ;;  %v703_v8 = vshll.u32 %v6509_v58, %v688_v59  ;;  %vm706_vm7 = vcmp.lt.s32.totalorder %v4557_v39, 1  ;;  %vm709_vm8 = vcmp.lt.s32.totalorder %v4557_v39, 4 }
 0x224   :  { %v692_v2 = vshrl.u32 %v6515_v49, %v689_v60  ;;  %v695_v3 = vshrl.u32 %v6513_v52, %v689_v60  ;;  %v698_v6 = vshrl.u32 %v6511_v55, %v689_v60  ;;  %v701_v7 = vshrl.u32 %v6509_v58, %v689_v60 }
 0x225   :  { %v704_v0 = vshrl.u32 %v6507_v61, %v689_v60  ;;  %vm708_vm9 = vcmp.lt.s32.totalorder %v4557_v39, 3  ;;  %vm707_vm10 = vcmp.lt.s32.totalorder %v4557_v39, 2  ;;  %v4615_v39 = vld [vmem:[#allocation9 + $0x20] sm:$0xff] }
 0x226   :  { %v693_v9 = vor.u32 %v692_v2, %v691_v1  ;;  %v696_v10 = vor.u32 %v695_v3, %v694_v44  ;;  %v699_v46 = vor.u32 %v698_v6, %v697_v5  ;;  %v702_v11 = vor.u32 %v701_v7, %v700_v63 }
 0x227   :  { %v705_v4 = vor.u32 %v704_v0, %v703_v8  ;;  %v690_v2 = vshrl.u32 %v4172_v47, %v689_v60 }
 0x228   :  { %v714_v12 = vsel %vm706_vm7, %v693_v9, %v696_v10  ;;  %v718_v16 = vsel %vm706_vm7, %v696_v10, %v699_v46  ;;  %v715_v18 = vsel %vm709_vm8, %v702_v11, 920167782  ;;  %v711_v62 = vsel %vm709_vm8, %v699_v46, 2102212464 }
 0x229   :  { %v719_v13 = vsel %vm709_vm8, %v705_v4, 1326507024  ;;  %v716_v21 = vsel %vm708_vm9, %v699_v46, %v715_v18  ;;  %v710_v8 = vsel %vm706_vm7, %v690_v2, %v693_v9  ;;  %v712_v0 = vsel %vm708_vm9, %v696_v10, %v711_v62  ;;  %v4609_v10 = vld [vmem:[#allocation9 + $0x30] sm:$0xff]  ;;  %v4628_v62 = vld [vmem:[#allocation9] sm:$0xff] }
 0x22a   :  { %v720_v24 = vsel %vm708_vm9, %v702_v11, %v719_v13  ;;  %v717_v25 = vsel %vm707_vm10, %v714_v12, %v716_v21  ;;  %v713_v60 = vsel %vm707_vm10, %v710_v8, %v712_v0 }
 0x22b   :  { %v721_v26 = vsel %vm707_vm10, %v718_v16, %v720_v24  ;;  %v747_v20 = vand.u32 65535, %v717_v25  ;;  %v748_v30 = vshrl.u32 %v717_v25, 16  ;;  %v767_v24 = vmul.u32 %v4570_v14, %v713_v60  ;;  %v4618_v14 = vld [vmem:[#allocation9 + $0x18] sm:$0xff] }
 0x22c   :  { %v725_v29 = vand.u32 65535, %v721_v26  ;;  %v726_v17 = vshrl.u32 %v721_v26, 16  ;;  %vm817_vm10 = vweird.f32 %v4551_v33 }
 0x22d   :  { %v750_v36 = vmul.u32 %v748_v30, %v723_v27  ;;  %v751_v38 = vmul.u32 %v747_v20, %v724_v15  ;;  %v749_v48 = vmul.u32 %v747_v20, %v723_v27  ;;  %v752_v45 = vmul.u32 %v748_v30, %v724_v15 }
 0x22e   :  { %v728_v32 = vmul.u32 %v726_v17, %v723_v27  ;;  %v729_v34 = vmul.u32 %v725_v29, %v724_v15  ;;  %v727_v41 = vmul.u32 %v725_v29, %v723_v27  ;;  %v730_v43 = vmul.u32 %v726_v17, %v724_v15  ;;  %v4607_v27 = vld [vmem:[#allocation9 + $0x38] sm:$0xff]  ;;  %v4612_v29 = vld [vmem:[#allocation9 + $0x28] sm:$0xff] }
 0x22f   :  { %v753_v51 = vshll.u32 %v750_v36, 16  ;;  %v755_v54 = vshll.u32 %v751_v38, 16  ;;  %v754_v63 = vshrl.u32 %v750_v36, 16  ;;  %v756_v4 = vshrl.u32 %v751_v38, 16  ;;  %1132 = vmatpush.msra.mxu1 %v4607_v27 }
 0x230   :  { %v731_v42 = vshll.u32 %v728_v32, 16  ;;  %v733_v37 = vshll.u32 %v729_v34, 16  ;;  %v732_v3 = vshrl.u32 %v728_v32, 16  ;;  %v734_v11 = vshrl.u32 %v729_v34, 16  ;;  %v4621_v32 = vld [vmem:[#allocation9 + $0x10] sm:$0xff] }
 0x231   :  { %vm757_vm12 = vc.u32 %v749_v48, %v753_v51  ;;  %v759_v56 = vadd.s32 %v753_v51, %v749_v48  ;;  %1133 = vmatpush.msra.mxu1 %v4609_v10 }
 0x232   :  { %vm735_vm11 = vc.u32 %v727_v41, %v731_v42  ;;  %v737_v40 = vadd.s32 %v731_v42, %v727_v41  ;;  %v758_v59 = vsel %vm757_vm12, 1, %v4178_v31 }
 0x233   :  { %v736_v50 = vsel %vm735_vm11, 1, %v4178_v31  ;;  %v760_v44 = vadd.s32 %v758_v59, %v752_v45  ;;  %vm761_vm14 = vc.u32 %v759_v56, %v755_v54  ;;  %v763_v18 = vadd.s32 %v759_v56, %v755_v54  ;;  %1134 = vmatpush.msra.mxu1 %v4612_v29  ;;  %v4625_v59 = vld [vmem:[#allocation9 + $0x8] sm:$0xff] }
 0x234   :  { %v738_v57 = vadd.s32 %v736_v50, %v730_v43  ;;  %vm739_vm13 = vc.u32 %v737_v40, %v733_v37  ;;  %v762_v6 = vsel %vm761_vm14, 1, %v4178_v31 }
 0x235   :  { %v740_v1 = vsel %vm739_vm13, 1, %v4178_v31  ;;  %v764_v7 = vadd.s32 %v762_v6, %v760_v44  ;;  %1135 = vmatpush.msra.mxu1 %v4615_v39 }
 0x236   :  { %v742_v5 = vadd.s32 %v740_v1, %v738_v57 }
 0x237   :  { %v765_v12 = vadd.s32 %v764_v7, %v754_v63  ;;  %1136 = vmatpush.msra.mxu1 %v4618_v14 }
 0x238   :  { %v743_v46 = vadd.s32 %v742_v5, %v732_v3 }
 0x239   :  { %v766_v13 = vadd.s32 %v765_v12, %v756_v4  ;;  %1137 = vmatpush.msra.mxu1 %v4621_v32 }
 0x23a   :  { %v744_v16 = vadd.s32 %v743_v46, %v734_v11 }
 0x23b   :  { %v770_v21 = vadd.s32 1, %v766_v13  ;;  %1138 = vmatpush.msra.mxu1 %v4625_v59 }
 0x23c   :  { %vm769_vm0 = vc.u32 %v744_v16, %v763_v18  ;;  %v768_v42 = vadd.s32 %v763_v18, %v744_v16 }
 0x23d   :  { %v771_v25 = vsel %vm769_vm0, %v770_v21, %v766_v13  ;;  %1139 = vmatpush.msra.mxu1 %v4628_v62 }
 0x23e   :  { %v772_v26 = vadd.s32 %v771_v25, %v767_v24 }
 0x240   :  { %v773_v9 = vadd.s32 536870912, %v772_v26 }
 0x242   :  { %v774_v15 = vshrl.u32 %v773_v9, 30 }
 0x244   :  { %v775_v17 = vshll.u32 %v774_v15, 30  ;;  %v798_v5 = vsub.s32 4, %v774_v15 }
 0x246   :  { %v776_v20 = vsub.s32 %v772_v26, %v775_v17  ;;  %v799_v8 = vsel %vm676_vm4, %v798_v5, %v774_v15 }
 0x247   :  { %v801_v46 = vsel %vm675_vm6, 0, %v799_v8  ;;  %v4667_v8 = vld [vmem:[#allocation7 + $0x58] sm:$0xff] }
 0x248   :  { %vm777_vm1 = vcmp.lt.s32.totalorder %v776_v20, 0  ;;  %v778_v30 = vsub.s32 0, %v776_v20  ;;  %v818_v60 = vadd.s32 3, %v801_v46 }
 0x24a   :  { %v779_v34 = vsel %vm777_vm1, %v778_v30, %v776_v20  ;;  %v819_v25 = vand.u32 3, %v818_v60 }
 0x24b   :  { %v780_v36 = vclz %v779_v34 }
 0x24c   :  { %vm821_vm7 = vcmp.eq.s32.totalorder %v819_v25, 0  ;;  %vm824_vm8 = vcmp.eq.s32.totalorder %v819_v25, 2  ;;  %vm820_vm9 = vcmp.lt.s32.totalorder %v819_v25, 2 }
 0x24d   :  { %v3917_v38 = vadd.s32 4294967294, %v780_v36  ;;  %v3978_v36 = vpop.eup %3977 }
 0x24f   :  { %vm3918_vm3 = vcmp.lt.s32.totalorder %v3917_v38, 0 }
 0x250   :  { %v783_v41 = vsel %vm3918_vm3, 0, %v3917_v38 }
 0x251   :  { %v784_v43 = vsub.s32 32, %v783_v41  ;;  %v788_v48 = vsub.s32 4294967266, %v783_v41  ;;  %v785_v51 = vshll.u32 %v776_v20, %v783_v41 }
 0x253   :  { %v786_v37 = vshrl.u32 %v768_v42, %v784_v43  ;;  %v789_v40 = vadd.s32 127, %v788_v48  ;;  %v1105_v42 = vpop.f32.mrf.mxu0 }
 0x255   :  { %v787_v45 = vor.u32 %v786_v37, %v785_v51  ;;  %v790_v50 = vshll.u32 %v789_v40, 23 }
 0x257   :  { %v791_v54 = vor.u32 4788187, %v790_v50  ;;  %v794_v57 = vcvt.s32.f32 %v787_v45 }
 0x259   :  { %v792_v56 = vand.u32 2147483647, %v791_v54  ;;  %v4647_v54 = vld [vmem:[#allocation7 + $0x78] sm:$0xff] }
 0x25a   :  { %1558 = vmatpush.msrb.mxu0 %v4647_v54 }
 0x25b   :  { %v795_v1 = vmul.f32 %v794_v57, %v792_v56  ;;  %v4650_v56 = vld [vmem:[#allocation7 + $0x70] sm:$0xff] }
 0x25c   :  { %1559 = vmatpush.msrb.mxu0 %v4650_v56 }
 0x25d   :  { %v796_v44 = vxor.u32 2147483648, %v795_v1 }
 0x25f   :  { %v797_v2 = vsel %vm676_vm4, %v796_v44, %v795_v1  ;;  %v4655_v1 = vld [vmem:[#allocation7 + $0x68] sm:$0xff] }
 0x260   :  { %v800_v3 = vsel %vm675_vm6, %v4551_v33, %v797_v2  ;;  %1560 = vmatpush.msrb.mxu0 %v4655_v1  ;;  %v4658_v2 = vld [vmem:[#allocation7 + $0x60] sm:$0xff] }
 0x261   :  { %v802_v6 = vmul.f32 %v800_v3, %v800_v3 }
 0x262   :  { %1561 = vmatpush.msrb.mxu0 %v4658_v2 }
 0x263   :  { %v803_v63 = vmul.f32 -0.001358992, %v802_v6  ;;  %v810_v7 = vmul.f32 -0.00019511016, %v802_v6 }
 0x264   :  { %1562 = vmatpush.msrb.mxu0 %v4667_v8 }
 0x265   :  { %v804_v0 = vadd.f32 0.041655596, %v803_v63  ;;  %v811_v11 = vadd.f32 0.008332121, %v810_v7 }
 0x267   :  { %v805_v4 = vmul.f32 %v804_v0, %v802_v6  ;;  %v812_v12 = vmul.f32 %v811_v11, %v802_v6 }
 0x269   :  { %v806_v16 = vadd.f32 -0.4999988, %v805_v4  ;;  %v813_v18 = vadd.f32 -0.16666654, %v812_v12 }
 0x26b   :  { %v807_v13 = vmul.f32 %v806_v16, %v802_v6  ;;  %v814_v21 = vmul.f32 %v813_v18, %v802_v6 }
 0x26d   :  { %v808_v24 = vadd.f32 1.0, %v807_v13  ;;  %v815_v53 = vadd.f32 1.0, %v814_v21  ;;  %v4683_v13 = vld [vmem:[#allocation7 + $0x50] sm:$0xff] }
 0x26e   :  { %1563 = vmatpush.msrb.mxu0 %v4683_v13 }
 0x26f   :  { %v816_v26 = vmul.f32 %v815_v53, %v800_v3  ;;  %v825_v9 = vxor.u32 2147483648, %v808_v24 }
 0x271   :  { %v822_v17 = vxor.u32 2147483648, %v816_v26  ;;  %v826_v20 = vsel %vm824_vm8, %v825_v9, %v816_v26 }
 0x273   :  { %v823_v15 = vsel %vm821_vm7, %v808_v24, %v822_v17  ;;  %v4693_v17 = vld [vmem:[#allocation7 + $0x48] sm:$0xff] }
 0x274   :  { %v827_v30 = vsel %vm820_vm9, %v823_v15, %v826_v20  ;;  %1564 = vmatpush.msrb.mxu0 %v4693_v17 }
 0x275   :  { %v828_v34 = vsel %vm817_vm10, nan, %v827_v30 }
 0x276   :  { %v829_v38 = vsel %vm196_vm2, %v828_v34, %v4551_v33 }
 0x277   :  { %v831_v41 = vsel %vm4522_vm5, %v3978_v36, %v829_v38  ;;  %v4709_v36 = vld [vmem:[#allocation7 + $0x40] sm:$0xff] }
 0x278   :  { %v832_v43 = vmul.f32 %v4515_v22, %v831_v41  ;;  %1565 = vmatpush.msrb.mxu0 %v4709_v36 }
 0x27a   :  { %v1106_v48 = vadd.f32 %v1105_v42, %v832_v43  ;;  %867 = vmatmul.f32.vlgmr.msrb.gmra.mxu2 %v832_v43 }
 0x27c   :  { %1140 = vmatmul.f32.vlgmr.msra.gmra.mxu1 %v1106_v48 }
 0x29d   :  { %v4643_v51 = vpop.f32.mrf.mxu3 }
 0x29e   :  { %v439_v37 = vand.u32 2139095040, %v4643_v51  ;;  %v436_v50 = vand.u32 2147483647, %v4643_v51  ;;  %vm438_vm10 = vcmp.lt.s32.totalorder %v4643_v51, 0  ;;  %3979 = vtanh.f32 %v4643_v51 }
 0x2a0   :  { %v440_v40 = vshrl.u32 %v439_v37, 23  ;;  %v443_v22 = vand.u32 8388607, %v436_v50 }
 0x2a2   :  { %v3913_v45 = vadd.s32 4294967169, %v440_v40  ;;  %v444_v5 = vor.u32 8388608, %v443_v22  ;;  %v4723_v40 = vld [vmem:[#allocation7 + $0x38] sm:$0xff] }
 0x2a3   :  { %1566 = vmatpush.msrb.mxu0 %v4723_v40 }
 0x2a4   :  { %v446_v33 = vadd.s32 1, %v3913_v45  ;;  %v4691_v9 = vshll.u32 %v444_v5, 8 }
 0x2a6   :  { %vm447_vm11 = vcmp.gt.s32.totalorder %v446_v33, 0  ;;  %v485_v48 = vand.u32 65535, %v4691_v9  ;;  %v486_v37 = vshrl.u32 %v4691_v9, 16 }
 0x2a7   :  { %v448_v57 = vsel %vm447_vm11, %v446_v33, 0  ;;  %vm437_vm11 = vcmp.le.f32.partialorder %v436_v50, 0.7853982 }
 0x2a8   :  { %v450_v44 = vand.u32 31, %v448_v57  ;;  %v4663_v6 = vshrl.u32 %v448_v57, 5 }
 0x2aa   :  { %v4660_v3 = vsub.s32 32, %v450_v44  ;;  %v453_v63 = vshll.u32 %v4172_v47, %v450_v44  ;;  %v456_v7 = vshll.u32 %v6515_v49, %v450_v44  ;;  %v459_v46 = vshll.u32 %v6513_v52, %v450_v44 }
 0x2ab   :  { %v462_v12 = vshll.u32 %v6511_v55, %v450_v44  ;;  %v465_v18 = vshll.u32 %v6509_v58, %v450_v44  ;;  %vm468_vm12 = vcmp.lt.s32.totalorder %v4663_v6, 1  ;;  %vm471_vm13 = vcmp.lt.s32.totalorder %v4663_v6, 4  ;;  %v4726_v44 = vld [vmem:[#allocation7 + $0x30] sm:$0xff] }
 0x2ac   :  { %v454_v0 = vshrl.u32 %v6515_v49, %v4660_v3  ;;  %v457_v11 = vshrl.u32 %v6513_v52, %v4660_v3  ;;  %v460_v4 = vshrl.u32 %v6511_v55, %v4660_v3  ;;  %v463_v16 = vshrl.u32 %v6509_v58, %v4660_v3  ;;  %1567 = vmatpush.msrb.mxu0 %v4726_v44 }
 0x2ad   :  { %v466_v60 = vshrl.u32 %v6507_v61, %v4660_v3  ;;  %vm470_vm14 = vcmp.lt.s32.totalorder %v4663_v6, 3  ;;  %vm469_vm0 = vcmp.lt.s32.totalorder %v4663_v6, 2 }
 0x2ae   :  { %v4685_v21 = vor.u32 %v454_v0, %v453_v63  ;;  %v4687_v24 = vor.u32 %v457_v11, %v456_v7  ;;  %v461_v53 = vor.u32 %v460_v4, %v459_v46  ;;  %v464_v25 = vor.u32 %v463_v16, %v462_v12  ;;  %v4729_v11 = vld [vmem:[#allocation7 + $0x28] sm:$0xff] }
 0x2af   :  { %v467_v26 = vor.u32 %v466_v60, %v465_v18  ;;  %1568 = vmatpush.msrb.mxu0 %v4729_v11  ;;  %v4732_v60 = vld [vmem:[#allocation7 + $0x20] sm:$0xff] }
 0x2b0   :  { %v476_v15 = vsel %vm468_vm12, %v4685_v21, %v4687_v24  ;;  %v480_v20 = vsel %vm468_vm12, %v4687_v24, %v461_v53  ;;  %v477_v30 = vsel %vm471_vm13, %v464_v25, 920167782 }
 0x2b1   :  { %v481_v34 = vsel %vm471_vm13, %v467_v26, 1326507024  ;;  %v478_v38 = vsel %vm470_vm14, %v461_v53, %v477_v30  ;;  %1569 = vmatpush.msrb.mxu0 %v4732_v60 }
 0x2b2   :  { %v482_v41 = vsel %vm470_vm14, %v464_v25, %v481_v34  ;;  %v479_v42 = vsel %vm469_vm0, %v476_v15, %v478_v38  ;;  %v4736_v38 = vld [vmem:[#allocation7 + $0x18] sm:$0xff] }
 0x2b3   :  { %v483_v43 = vsel %vm469_vm0, %v480_v20, %v482_v41  ;;  %v509_v22 = vand.u32 65535, %v479_v42  ;;  %v510_v57 = vshrl.u32 %v479_v42, 16  ;;  %1570 = vmatpush.msrb.mxu0 %v4736_v38 }
 0x2b4   :  { %v487_v45 = vand.u32 65535, %v483_v43  ;;  %v488_v33 = vshrl.u32 %v483_v43, 16  ;;  %v473_v43 = vsel %vm471_vm13, %v461_v53, 2102212464 }
 0x2b5   :  { %v512_v7 = vmul.u32 %v510_v57, %v485_v48  ;;  %v513_v0 = vmul.u32 %v509_v22, %v486_v37  ;;  %v511_v16 = vmul.u32 %v509_v22, %v485_v48  ;;  %v514_v15 = vmul.u32 %v510_v57, %v486_v37 }
 0x2b6   :  { %v490_v5 = vmul.u32 %v488_v33, %v485_v48  ;;  %v491_v63 = vmul.u32 %v487_v45, %v486_v37  ;;  %v489_v46 = vmul.u32 %v487_v45, %v485_v48  ;;  %v492_v12 = vmul.u32 %v488_v33, %v486_v37  ;;  %v1543_v45 = vld [vmem:[#allocation7 + $0x10] sm:$0xff] }
 0x2b7   :  { %v515_v18 = vshll.u32 %v512_v7, 16  ;;  %v517_v30 = vshll.u32 %v513_v0, 16  ;;  %v452_v33 = vshrl.u32 %v4172_v47, %v4660_v3  ;;  %1571 = vmatpush.msrb.mxu0 %v1543_v45  ;;  %v518_v3 = vshrl.u32 %v513_v0, 16 }
 0x2b8   :  { %v493_v4 = vshll.u32 %v490_v5, 16  ;;  %v495_v25 = vshll.u32 %v491_v63, 16  ;;  %v494_v22 = vshrl.u32 %v490_v5, 16 }
 0x2b9   :  { %vm519_vm3 = vc.u32 %v511_v16, %v515_v18  ;;  %v521_v34 = vadd.s32 %v515_v18, %v511_v16  ;;  %v1542_v16 = vld [vmem:[#allocation7 + $0x8] sm:$0xff]  ;;  %v472_v53 = vsel %vm468_vm12, %v452_v33, %v4685_v21  ;;  %v474_v18 = vsel %vm470_vm14, %v4687_v24, %v473_v43 }
 0x2ba   :  { %vm497_vm1 = vc.u32 %v489_v46, %v493_v4  ;;  %v499_v26 = vadd.s32 %v493_v4, %v489_v46  ;;  %v520_v42 = vsel %vm519_vm3, 1, %v4178_v31  ;;  %v516_v4 = vshrl.u32 %v512_v7, 16  ;;  %1572 = vmatpush.msrb.mxu0 %v1542_v16  ;;  %v1540_v7 = vld [vmem:[#allocation4 + $0x18] sm:$0xff] }
 0x2bb   :  { %v498_v20 = vsel %vm497_vm1, 1, %v4178_v31  ;;  %v522_v37 = vadd.s32 %v520_v42, %v514_v15  ;;  %vm523_vm6 = vc.u32 %v521_v34, %v517_v30  ;;  %v1541_v15 = vld [vmem:[#allocation7] sm:$0xff]  ;;  %v475_v42 = vsel %vm469_vm0, %v472_v53, %v474_v18 }
 0x2bc   :  { %v500_v41 = vadd.s32 %v498_v20, %v492_v12  ;;  %vm501_vm4 = vc.u32 %v499_v26, %v495_v25  ;;  %v524_v46 = vsel %vm523_vm6, 1, %v4178_v31  ;;  %v496_v25 = vshrl.u32 %v491_v63, 16  ;;  %1573 = vmatpush.msrb.mxu0 %v1541_v15 }
 0x2bd   :  { %v502_v48 = vsel %vm501_vm4, 1, %v4178_v31  ;;  %v526_v12 = vadd.s32 %v524_v46, %v522_v37  ;;  %1574 = vmatmul.f32.vlgmr.msrb.gmra.mxu0 %v1540_v7  ;;  %v529_v24 = vmul.u32 %v4691_v9, %v475_v42  ;;  %vm592_vm12 = vcmp.ge.s32.totalorder %v4502_v19, 8 }
 0x2be   :  { %v504_v57 = vadd.s32 %v502_v48, %v500_v41  ;;  %v525_v41 = vadd.s32 %v521_v34, %v517_v30  ;;  %2028 = vmatpush.msra.mxu0 %v4647_v54  ;;  %vm434_vm0 = vcmp.lt.s32.totalorder %v4502_v19, 8  ;;  %vm579_vm3 = vweird.f32 %v4643_v51  ;;  %vm4797_vm4 = vmand %vm592_vm12, %vm355_vm15 }
 0x2bf   :  { %v527_v5 = vadd.s32 %v526_v12, %v516_v4 }
 0x2c0   :  { %v505_v26 = vadd.s32 %v504_v57, %v494_v22  ;;  %2029 = vmatpush.msra.mxu0 %v4650_v56  ;;  %v4768_v57 = vld [vmem:[#allocation12 + $0x20] sm:$0xff] }
 0x2c1   :  { %v528_v48 = vadd.s32 %v527_v5, %v518_v3  ;;  %898 = vmatpush.msrb.mxu3 %v4768_v57 }
 0x2c2   :  { %v506_v20 = vadd.s32 %v505_v26, %v496_v25  ;;  %2030 = vmatpush.msra.mxu0 %v4655_v1 }
 0x2c3   :  { %v532_v21 = vadd.s32 1, %v528_v48 }
 0x2c4   :  { %vm531_vm7 = vc.u32 %v506_v20, %v525_v41  ;;  %2031 = vmatpush.msra.mxu0 %v4658_v2 }
 0x2c5   :  { %v533_v63 = vsel %vm531_vm7, %v532_v21, %v528_v48 }
 0x2c6   :  { %v534_v0 = vadd.s32 %v533_v63, %v529_v24  ;;  %2032 = vmatpush.msra.mxu0 %v4667_v8 }
 0x2c8   :  { %v535_v30 = vadd.s32 536870912, %v534_v0  ;;  %2033 = vmatpush.msra.mxu0 %v4683_v13  ;;  %v530_v13 = vadd.s32 %v525_v41, %v506_v20 }
 0x2ca   :  { %v536_v34 = vshrl.u32 %v535_v30, 30  ;;  %2034 = vmatpush.msra.mxu0 %v4693_v17 }
 0x2cc   :  { %v537_v6 = vshll.u32 %v536_v34, 30  ;;  %2035 = vmatpush.msra.mxu0 %v4709_v36  ;;  %v560_v53 = vsub.s32 4, %v536_v34 }
 0x2ce   :  { %v538_v43 = vsub.s32 %v534_v0, %v537_v6  ;;  %2036 = vmatpush.msra.mxu0 %v4723_v40  ;;  %v561_v3 = vsel %vm438_vm10, %v560_v53, %v536_v34 }
 0x2cf   :  { %v563_v20 = vsel %vm437_vm11, 0, %v561_v3 }
 0x2d0   :  { %vm539_vm8 = vcmp.lt.s32.totalorder %v538_v43, 0  ;;  %v540_v54 = vsub.s32 0, %v538_v43  ;;  %2037 = vmatpush.msra.mxu0 %v4726_v44  ;;  %v580_v48 = vadd.s32 3, %v563_v20 }
 0x2d2   :  { %v541_v56 = vsel %vm539_vm8, %v540_v54, %v538_v43  ;;  %2038 = vmatpush.msra.mxu0 %v4729_v11  ;;  %v4771_v11 = vld [vmem:[#allocation12 + $0x18] sm:$0xff]  ;;  %v581_v63 = vand.u32 3, %v580_v48 }
 0x2d3   :  { %v542_v1 = vclz %v541_v56  ;;  %899 = vmatpush.msrb.mxu3 %v4771_v11 }
 0x2d4   :  { %2039 = vmatpush.msra.mxu0 %v4732_v60  ;;  %vm583_vm13 = vcmp.eq.s32.totalorder %v581_v63, 0  ;;  %vm586_vm14 = vcmp.eq.s32.totalorder %v581_v63, 2  ;;  %vm582_vm1 = vcmp.lt.s32.totalorder %v581_v63, 2 }
 0x2d5   :  { %v3914_v2 = vadd.s32 4294967294, %v542_v1 }
 0x2d6   :  { %2040 = vmatpush.msra.mxu0 %v4736_v38  ;;  %v4774_v38 = vld [vmem:[#allocation12 + $0x10] sm:$0xff] }
 0x2d7   :  { %vm3915_vm9 = vcmp.lt.s32.totalorder %v3914_v2, 0  ;;  %900 = vmatpush.msrb.mxu3 %v4774_v38 }
 0x2d8   :  { %v545_v8 = vsel %vm3915_vm9, 0, %v3914_v2  ;;  %2041 = vmatpush.msra.mxu0 %v1543_v45  ;;  %v4792_v2 = vld [vmem:[%s6505_s6] ss:$0 sm:$0xff] }
 0x2d9   :  { %v546_v9 = vsub.s32 32, %v545_v8  ;;  %v550_v17 = vsub.s32 4294967266, %v545_v8  ;;  %v547_v37 = vshll.u32 %v538_v43, %v545_v8  ;;  %901 = vmatpush.msrb.mxu3 %v4536_v28 }
 0x2da   :  { %2042 = vmatpush.msra.mxu0 %v1542_v16 }
 0x2db   :  { %v548_v36 = vshrl.u32 %v530_v13, %v546_v9  ;;  %v551_v33 = vadd.s32 127, %v550_v17  ;;  %902 = vmatpush.msrb.mxu3 %v4539_v35  ;;  %v3980_v17 = vpop.eup %3979 }
 0x2dc   :  { %2043 = vmatpush.msra.mxu0 %v1541_v15 }
 0x2dd   :  { %v549_v40 = vor.u32 %v548_v36, %v547_v37  ;;  %v552_v22 = vshll.u32 %v551_v33, 23 }
 0x2df   :  { %v553_v44 = vor.u32 4788187, %v552_v22  ;;  %v556_v46 = vcvt.s32.f32 %v549_v40 }
 0x2e1   :  { %v554_v60 = vand.u32 2147483647, %v553_v44 }
 0x2e3   :  { %v557_v45 = vmul.f32 %v556_v46, %v554_v60 }
 0x2e5   :  { %v558_v4 = vxor.u32 2147483648, %v557_v45 }
 0x2e7   :  { %v559_v12 = vsel %vm438_vm10, %v558_v4, %v557_v45 }
 0x2e8   :  { %v562_v16 = vsel %vm437_vm11, %v4643_v51, %v559_v12 }
 0x2e9   :  { %v564_v18 = vmul.f32 %v562_v16, %v562_v16 }
 0x2eb   :  { %v565_v25 = vmul.f32 -0.001358992, %v564_v18  ;;  %v572_v26 = vmul.f32 -0.00019511016, %v564_v18 }
 0x2ed   :  { %v566_v5 = vadd.f32 0.041655596, %v565_v25  ;;  %v573_v15 = vadd.f32 0.008332121, %v572_v26 }
 0x2ef   :  { %v567_v28 = vmul.f32 %v566_v5, %v564_v18  ;;  %v574_v41 = vmul.f32 %v573_v15, %v564_v18 }
 0x2f1   :  { %v568_v7 = vadd.f32 -0.4999988, %v567_v28  ;;  %v575_v42 = vadd.f32 -0.16666654, %v574_v41 }
 0x2f3   :  { %v569_v35 = vmul.f32 %v568_v7, %v564_v18  ;;  %v576_v21 = vmul.f32 %v575_v42, %v564_v18 }
 0x2f5   :  { %v570_v24 = vadd.f32 1.0, %v569_v35  ;;  %v577_v50 = vadd.f32 1.0, %v576_v21 }
 0x2f7   :  { %v578_v0 = vmul.f32 %v577_v50, %v562_v16  ;;  %v587_v30 = vxor.u32 2147483648, %v570_v24 }
 0x2f9   :  { %v4784_v6 = vpop.f32.mrf.mxu1  ;;  %v584_v34 = vxor.u32 2147483648, %v578_v0  ;;  %v588_v56 = vsel %vm586_vm14, %v587_v30, %v578_v0 }
 0x2fa   :  { %v1147_v43 = vand.u32 2139095040, %v4784_v6  ;;  %v1144_v33 = vand.u32 2147483647, %v4784_v6  ;;  %3981 = vtanh.f32 %v4784_v6 }
 0x2fb   :  { %v585_v54 = vsel %vm583_vm13, %v570_v24, %v584_v34 }
 0x2fc   :  { %v1148_v1 = vshrl.u32 %v1147_v43, 23  ;;  %v589_v8 = vsel %vm582_vm1, %v585_v54, %v588_v56  ;;  %v1151_v45 = vand.u32 8388607, %v1144_v33 }
 0x2fd   :  { %v590_v9 = vsel %vm579_vm3, nan, %v589_v8  ;;  %v868_v60 = vpop.f32.mrf.mxu2 }
 0x2fe   :  { %v3922_v37 = vadd.s32 4294967169, %v1148_v1  ;;  %v591_v36 = vsel %vm434_vm0, %v590_v9, %v4643_v51  ;;  %v1152_v51 = vor.u32 8388608, %v1151_v45 }
 0x2ff   :  { %v595_v40 = vsel %vm4797_vm4, %v3980_v17, %v591_v36 }
 0x300   :  { %v1154_v22 = vadd.s32 1, %v3922_v37  ;;  %v596_v44 = vmul.f32 %v4792_v2, %v595_v40  ;;  %v4823_v50 = vshll.u32 %v1152_v51, 8 }
 0x302   :  { %vm1155_vm15 = vcmp.gt.s32.totalorder %v1154_v22, 0  ;;  %598 = vst [vmem:[#allocation13] sm:$0xff] %v596_v44  ;;  %v869_v46 = vadd.f32 %v868_v60, %v596_v44  ;;  %v1193_v8 = vand.u32 65535, %v4823_v50  ;;  %v1194_v9 = vshrl.u32 %v4823_v50, 16 }
 0x303   :  { %v1156_v4 = vsel %vm1155_vm15, %v1154_v22, 0  ;;  %vm1146_vm15 = vcmp.lt.s32.totalorder %v4784_v6, 0 }
 0x304   :  { %v1158_v12 = vand.u32 31, %v1156_v4  ;;  %903 = vmatmul.f32.vlgmr.msrb.gmra.mxu3 %v869_v46  ;;  %v4810_v53 = vshrl.u32 %v1156_v4, 5 }
 0x306   :  { %v1159_v16 = vsub.s32 32, %v1158_v12  ;;  %v1161_v18 = vshll.u32 %v4172_v47, %v1158_v12  ;;  %v1164_v25 = vshll.u32 %v6515_v49, %v1158_v12  ;;  %v1167_v5 = vshll.u32 %v6513_v52, %v1158_v12 }
 0x307   :  { %v1170_v20 = vshll.u32 %v6511_v55, %v1158_v12  ;;  %v1173_v41 = vshll.u32 %v6509_v58, %v1158_v12  ;;  %vm1176_vm6 = vcmp.lt.s32.totalorder %v4810_v53, 1  ;;  %vm1179_vm7 = vcmp.lt.s32.totalorder %v4810_v53, 4 }
 0x308   :  { %v1162_v26 = vshrl.u32 %v6515_v49, %v1159_v16  ;;  %v1165_v3 = vshrl.u32 %v6513_v52, %v1159_v16  ;;  %v1168_v15 = vshrl.u32 %v6511_v55, %v1159_v16  ;;  %v1171_v28 = vshrl.u32 %v6509_v58, %v1159_v16 }
 0x309   :  { %v1174_v7 = vshrl.u32 %v6507_v61, %v1159_v16  ;;  %vm1178_vm8 = vcmp.lt.s32.totalorder %v4810_v53, 3  ;;  %vm1177_vm9 = vcmp.lt.s32.totalorder %v4810_v53, 2  ;;  %v4869_v53 = vld [vmem:[#allocation10 + $0x68] sm:$0xff] }
 0x30a   :  { %v1163_v42 = vor.u32 %v1162_v26, %v1161_v18  ;;  %v1166_v48 = vor.u32 %v1165_v3, %v1164_v25  ;;  %v1169_v35 = vor.u32 %v1168_v15, %v1167_v5  ;;  %v1172_v21 = vor.u32 %v1171_v28, %v1170_v20 }
 0x30b   :  { %v1175_v24 = vor.u32 %v1174_v7, %v1173_v41 }
 0x30c   :  { %v1184_v63 = vsel %vm1176_vm6, %v1163_v42, %v1166_v48  ;;  %v1188_v0 = vsel %vm1176_vm6, %v1166_v48, %v1169_v35  ;;  %v1185_v30 = vsel %vm1179_vm7, %v1172_v21, 920167782  ;;  %v1181_v7 = vsel %vm1179_vm7, %v1169_v35, 2102212464 }
 0x30d   :  { %v1189_v34 = vsel %vm1179_vm7, %v1175_v24, 1326507024  ;;  %v1186_v43 = vsel %vm1178_vm8, %v1169_v35, %v1185_v30 }
 0x30e   :  { %v1190_v54 = vsel %vm1178_vm8, %v1172_v21, %v1189_v34  ;;  %v1187_v56 = vsel %vm1177_vm9, %v1184_v63, %v1186_v43  ;;  %v1160_v63 = vshrl.u32 %v4172_v47, %v1159_v16 }
 0x30f   :  { %v1191_v1 = vsel %vm1177_vm9, %v1188_v0, %v1190_v54  ;;  %v1217_v36 = vand.u32 65535, %v1187_v56  ;;  %v1218_v40 = vshrl.u32 %v1187_v56, 16 }
 0x310   :  { %v1195_v17 = vand.u32 65535, %v1191_v1  ;;  %v1196_v37 = vshrl.u32 %v1191_v1, 16  ;;  %v1180_v56 = vsel %vm1176_vm6, %v1160_v63, %v1163_v42  ;;  %v1182_v1 = vsel %vm1178_vm8, %v1166_v48, %v1181_v7  ;;  %v4863_v48 = vld [vmem:[#allocation10 + $0x70] sm:$0xff]  ;;  %v4900_v7 = vld [vmem:[#allocation10 + $0x40] sm:$0xff]  ;;  %v4906_v63 = vld [vmem:[#allocation10 + $0x38] sm:$0xff] }
 0x311   :  { %v1220_v60 = vmul.u32 %v1218_v40, %v1193_v8  ;;  %v1221_v46 = vmul.u32 %v1217_v36, %v1194_v9  ;;  %v1219_v51 = vmul.u32 %v1217_v36, %v1193_v8  ;;  %v1222_v3 = vmul.u32 %v1218_v40, %v1194_v9 }
 0x312   :  { %v1198_v22 = vmul.u32 %v1196_v37, %v1193_v8  ;;  %v1199_v44 = vmul.u32 %v1195_v17, %v1194_v9  ;;  %v1197_v45 = vmul.u32 %v1195_v17, %v1193_v8  ;;  %v1200_v12 = vmul.u32 %v1196_v37, %v1194_v9 }
 0x313   :  { %v1223_v18 = vshll.u32 %v1220_v60, 16  ;;  %v1225_v15 = vshll.u32 %v1221_v46, 16  ;;  %v1224_v43 = vshrl.u32 %v1220_v60, 16  ;;  %v1226_v9 = vshrl.u32 %v1221_v46, 16  ;;  %v4859_v60 = vld [vmem:[#allocation10 + $0x78] sm:$0xff] }
 0x314   :  { %v1201_v4 = vshll.u32 %v1198_v22, 16  ;;  %v1203_v25 = vshll.u32 %v1199_v44, 16  ;;  %v1202_v0 = vshrl.u32 %v1198_v22, 16  ;;  %v1204_v8 = vshrl.u32 %v1199_v44, 16  ;;  %1321 = vmatpush.msra.mxu2 %v4859_v60  ;;  %v4865_v44 = vld [vmem:[#allocation9 + $0x78] sm:$0xff] }
 0x315   :  { %vm1227_vm11 = vc.u32 %v1219_v51, %v1223_v18  ;;  %v1229_v20 = vadd.s32 %v1223_v18, %v1219_v51  ;;  %v1183_v16 = vsel %vm1177_vm9, %v1180_v56, %v1182_v1  ;;  %1594 = vmatpush.msrb.mxu1 %v4865_v44  ;;  %v4877_v51 = vld [vmem:[#allocation9 + $0x68] sm:$0xff]  ;;  %v4879_v18 = vld [vmem:[#allocation10 + $0x58] sm:$0xff]  ;;  %v4920_v1 = vld [vmem:[#allocation10 + $0x20] sm:$0xff]  ;;  %vm4949_vm6 = vcmp.le.f32.partialorder %v1144_v33, 0.7853982 }
 0x316   :  { %vm1205_vm10 = vc.u32 %v1197_v45, %v1201_v4  ;;  %v1207_v26 = vadd.s32 %v1201_v4, %v1197_v45  ;;  %v1228_v41 = vsel %vm1227_vm11, 1, %v4178_v31  ;;  %v1237_v45 = vmul.u32 %v4823_v50, %v1183_v16  ;;  %1322 = vmatpush.msra.mxu2 %v4863_v48  ;;  %v4871_v4 = vld [vmem:[#allocation9 + $0x70] sm:$0xff]  ;;  %v4875_v50 = vld [vmem:[#allocation10 + $0x60] sm:$0xff]  ;;  %v4916_v56 = vld [vmem:[#allocation10 + $0x28] sm:$0xff] }
 0x317   :  { %v1206_v5 = vsel %vm1205_vm10, 1, %v4178_v31  ;;  %v1230_v24 = vadd.s32 %v1228_v41, %v1222_v3  ;;  %vm1231_vm13 = vc.u32 %v1229_v20, %v1225_v15  ;;  %v1233_v36 = vadd.s32 %v1229_v20, %v1225_v15  ;;  %1595 = vmatpush.msrb.mxu1 %v4871_v4  ;;  %v4887_v3 = vld [vmem:[#allocation10 + $0x50] sm:$0xff]  ;;  %v4894_v20 = vld [vmem:[#allocation10 + $0x48] sm:$0xff]  ;;  %v4924_v16 = vld [vmem:[#allocation10 + $0x18] sm:$0xff] }
 0x318   :  { %v1208_v28 = vadd.s32 %v1206_v5, %v1200_v12  ;;  %vm1209_vm12 = vc.u32 %v1207_v26, %v1203_v25  ;;  %v1232_v34 = vsel %vm1231_vm13, 1, %v4178_v31  ;;  %1323 = vmatpush.msra.mxu2 %v4869_v53  ;;  %v4885_v26 = vld [vmem:[#allocation9 + $0x60] sm:$0xff]  ;;  %v4889_v5 = vld [vmem:[#allocation9 + $0x58] sm:$0xff]  ;;  %vm1287_vm10 = vweird.f32 %v4784_v6 }
 0x319   :  { %v1210_v21 = vsel %vm1209_vm12, 1, %v4178_v31  ;;  %v1234_v54 = vadd.s32 %v1232_v34, %v1230_v24  ;;  %1596 = vmatpush.msrb.mxu1 %v4877_v51 }
 0x31a   :  { %v1212_v30 = vadd.s32 %v1210_v21, %v1208_v28  ;;  %1324 = vmatpush.msra.mxu2 %v4875_v50  ;;  %v4896_v28 = vld [vmem:[#allocation9 + $0x50] sm:$0xff]  ;;  %v4902_v21 = vld [vmem:[#allocation9 + $0x48] sm:$0xff] }
 0x31b   :  { %v1235_v17 = vadd.s32 %v1234_v54, %v1224_v43  ;;  %1597 = vmatpush.msrb.mxu1 %v4885_v26  ;;  %v4912_v43 = vld [vmem:[#allocation10 + $0x30] sm:$0xff] }
 0x31c   :  { %v1213_v35 = vadd.s32 %v1212_v30, %v1202_v0  ;;  %1325 = vmatpush.msra.mxu2 %v4879_v18  ;;  %v4908_v0 = vld [vmem:[#allocation9 + $0x40] sm:$0xff] }
 0x31d   :  { %v1236_v40 = vadd.s32 %v1235_v17, %v1226_v9  ;;  %1598 = vmatpush.msrb.mxu1 %v4889_v5 }
 0x31e   :  { %v1214_v37 = vadd.s32 %v1213_v35, %v1204_v8  ;;  %1326 = vmatpush.msra.mxu2 %v4887_v3 }
 0x31f   :  { %v1240_v22 = vadd.s32 1, %v1236_v40  ;;  %1599 = vmatpush.msrb.mxu1 %v4896_v28 }
 0x320   :  { %vm1239_vm14 = vc.u32 %v1214_v37, %v1233_v36  ;;  %1327 = vmatpush.msra.mxu2 %v4894_v20  ;;  %v1238_v35 = vadd.s32 %v1233_v36, %v1214_v37  ;;  %v4932_v37 = vld [vmem:[#allocation10 + $0x8] sm:$0xff] }
 0x321   :  { %v1241_v42 = vsel %vm1239_vm14, %v1240_v22, %v1236_v40  ;;  %1600 = vmatpush.msrb.mxu1 %v4902_v21 }
 0x322   :  { %v1242_v46 = vadd.s32 %v1241_v42, %v1237_v45  ;;  %1328 = vmatpush.msra.mxu2 %v4900_v7  ;;  %v4928_v45 = vld [vmem:[#allocation10 + $0x10] sm:$0xff] }
 0x323   :  { %1601 = vmatpush.msrb.mxu1 %v4908_v0 }
 0x324   :  { %v1243_v12 = vadd.s32 536870912, %v1242_v46  ;;  %1329 = vmatpush.msra.mxu2 %v4906_v63 }
 0x325   :  { %1602 = vmatpush.msrb.mxu1 %v4607_v27 }
 0x326   :  { %v4881_v25 = vshrl.u32 %v1243_v12, 30  ;;  %1330 = vmatpush.msra.mxu2 %v4912_v43 }
 0x327   :  { %1603 = vmatpush.msrb.mxu1 %v4609_v10 }
 0x328   :  { %v1245_v15 = vshll.u32 %v4881_v25, 30  ;;  %1331 = vmatpush.msra.mxu2 %v4916_v56 }
 0x329   :  { %1604 = vmatpush.msrb.mxu1 %v4612_v29 }
 0x32a   :  { %v1246_v41 = vsub.s32 %v1242_v46, %v1245_v15  ;;  %1332 = vmatpush.msra.mxu2 %v4920_v1  ;;  %v4936_v46 = vld [vmem:[#allocation10] sm:$0xff] }
 0x32b   :  { %1605 = vmatpush.msrb.mxu1 %v4615_v39 }
 0x32c   :  { %vm1247_vm1 = vcmp.lt.s32.totalorder %v1246_v41, 0  ;;  %v1248_v24 = vsub.s32 0, %v1246_v41  ;;  %1333 = vmatpush.msra.mxu2 %v4924_v16 }
 0x32d   :  { %1606 = vmatpush.msrb.mxu1 %v4618_v14 }
 0x32e   :  { %v1249_v30 = vsel %vm1247_vm1, %v1248_v24, %v1246_v41  ;;  %1334 = vmatpush.msra.mxu2 %v4928_v45 }
 0x32f   :  { %v1250_v34 = vclz %v1249_v30  ;;  %1607 = vmatpush.msrb.mxu1 %v4621_v32 }
 0x330   :  { %1335 = vmatpush.msra.mxu2 %v4932_v37 }
 0x331   :  { %v3923_v54 = vadd.s32 4294967294, %v1250_v34  ;;  %1608 = vmatpush.msrb.mxu1 %v4625_v59 }
 0x332   :  { %1336 = vmatpush.msra.mxu2 %v4936_v46 }
 0x333   :  { %vm3924_vm3 = vcmp.lt.s32.totalorder %v3923_v54, 0  ;;  %1609 = vmatpush.msrb.mxu1 %v4628_v62  ;;  %v1268_v62 = vsub.s32 4, %v4881_v25 }
 0x334   :  { %v1253_v8 = vsel %vm3924_vm3, 0, %v3923_v54  ;;  %1791 = vmatpush.msrb.mxu2 %v4859_v60  ;;  %v3982_v54 = vpop.eup %3981 }
 0x335   :  { %v1254_v9 = vsub.s32 32, %v1253_v8  ;;  %v1258_v17 = vsub.s32 4294967266, %v1253_v8  ;;  %v1255_v40 = vshll.u32 %v1246_v41, %v1253_v8  ;;  %2064 = vmatpush.msra.mxu1 %v4865_v44  ;;  %v1269_v44 = vsel %vm1146_vm15, %v1268_v62, %v4881_v25 }
 0x336   :  { %1792 = vmatpush.msrb.mxu2 %v4863_v48  ;;  %v1271_v41 = vsel %vm4949_vm6, 0, %v1269_v44 }
 0x337   :  { %v1256_v22 = vshrl.u32 %v1238_v35, %v1254_v9  ;;  %v1259_v27 = vadd.s32 127, %v1258_v17  ;;  %2065 = vmatpush.msra.mxu1 %v4871_v4  ;;  %v1288_v25 = vadd.s32 3, %v1271_v41  ;;  %v4990_v35 = vld [vmem:[%s6502_s3] ss:$0 sm:$0xff] }
 0x338   :  { %1793 = vmatpush.msrb.mxu2 %v4869_v53 }
 0x339   :  { %v1257_v42 = vor.u32 %v1256_v22, %v1255_v40  ;;  %v1260_v10 = vshll.u32 %v1259_v27, 23  ;;  %2066 = vmatpush.msra.mxu1 %v4877_v51 }
 0x33a   :  { %1794 = vmatpush.msrb.mxu2 %v4875_v50  ;;  %v1575_v8 = vpop.f32.mrf.mxu0 }
 0x33b   :  { %v1261_v36 = vor.u32 4788187, %v1260_v10  ;;  %v1264_v12 = vcvt.s32.f32 %v1257_v42  ;;  %2067 = vmatpush.msra.mxu1 %v4885_v26 }
 0x33c   :  { %1795 = vmatpush.msrb.mxu2 %v4879_v18 }
 0x33d   :  { %v1262_v29 = vand.u32 2147483647, %v1261_v36  ;;  %2068 = vmatpush.msra.mxu1 %v4889_v5 }
 0x33e   :  { %1796 = vmatpush.msrb.mxu2 %v4887_v3 }
 0x33f   :  { %v1265_v39 = vmul.f32 %v1264_v12, %v1262_v29  ;;  %2069 = vmatpush.msra.mxu1 %v4896_v28 }
 0x340   :  { %1797 = vmatpush.msrb.mxu2 %v4894_v20  ;;  %v1289_v20 = vand.u32 3, %v1288_v25 }
 0x341   :  { %v1266_v15 = vxor.u32 2147483648, %v1265_v39  ;;  %2070 = vmatpush.msra.mxu1 %v4902_v21 }
 0x342   :  { %1798 = vmatpush.msrb.mxu2 %v4900_v7  ;;  %vm1291_vm7 = vcmp.eq.s32.totalorder %v1289_v20, 0  ;;  %vm1294_vm8 = vcmp.eq.s32.totalorder %v1289_v20, 2  ;;  %vm1290_vm9 = vcmp.lt.s32.totalorder %v1289_v20, 2 }
 0x343   :  { %v1267_v32 = vsel %vm1146_vm15, %v1266_v15, %v1265_v39  ;;  %2071 = vmatpush.msra.mxu1 %v4908_v0 }
 0x344   :  { %v1270_v59 = vsel %vm4949_vm6, %v4784_v6, %v1267_v32  ;;  %1799 = vmatpush.msrb.mxu2 %v4906_v63 }
 0x345   :  { %v1272_v60 = vmul.f32 %v1270_v59, %v1270_v59 }
 0x346   :  { %1800 = vmatpush.msrb.mxu2 %v4912_v43 }
 0x347   :  { %v1273_v33 = vmul.f32 -0.001358992, %v1272_v60  ;;  %v1280_v48 = vmul.f32 -0.00019511016, %v1272_v60 }
 0x348   :  { %1801 = vmatpush.msrb.mxu2 %v4916_v56 }
 0x349   :  { %v1274_v53 = vadd.f32 0.041655596, %v1273_v33  ;;  %v1281_v4 = vadd.f32 0.008332121, %v1280_v48 }
 0x34a   :  { %1802 = vmatpush.msrb.mxu2 %v4920_v1 }
 0x34b   :  { %v1275_v50 = vmul.f32 %v1274_v53, %v1272_v60  ;;  %v1282_v24 = vmul.f32 %v1281_v4, %v1272_v60 }
 0x34c   :  { %1803 = vmatpush.msrb.mxu2 %v4924_v16 }
 0x34d   :  { %v1276_v51 = vadd.f32 -0.4999988, %v1275_v50  ;;  %v1283_v18 = vadd.f32 -0.16666654, %v1282_v24 }
 0x34e   :  { %1804 = vmatpush.msrb.mxu2 %v4928_v45 }
 0x34f   :  { %v1277_v26 = vmul.f32 %v1276_v51, %v1272_v60  ;;  %v1284_v3 = vmul.f32 %v1283_v18, %v1272_v60 }
 0x350   :  { %1805 = vmatpush.msrb.mxu2 %v4932_v37 }
 0x351   :  { %v1278_v5 = vadd.f32 1.0, %v1277_v26  ;;  %v1285_v30 = vadd.f32 1.0, %v1284_v3 }
 0x352   :  { %1806 = vmatpush.msrb.mxu2 %v4936_v46 }
 0x353   :  { %v1286_v34 = vmul.f32 %v1285_v30, %v1270_v59  ;;  %v1295_v28 = vxor.u32 2147483648, %v1278_v5 }
 0x355   :  { %v1292_v7 = vxor.u32 2147483648, %v1286_v34  ;;  %v1296_v63 = vsel %vm1294_vm8, %v1295_v28, %v1286_v34 }
 0x357   :  { %v1293_v21 = vsel %vm1291_vm7, %v1278_v5, %v1292_v7 }
 0x358   :  { %v1297_v0 = vsel %vm1290_vm9, %v1293_v21, %v1296_v63 }
 0x359   :  { %v1298_v43 = vsel %vm1287_vm10, nan, %v1297_v0 }
 0x35a   :  { %v1299_v56 = vsel %vm196_vm2, %v1298_v43, %v4784_v6 }
 0x35b   :  { %v1301_v1 = vsel %vm4522_vm5, %v3982_v54, %v1299_v56 }
 0x35c   :  { %v1302_v9 = vmul.f32 %v4990_v35, %v1301_v1 }
 0x35e   :  { %v1576_v17 = vadd.f32 %v1575_v8, %v1302_v9  ;;  %1337 = vmatmul.f32.vlgmr.msra.gmra.mxu2 %v1302_v9 }
 0x360   :  { %1610 = vmatmul.f32.vlgmr.msrb.gmra.mxu1 %v1576_v17 }
 0x387   :  { %v4994_v16 = vpop.f32.mrf.mxu3 }
 0x388   :  { %v910_v6 = vand.u32 2139095040, %v4994_v16  ;;  %v907_v27 = vand.u32 2147483647, %v4994_v16  ;;  %3983 = vtanh.f32 %v4994_v16 }
 0x38a   :  { %v911_v40 = vshrl.u32 %v910_v6, 23  ;;  %v914_v42 = vand.u32 8388607, %v907_v27 }
 0x38c   :  { %v3919_v22 = vadd.s32 4294967169, %v911_v40  ;;  %v915_v46 = vor.u32 8388608, %v914_v42 }
 0x38e   :  { %v917_v45 = vadd.s32 1, %v3919_v22  ;;  %v5020_v24 = vshll.u32 %v915_v46, 8 }
 0x390   :  { %vm918_vm11 = vcmp.gt.s32.totalorder %v917_v45, 0  ;;  %v956_v34 = vand.u32 65535, %v5020_v24  ;;  %v957_v28 = vshrl.u32 %v5020_v24, 16 }
 0x391   :  { %v919_v10 = vsel %vm918_vm11, %v917_v45, 0  ;;  %vm909_vm11 = vcmp.lt.s32.totalorder %v4994_v16, 0 }
 0x392   :  { %v921_v37 = vand.u32 31, %v919_v10  ;;  %v5002_v29 = vshrl.u32 %v919_v10, 5 }
 0x394   :  { %v5000_v36 = vsub.s32 32, %v921_v37  ;;  %v924_v12 = vshll.u32 %v4172_v47, %v921_v37  ;;  %v927_v39 = vshll.u32 %v6515_v49, %v921_v37  ;;  %v930_v32 = vshll.u32 %v6513_v52, %v921_v37 }
 0x395   :  { %v933_v62 = vshll.u32 %v6511_v55, %v921_v37  ;;  %v936_v33 = vshll.u32 %v6509_v58, %v921_v37  ;;  %vm939_vm12 = vcmp.lt.s32.totalorder %v5002_v29, 1  ;;  %vm942_vm13 = vcmp.lt.s32.totalorder %v5002_v29, 4 }
 0x396   :  { %v925_v15 = vshrl.u32 %v6515_v49, %v5000_v36  ;;  %v928_v14 = vshrl.u32 %v6513_v52, %v5000_v36  ;;  %v931_v59 = vshrl.u32 %v6511_v55, %v5000_v36  ;;  %v934_v60 = vshrl.u32 %v6509_v58, %v5000_v36 }
 0x397   :  { %v937_v48 = vshrl.u32 %v6507_v61, %v5000_v36  ;;  %vm941_vm14 = vcmp.lt.s32.totalorder %v5002_v29, 3  ;;  %vm940_vm1 = vcmp.lt.s32.totalorder %v5002_v29, 2 }
 0x398   :  { %v926_v44 = vor.u32 %v925_v15, %v924_v12  ;;  %v929_v53 = vor.u32 %v928_v14, %v927_v39  ;;  %v932_v4 = vor.u32 %v931_v59, %v930_v32  ;;  %v935_v41 = vor.u32 %v934_v60, %v933_v62  ;;  %v2010_v15 = vld [vmem:[#allocation4 + $0x20] sm:$0xff] }
 0x399   :  { %v938_v50 = vor.u32 %v937_v48, %v936_v33  ;;  %2044 = vmatmul.f32.vlgmr.msra.gmra.mxu0 %v2010_v15  ;;  %v923_v62 = vshrl.u32 %v4172_v47, %v5000_v36 }
 0x39a   :  { %v947_v51 = vsel %vm939_vm12, %v926_v44, %v929_v53  ;;  %v951_v18 = vsel %vm939_vm12, %v929_v53, %v932_v4  ;;  %v948_v25 = vsel %vm942_vm13, %v935_v41, 920167782  ;;  %v944_v14 = vsel %vm942_vm13, %v932_v4, 2102212464 }
 0x39b   :  { %v952_v26 = vsel %vm942_vm13, %v938_v50, 1326507024  ;;  %v949_v3 = vsel %vm941_vm14, %v932_v4, %v948_v25  ;;  %v945_v4 = vsel %vm941_vm14, %v929_v53, %v944_v14  ;;  %v5067_v14 = vld [vmem:[#allocation12 + $0x30] sm:$0xff] }
 0x39c   :  { %v953_v5 = vsel %vm941_vm14, %v935_v41, %v952_v26  ;;  %v950_v30 = vsel %vm940_vm1, %v947_v51, %v949_v3  ;;  %v943_v51 = vsel %vm939_vm12, %v923_v62, %v926_v44  ;;  %v5070_v62 = vld [vmem:[#allocation12 + $0x28] sm:$0xff]  ;;  %vm5082_vm12 = vcmp.le.f32.partialorder %v907_v27, 0.7853982 }
 0x39d   :  { %v954_v20 = vsel %vm940_vm1, %v951_v18, %v953_v5  ;;  %v980_v63 = vand.u32 65535, %v950_v30  ;;  %v981_v0 = vshrl.u32 %v950_v30, 16  ;;  %v946_v36 = vsel %vm940_vm1, %v943_v51, %v945_v4  ;;  %v5076_v51 = vld [vmem:[#allocation12 + $0x8] sm:$0xff] }
 0x39e   :  { %v958_v7 = vand.u32 65535, %v954_v20  ;;  %v959_v21 = vshrl.u32 %v954_v20, 16 }
 0x39f   :  { %v983_v56 = vmul.u32 %v981_v0, %v956_v34  ;;  %v984_v1 = vmul.u32 %v980_v63, %v957_v28  ;;  %v982_v6 = vmul.u32 %v980_v63, %v956_v34  ;;  %v985_v42 = vmul.u32 %v981_v0, %v957_v28  ;;  %v1355_v63 = vld [vmem:[#allocation12 + $0x70] sm:$0xff]  ;;  %v1354_v0 = vld [vmem:[#allocation12 + $0x68] sm:$0xff] }
 0x3a0   :  { %v961_v43 = vmul.u32 %v959_v21, %v956_v34  ;;  %v962_v54 = vmul.u32 %v958_v7, %v957_v28  ;;  %v960_v8 = vmul.u32 %v958_v7, %v956_v34  ;;  %v963_v17 = vmul.u32 %v959_v21, %v957_v28  ;;  %v1356_v21 = vld [vmem:[#allocation12 + $0x78] sm:$0xff] }
 0x3a1   :  { %v986_v40 = vshll.u32 %v983_v56, 16  ;;  %v988_v37 = vshll.u32 %v984_v1, 16  ;;  %v987_v41 = vshrl.u32 %v983_v56, 16  ;;  %v989_v26 = vshrl.u32 %v984_v1, 16  ;;  %1357 = vmatpush.msra.mxu3 %v1356_v21  ;;  %v5060_v56 = vld [vmem:[#allocation12 + $0x58] sm:$0xff]  ;;  %v1351_v1 = vld [vmem:[#allocation12 + $0x50] sm:$0xff] }
 0x3a2   :  { %v964_v9 = vshll.u32 %v961_v43, 16  ;;  %v966_v22 = vshll.u32 %v962_v54, 16  ;;  %v965_v60 = vshrl.u32 %v961_v43, 16  ;;  %v967_v18 = vshrl.u32 %v962_v54, 16  ;;  %v5058_v43 = vld [vmem:[#allocation12 + $0x60] sm:$0xff] }
 0x3a3   :  { %vm990_vm15 = vc.u32 %v982_v6, %v986_v40  ;;  %v992_v46 = vadd.s32 %v986_v40, %v982_v6  ;;  %v1000_v28 = vmul.u32 %v5020_v24, %v946_v36  ;;  %1358 = vmatpush.msra.mxu3 %v1355_v63  ;;  %v1350_v24 = vld [vmem:[#allocation12 + $0x48] sm:$0xff] }
 0x3a4   :  { %vm968_vm3 = vc.u32 %v960_v8, %v964_v9  ;;  %v970_v45 = vadd.s32 %v964_v9, %v960_v8  ;;  %v991_v39 = vsel %vm990_vm15, 1, %v4178_v31  ;;  %vm1050_vm15 = vweird.f32 %v4994_v16 }
 0x3a5   :  { %v969_v10 = vsel %vm968_vm3, 1, %v4178_v31  ;;  %v993_v59 = vadd.s32 %v991_v39, %v985_v42  ;;  %vm994_vm7 = vc.u32 %v992_v46, %v988_v37  ;;  %v996_v30 = vadd.s32 %v992_v46, %v988_v37  ;;  %1359 = vmatpush.msra.mxu3 %v1354_v0 }
 0x3a6   :  { %v971_v12 = vadd.s32 %v969_v10, %v963_v17  ;;  %vm972_vm6 = vc.u32 %v970_v45, %v966_v22  ;;  %v995_v48 = vsel %vm994_vm7, 1, %v4178_v31  ;;  %v1349_v17 = vld [vmem:[#allocation12 + $0x40] sm:$0xff]  ;;  %v5064_v45 = vld [vmem:[#allocation12 + $0x38] sm:$0xff] }
 0x3a7   :  { %v973_v32 = vsel %vm972_vm6, 1, %v4178_v31  ;;  %v997_v50 = vadd.s32 %v995_v48, %v993_v59  ;;  %1360 = vmatpush.msra.mxu3 %v5058_v43 }
 0x3a8   :  { %v975_v33 = vadd.s32 %v973_v32, %v971_v12 }
 0x3a9   :  { %v998_v3 = vadd.s32 %v997_v50, %v987_v41  ;;  %1361 = vmatpush.msra.mxu3 %v5060_v56 }
 0x3aa   :  { %v976_v25 = vadd.s32 %v975_v33, %v965_v60 }
 0x3ab   :  { %v999_v20 = vadd.s32 %v998_v3, %v989_v26  ;;  %1362 = vmatpush.msra.mxu3 %v1351_v1 }
 0x3ac   :  { %v977_v5 = vadd.s32 %v976_v25, %v967_v18  ;;  %v5086_v18 = vld [vmem:[#allocation12] sm:$0xff] }
 0x3ad   :  { %v1003_v34 = vadd.s32 1, %v999_v20  ;;  %1363 = vmatpush.msra.mxu3 %v1350_v24 }
 0x3ae   :  { %vm1002_vm8 = vc.u32 %v977_v5, %v996_v30  ;;  %v1001_v10 = vadd.s32 %v996_v30, %v977_v5 }
 0x3af   :  { %v1004_v7 = vsel %vm1002_vm8, %v1003_v34, %v999_v20  ;;  %1364 = vmatpush.msra.mxu3 %v1349_v17 }
 0x3b0   :  { %v1005_v44 = vadd.s32 %v1004_v7, %v1000_v28 }
 0x3b1   :  { %1365 = vmatpush.msra.mxu3 %v5064_v45 }
 0x3b2   :  { %v1006_v53 = vadd.s32 536870912, %v1005_v44 }
 0x3b3   :  { %1366 = vmatpush.msra.mxu3 %v5067_v14 }
 0x3b4   :  { %v1007_v54 = vshrl.u32 %v1006_v53, 30 }
 0x3b5   :  { %1367 = vmatpush.msra.mxu3 %v5070_v62 }
 0x3b6   :  { %v1008_v29 = vshll.u32 %v1007_v54, 30 }
 0x3b7   :  { %1368 = vmatpush.msra.mxu3 %v4768_v57 }
 0x3b8   :  { %v1009_v8 = vsub.s32 %v1005_v44, %v1008_v29 }
 0x3b9   :  { %1369 = vmatpush.msra.mxu3 %v4771_v11 }
 0x3ba   :  { %vm1010_vm9 = vcmp.lt.s32.totalorder %v1009_v8, 0  ;;  %v1011_v9 = vsub.s32 0, %v1009_v8 }
 0x3bb   :  { %1370 = vmatpush.msra.mxu3 %v4774_v38  ;;  %v1031_v38 = vsub.s32 4, %v1007_v54 }
 0x3bc   :  { %v1012_v6 = vsel %vm1010_vm9, %v1011_v9, %v1009_v8 }
 0x3bd   :  { %v1013_v40 = vclz %v1012_v6  ;;  %1371 = vmatpush.msra.mxu3 %v5076_v51  ;;  %v1032_v5 = vsel %vm909_vm11, %v1031_v38, %v1007_v54 }
 0x3be   :  { %v1034_v36 = vsel %vm5082_vm12, 0, %v1032_v5 }
 0x3bf   :  { %v3920_v22 = vadd.s32 4294967294, %v1013_v40  ;;  %1372 = vmatpush.msra.mxu3 %v5086_v18  ;;  %v1051_v44 = vadd.s32 3, %v1034_v36 }
 0x3c1   :  { %vm3921_vm10 = vcmp.lt.s32.totalorder %v3920_v22, 0  ;;  %1827 = vmatpush.msrb.mxu3 %v1356_v21 }
 0x3c2   :  { %v1016_v42 = vsel %vm3921_vm10, 0, %v3920_v22 }
 0x3c3   :  { %v1017_v37 = vsub.s32 32, %v1016_v42  ;;  %v1021_v46 = vsub.s32 4294967266, %v1016_v42  ;;  %v1018_v12 = vshll.u32 %v1009_v8, %v1016_v42  ;;  %1828 = vmatpush.msrb.mxu3 %v1355_v63  ;;  %v1052_v8 = vand.u32 3, %v1051_v44 }
 0x3c5   :  { %v1019_v39 = vshrl.u32 %v1001_v10, %v1017_v37  ;;  %v1022_v15 = vadd.s32 127, %v1021_v46  ;;  %1829 = vmatpush.msrb.mxu3 %v1354_v0  ;;  %vm1054_vm13 = vcmp.eq.s32.totalorder %v1052_v8, 0  ;;  %vm1057_vm14 = vcmp.eq.s32.totalorder %v1052_v8, 2 }
 0x3c6   :  { %vm1053_vm1 = vcmp.lt.s32.totalorder %v1052_v8, 2 }
 0x3c7   :  { %v1020_v32 = vor.u32 %v1019_v39, %v1018_v12  ;;  %v1023_v59 = vshll.u32 %v1022_v15, 23  ;;  %1830 = vmatpush.msrb.mxu3 %v5058_v43  ;;  %v3984_v15 = vpop.eup %3983 }
 0x3c9   :  { %v1024_v60 = vor.u32 4788187, %v1023_v59  ;;  %v1027_v48 = vcvt.s32.f32 %v1020_v32  ;;  %1831 = vmatpush.msrb.mxu3 %v5060_v56 }
 0x3cb   :  { %v1025_v33 = vand.u32 2147483647, %v1024_v60 }
 0x3cd   :  { %v1028_v41 = vmul.f32 %v1027_v48, %v1025_v33 }
 0x3cf   :  { %v1029_v50 = vxor.u32 2147483648, %v1028_v41 }
 0x3d1   :  { %v1030_v57 = vsel %vm909_vm11, %v1029_v50, %v1028_v41 }
 0x3d2   :  { %v1033_v11 = vsel %vm5082_vm12, %v4994_v16, %v1030_v57 }
 0x3d3   :  { %v1035_v25 = vmul.f32 %v1033_v11, %v1033_v11 }
 0x3d5   :  { %v1036_v26 = vmul.f32 -0.001358992, %v1035_v25  ;;  %v1043_v3 = vmul.f32 -0.00019511016, %v1035_v25 }
 0x3d7   :  { %v1037_v27 = vadd.f32 0.041655596, %v1036_v26  ;;  %v1044_v30 = vadd.f32 0.008332121, %v1043_v3 }
 0x3d9   :  { %v1038_v20 = vmul.f32 %v1037_v27, %v1035_v25  ;;  %v1045_v34 = vmul.f32 %v1044_v30, %v1035_v25 }
 0x3db   :  { %v1039_v28 = vadd.f32 -0.4999988, %v1038_v20  ;;  %v1046_v7 = vadd.f32 -0.16666654, %v1045_v34 }
 0x3dd   :  { %v5096_v21 = vpop.f32.mrf.mxu1  ;;  %v1040_v53 = vmul.f32 %v1039_v28, %v1035_v25  ;;  %v1047_v63 = vmul.f32 %v1046_v7, %v1035_v25 }
 0x3de   :  { %v1617_v54 = vand.u32 2139095040, %v5096_v21  ;;  %v1614_v17 = vand.u32 2147483647, %v5096_v21  ;;  %3985 = vtanh.f32 %v5096_v21 }
 0x3df   :  { %v1041_v29 = vadd.f32 1.0, %v1040_v53  ;;  %v1048_v0 = vadd.f32 1.0, %v1047_v63 }
 0x3e0   :  { %v1618_v1 = vshrl.u32 %v1617_v54, 23  ;;  %v1621_v42 = vand.u32 8388607, %v1614_v17 }
 0x3e1   :  { %v1049_v24 = vmul.f32 %v1048_v0, %v1033_v11  ;;  %v1058_v9 = vxor.u32 2147483648, %v1041_v29  ;;  %v1338_v44 = vpop.f32.mrf.mxu2 }
 0x3e2   :  { %v3928_v43 = vadd.s32 4294967169, %v1618_v1  ;;  %v1622_v32 = vor.u32 8388608, %v1621_v42 }
 0x3e3   :  { %v1055_v6 = vxor.u32 2147483648, %v1049_v24  ;;  %v1059_v22 = vsel %vm1057_vm14, %v1058_v9, %v1049_v24 }
 0x3e4   :  { %v1624_v56 = vadd.s32 1, %v3928_v43  ;;  %v5130_v34 = vshll.u32 %v1622_v32, 8 }
 0x3e5   :  { %v1056_v40 = vsel %vm1054_vm13, %v1041_v29, %v1055_v6 }
 0x3e6   :  { %vm1625_vm3 = vcmp.gt.s32.totalorder %v1624_v56, 0  ;;  %v1060_v10 = vsel %vm1053_vm1, %v1056_v40, %v1059_v22  ;;  %v1663_v8 = vand.u32 65535, %v5130_v34  ;;  %v1664_v24 = vshrl.u32 %v5130_v34, 16 }
 0x3e7   :  { %v1626_v37 = vsel %vm1625_vm3, %v1624_v56, 0  ;;  %v1061_v46 = vsel %vm1050_vm15, nan, %v1060_v10  ;;  %vm1616_vm15 = vcmp.lt.s32.totalorder %v5096_v21, 0 }
 0x3e8   :  { %v1628_v12 = vand.u32 31, %v1626_v37  ;;  %v1062_v39 = vsel %vm434_vm0, %v1061_v46, %v4994_v16  ;;  %v5109_v60 = vshrl.u32 %v1626_v37, 5 }
 0x3e9   :  { %v1064_v41 = vsel %vm4797_vm4, %v3984_v15, %v1062_v39 }
 0x3ea   :  { %v5107_v59 = vsub.s32 32, %v1628_v12  ;;  %v1631_v33 = vshll.u32 %v4172_v47, %v1628_v12  ;;  %v1634_v48 = vshll.u32 %v6515_v49, %v1628_v12  ;;  %v1637_v16 = vshll.u32 %v6513_v52, %v1628_v12 }
 0x3eb   :  { %v1640_v11 = vshll.u32 %v6511_v55, %v1628_v12  ;;  %v1643_v25 = vshll.u32 %v6509_v58, %v1628_v12  ;;  %v1065_v30 = vmul.f32 %v4792_v2, %v1064_v41  ;;  %vm1646_vm6 = vcmp.lt.s32.totalorder %v5109_v60, 1 }
 0x3ec   :  { %v1632_v50 = vshrl.u32 %v6515_v49, %v5107_v59  ;;  %v1635_v4 = vshrl.u32 %v6513_v52, %v5107_v59  ;;  %v1638_v57 = vshrl.u32 %v6511_v55, %v5107_v59  ;;  %v1641_v38 = vshrl.u32 %v6509_v58, %v5107_v59 }
 0x3ed   :  { %v1644_v26 = vshrl.u32 %v6507_v61, %v5107_v59  ;;  %vm1649_vm7 = vcmp.lt.s32.totalorder %v5109_v60, 4  ;;  %1068 = vst [vmem:[#allocation13 + $0x8] sm:$0xff] %v1065_v30  ;;  %vm1648_vm8 = vcmp.lt.s32.totalorder %v5109_v60, 3  ;;  %v1339_v63 = vadd.f32 %v1338_v44, %v1065_v30 }
 0x3ee   :  { %v1633_v3 = vor.u32 %v1632_v50, %v1631_v33  ;;  %v1636_v5 = vor.u32 %v1635_v4, %v1634_v48  ;;  %v1639_v27 = vor.u32 %v1638_v57, %v1637_v16  ;;  %v1642_v36 = vor.u32 %v1641_v38, %v1640_v11 }
 0x3ef   :  { %v1645_v20 = vor.u32 %v1644_v26, %v1643_v25  ;;  %vm1647_vm9 = vcmp.lt.s32.totalorder %v5109_v60, 2  ;;  %1373 = vmatmul.f32.vlgmr.msra.gmra.mxu3 %v1339_v63  ;;  %v1630_v26 = vshrl.u32 %v4172_v47, %v5107_v59  ;;  %v5176_v60 = vld [vmem:[#allocation9 + $0x20] sm:$0xff] }
 0x3f0   :  { %v1654_v28 = vsel %vm1646_vm6, %v1633_v3, %v1636_v5  ;;  %v1658_v7 = vsel %vm1646_vm6, %v1636_v5, %v1639_v27  ;;  %v1655_v2 = vsel %vm1649_vm7, %v1642_v36, 920167782  ;;  %v1651_v11 = vsel %vm1649_vm7, %v1639_v27, 2102212464 }
 0x3f1   :  { %v1659_v53 = vsel %vm1649_vm7, %v1645_v20, 1326507024  ;;  %v1656_v54 = vsel %vm1648_vm8, %v1639_v27, %v1655_v2  ;;  %v1650_v44 = vsel %vm1646_vm6, %v1630_v26, %v1633_v3  ;;  %v1652_v2 = vsel %vm1648_vm8, %v1636_v5, %v1651_v11  ;;  %v5170_v5 = vld [vmem:[#allocation9 + $0x30] sm:$0xff]  ;;  %v5186_v26 = vld [vmem:[#allocation9 + $0x8] sm:$0xff] }
 0x3f2   :  { %v1660_v29 = vsel %vm1648_vm8, %v1642_v36, %v1659_v53  ;;  %v1657_v0 = vsel %vm1647_vm9, %v1654_v28, %v1656_v54  ;;  %v1653_v59 = vsel %vm1647_vm9, %v1650_v44, %v1652_v2  ;;  %vm1615_vm6 = vcmp.le.f32.partialorder %v1614_v17, 0.7853982 }
 0x3f3   :  { %v1661_v1 = vsel %vm1647_vm9, %v1658_v7, %v1660_v29  ;;  %v1687_v6 = vand.u32 65535, %v1657_v0  ;;  %v1688_v56 = vshrl.u32 %v1657_v0, 16 }
 0x3f4   :  { %v1665_v9 = vand.u32 65535, %v1661_v1  ;;  %v1666_v43 = vshrl.u32 %v1661_v1, 16 }
 0x3f5   :  { %v1690_v42 = vmul.u32 %v1688_v56, %v1663_v8  ;;  %v1691_v10 = vmul.u32 %v1687_v6, %v1664_v24  ;;  %v1689_v39 = vmul.u32 %v1687_v6, %v1663_v8  ;;  %v1692_v48 = vmul.u32 %v1688_v56, %v1664_v24  ;;  %v5168_v6 = vld [vmem:[#allocation9 + $0x38] sm:$0xff] }
 0x3f6   :  { %v1668_v40 = vmul.u32 %v1666_v43, %v1663_v8  ;;  %v1669_v22 = vmul.u32 %v1665_v9, %v1664_v24  ;;  %v1667_v37 = vmul.u32 %v1665_v9, %v1663_v8  ;;  %v1670_v12 = vmul.u32 %v1666_v43, %v1664_v24  ;;  %2072 = vmatpush.msra.mxu1 %v5168_v6 }
 0x3f7   :  { %v1693_v15 = vshll.u32 %v1690_v42, 16  ;;  %v1695_v50 = vshll.u32 %v1691_v10, 16  ;;  %v1694_v28 = vshrl.u32 %v1690_v42, 16  ;;  %v1696_v63 = vshrl.u32 %v1691_v10, 16 }
 0x3f8   :  { %v1671_v46 = vshll.u32 %v1668_v40, 16  ;;  %v1673_v32 = vshll.u32 %v1669_v22, 16  ;;  %v1672_v30 = vshrl.u32 %v1668_v40, 16  ;;  %v1674_v27 = vshrl.u32 %v1669_v22, 16  ;;  %v5173_v40 = vld [vmem:[#allocation9 + $0x28] sm:$0xff]  ;;  %2073 = vmatpush.msra.mxu1 %v5170_v5 }
 0x3f9   :  { %vm1697_vm11 = vc.u32 %v1689_v39, %v1693_v15  ;;  %v1699_v4 = vadd.s32 %v1693_v15, %v1689_v39  ;;  %v1707_v24 = vmul.u32 %v5130_v34, %v1653_v59  ;;  %v5179_v34 = vld [vmem:[#allocation9 + $0x18] sm:$0xff] }
 0x3fa   :  { %vm1675_vm10 = vc.u32 %v1667_v37, %v1671_v46  ;;  %v1677_v33 = vadd.s32 %v1671_v46, %v1667_v37  ;;  %v1698_v57 = vsel %vm1697_vm11, 1, %v4178_v31  ;;  %2074 = vmatpush.msra.mxu1 %v5173_v40  ;;  %v5182_v37 = vld [vmem:[#allocation9 + $0x10] sm:$0xff] }
 0x3fb   :  { %v1676_v41 = vsel %vm1675_vm10, 1, %v4178_v31  ;;  %v1700_v25 = vadd.s32 %v1698_v57, %v1692_v48  ;;  %vm1701_vm13 = vc.u32 %v1699_v4, %v1695_v50  ;;  %v1703_v0 = vadd.s32 %v1699_v4, %v1695_v50 }
 0x3fc   :  { %v1678_v16 = vadd.s32 %v1676_v41, %v1670_v12  ;;  %vm1679_vm12 = vc.u32 %v1677_v33, %v1673_v32  ;;  %v1702_v20 = vsel %vm1701_vm13, 1, %v4178_v31  ;;  %2075 = vmatpush.msra.mxu1 %v5176_v60  ;;  %vm1757_vm10 = vweird.f32 %v5096_v21 }
 0x3fd   :  { %v1680_v38 = vsel %vm1679_vm12, 1, %v4178_v31  ;;  %v1704_v7 = vadd.s32 %v1702_v20, %v1700_v25 }
 0x3fe   :  { %v1682_v36 = vadd.s32 %v1680_v38, %v1678_v16  ;;  %2076 = vmatpush.msra.mxu1 %v5179_v34 }
 0x3ff   :  { %v1705_v54 = vadd.s32 %v1704_v7, %v1694_v28 }
 0x400   :  { %v1683_v53 = vadd.s32 %v1682_v36, %v1672_v30  ;;  %2077 = vmatpush.msra.mxu1 %v5182_v37  ;;  %v5188_v30 = vld [vmem:[#allocation9] sm:$0xff] }
 0x401   :  { %v1706_v1 = vadd.s32 %v1705_v54, %v1696_v63 }
 0x402   :  { %v1684_v29 = vadd.s32 %v1683_v53, %v1674_v27  ;;  %2078 = vmatpush.msra.mxu1 %v5186_v26 }
 0x403   :  { %v1710_v8 = vadd.s32 1, %v1706_v1 }
 0x404   :  { %vm1709_vm14 = vc.u32 %v1684_v29, %v1703_v0  ;;  %v1708_v32 = vadd.s32 %v1703_v0, %v1684_v29  ;;  %2079 = vmatpush.msra.mxu1 %v5188_v30 }
 0x405   :  { %v1711_v9 = vsel %vm1709_vm14, %v1710_v8, %v1706_v1 }
 0x406   :  { %v1712_v43 = vadd.s32 %v1711_v9, %v1707_v24 }
 0x408   :  { %v1713_v3 = vadd.s32 536870912, %v1712_v43 }
 0x40a   :  { %v1714_v56 = vshrl.u32 %v1713_v3, 30 }
 0x40c   :  { %v1715_v22 = vshll.u32 %v1714_v56, 30  ;;  %v1738_v44 = vsub.s32 4, %v1714_v56 }
 0x40e   :  { %v1716_v42 = vsub.s32 %v1712_v43, %v1715_v22  ;;  %v1739_v63 = vsel %vm1616_vm15, %v1738_v44, %v1714_v56 }
 0x40f   :  { %v1741_v0 = vsel %vm1615_vm6, 0, %v1739_v63 }
 0x410   :  { %vm1717_vm1 = vcmp.lt.s32.totalorder %v1716_v42, 0  ;;  %v1718_v10 = vsub.s32 0, %v1716_v42  ;;  %v1758_v9 = vadd.s32 3, %v1741_v0 }
 0x412   :  { %v1719_v46 = vsel %vm1717_vm1, %v1718_v10, %v1716_v42 }
 0x413   :  { %v1720_v12 = vclz %v1719_v46 }
 0x415   :  { %v3929_v39 = vadd.s32 4294967294, %v1720_v12 }
 0x417   :  { %vm3930_vm3 = vcmp.lt.s32.totalorder %v3929_v39, 0 }
 0x418   :  { %v1723_v15 = vsel %vm3930_vm3, 0, %v3929_v39 }
 0x419   :  { %v1724_v33 = vsub.s32 32, %v1723_v15  ;;  %v1728_v48 = vsub.s32 4294967266, %v1723_v15  ;;  %v1725_v41 = vshll.u32 %v1716_v42, %v1723_v15  ;;  %v1759_v42 = vand.u32 3, %v1758_v9 }
 0x41b   :  { %v1726_v50 = vshrl.u32 %v1708_v32, %v1724_v33  ;;  %v1729_v4 = vadd.s32 127, %v1728_v48  ;;  %vm1761_vm7 = vcmp.eq.s32.totalorder %v1759_v42, 0  ;;  %vm1764_vm8 = vcmp.eq.s32.totalorder %v1759_v42, 2  ;;  %v3986_v33 = vpop.eup %3985 }
 0x41c   :  { %vm1760_vm9 = vcmp.lt.s32.totalorder %v1759_v42, 2 }
 0x41d   :  { %v1727_v16 = vor.u32 %v1726_v50, %v1725_v41  ;;  %v1730_v57 = vshll.u32 %v1729_v4, 23  ;;  %v2045_v50 = vpop.f32.mrf.mxu0 }
 0x41f   :  { %v1731_v11 = vor.u32 4788187, %v1730_v57  ;;  %v1734_v25 = vcvt.s32.f32 %v1727_v16  ;;  %v5204_v57 = vld [vmem:[#allocation7 + $0x78] sm:$0xff] }
 0x420   :  { %2498 = vmatpush.msrb.mxu0 %v5204_v57 }
 0x421   :  { %v1732_v38 = vand.u32 2147483647, %v1731_v11  ;;  %v5207_v11 = vld [vmem:[#allocation7 + $0x70] sm:$0xff] }
 0x422   :  { %2499 = vmatpush.msrb.mxu0 %v5207_v11 }
 0x423   :  { %v1735_v36 = vmul.f32 %v1734_v25, %v1732_v38  ;;  %v5210_v38 = vld [vmem:[#allocation7 + $0x68] sm:$0xff]  ;;  %v5215_v25 = vld [vmem:[#allocation7 + $0x60] sm:$0xff] }
 0x424   :  { %2500 = vmatpush.msrb.mxu0 %v5210_v38 }
 0x425   :  { %v1736_v20 = vxor.u32 2147483648, %v1735_v36 }
 0x426   :  { %2501 = vmatpush.msrb.mxu0 %v5215_v25 }
 0x427   :  { %v1737_v28 = vsel %vm1616_vm15, %v1736_v20, %v1735_v36  ;;  %v5219_v36 = vld [vmem:[#allocation7 + $0x58] sm:$0xff] }
 0x428   :  { %v1740_v7 = vsel %vm1615_vm6, %v5096_v21, %v1737_v28  ;;  %2502 = vmatpush.msrb.mxu0 %v5219_v36  ;;  %v5222_v28 = vld [vmem:[#allocation7 + $0x50] sm:$0xff] }
 0x429   :  { %v1742_v2 = vmul.f32 %v1740_v7, %v1740_v7 }
 0x42a   :  { %2503 = vmatpush.msrb.mxu0 %v5222_v28 }
 0x42b   :  { %v1743_v27 = vmul.f32 -0.001358992, %v1742_v2  ;;  %v1750_v53 = vmul.f32 -0.00019511016, %v1742_v2 }
 0x42d   :  { %v1744_v54 = vadd.f32 0.041655596, %v1743_v27  ;;  %v1751_v29 = vadd.f32 0.008332121, %v1750_v53  ;;  %v5229_v53 = vld [vmem:[#allocation7 + $0x40] sm:$0xff] }
 0x42f   :  { %v1745_v59 = vmul.f32 %v1744_v54, %v1742_v2  ;;  %v1752_v1 = vmul.f32 %v1751_v29, %v1742_v2  ;;  %v5234_v29 = vld [vmem:[#allocation7 + $0x38] sm:$0xff] }
 0x431   :  { %v1746_v8 = vadd.f32 -0.4999988, %v1745_v59  ;;  %v1753_v24 = vadd.f32 -0.16666654, %v1752_v1  ;;  %v5237_v59 = vld [vmem:[#allocation7 + $0x30] sm:$0xff] }
 0x433   :  { %v1747_v43 = vmul.f32 %v1746_v8, %v1742_v2  ;;  %v1754_v3 = vmul.f32 %v1753_v24, %v1742_v2  ;;  %v5226_v2 = vld [vmem:[#allocation7 + $0x48] sm:$0xff] }
 0x434   :  { %2504 = vmatpush.msrb.mxu0 %v5226_v2 }
 0x435   :  { %v1748_v22 = vadd.f32 1.0, %v1747_v43  ;;  %v1755_v17 = vadd.f32 1.0, %v1754_v3  ;;  %v5246_v3 = vld [vmem:[#allocation7 + $0x28] sm:$0xff] }
 0x436   :  { %2505 = vmatpush.msrb.mxu0 %v5229_v53 }
 0x437   :  { %v1756_v10 = vmul.f32 %v1755_v17, %v1740_v7  ;;  %v1765_v46 = vxor.u32 2147483648, %v1748_v22 }
 0x438   :  { %2506 = vmatpush.msrb.mxu0 %v5234_v29 }
 0x439   :  { %v1762_v12 = vxor.u32 2147483648, %v1756_v10  ;;  %v1766_v39 = vsel %vm1764_vm8, %v1765_v46, %v1756_v10 }
 0x43a   :  { %2507 = vmatpush.msrb.mxu0 %v5237_v59 }
 0x43b   :  { %v1763_v56 = vsel %vm1761_vm7, %v1748_v22, %v1762_v12 }
 0x43c   :  { %v1767_v15 = vsel %vm1760_vm9, %v1763_v56, %v1766_v39  ;;  %2508 = vmatpush.msrb.mxu0 %v5246_v3 }
 0x43d   :  { %v1768_v32 = vsel %vm1757_vm10, nan, %v1767_v15  ;;  %v5262_v15 = vld [vmem:[#allocation7 + $0x20] sm:$0xff] }
 0x43e   :  { %v1769_v48 = vsel %vm196_vm2, %v1768_v32, %v5096_v21  ;;  %2509 = vmatpush.msrb.mxu0 %v5262_v15 }
 0x43f   :  { %v1771_v41 = vsel %vm4522_vm5, %v3986_v33, %v1769_v48 }
 0x440   :  { %v1772_v4 = vmul.f32 %v4990_v35, %v1771_v41 }
 0x442   :  { %v2046_v16 = vadd.f32 %v2045_v50, %v1772_v4  ;;  %1807 = vmatmul.f32.vlgmr.msrb.gmra.mxu2 %v1772_v4 }
 0x444   :  { %2080 = vmatmul.f32.vlgmr.msra.gmra.mxu1 %v2046_v16  ;;  %v5272_v16 = vld [vmem:[#allocation7 + $0x18] sm:$0xff] }
 0x445   :  { %2510 = vmatpush.msrb.mxu0 %v5272_v16 }
 0x472   :  { %v5213_v21 = vpop.f32.mrf.mxu3 }
 0x473   :  { %v1380_v35 = vand.u32 2139095040, %v5213_v21  ;;  %v6517_v44 = vand.u32 2147483647, %v5213_v21  ;;  %3987 = vtanh.f32 %v5213_v21 }
 0x475   :  { %v1381_v20 = vshrl.u32 %v1380_v35, 23  ;;  %v1384_v63 = vand.u32 8388607, %v6517_v44 }
 0x477   :  { %v3925_v7 = vadd.s32 4294967169, %v1381_v20  ;;  %v1385_v8 = vor.u32 8388608, %v1384_v63  ;;  %v5288_v63 = vld [vmem:[#allocation7 + $0x10] sm:$0xff] }
 0x478   :  { %2511 = vmatpush.msrb.mxu0 %v5288_v63 }
 0x479   :  { %v1387_v27 = vadd.s32 1, %v3925_v7  ;;  %v5270_v4 = vshll.u32 %v1385_v8, 8 }
 0x47b   :  { %vm1388_vm11 = vcmp.gt.s32.totalorder %v1387_v27, 0 }
 0x47c   :  { %v1389_v54 = vsel %vm1388_vm11, %v1387_v27, 0  ;;  %vm1379_vm11 = vcmp.lt.s32.totalorder %v5213_v21, 0 }
 0x47d   :  { %v1391_v0 = vand.u32 31, %v1389_v54  ;;  %v5242_v24 = vshrl.u32 %v1389_v54, 5 }
 0x47f   :  { %v5239_v1 = vsub.s32 32, %v1391_v0  ;;  %v1394_v9 = vshll.u32 %v4172_v47, %v1391_v0  ;;  %v1397_v43 = vshll.u32 %v6515_v49, %v1391_v0  ;;  %v1400_v42 = vshll.u32 %v6513_v52, %v1391_v0 }
 0x480   :  { %v1403_v46 = vshll.u32 %v6511_v55, %v1391_v0  ;;  %v1406_v56 = vshll.u32 %v6509_v58, %v1391_v0  ;;  %vm1409_vm12 = vcmp.lt.s32.totalorder %v5242_v24, 1  ;;  %vm1412_vm13 = vcmp.lt.s32.totalorder %v5242_v24, 4 }
 0x481   :  { %v1395_v22 = vshrl.u32 %v6515_v49, %v5239_v1  ;;  %v1398_v17 = vshrl.u32 %v6513_v52, %v5239_v1  ;;  %v1401_v10 = vshrl.u32 %v6511_v55, %v5239_v1  ;;  %v1404_v12 = vshrl.u32 %v6509_v58, %v5239_v1 }
 0x482   :  { %v1407_v39 = vshrl.u32 %v6507_v61, %v5239_v1  ;;  %vm1411_vm14 = vcmp.lt.s32.totalorder %v5242_v24, 3  ;;  %vm1410_vm1 = vcmp.lt.s32.totalorder %v5242_v24, 2 }
 0x483   :  { %v5264_v32 = vor.u32 %v1395_v22, %v1394_v9  ;;  %v5266_v33 = vor.u32 %v1398_v17, %v1397_v43  ;;  %v1402_v48 = vor.u32 %v1401_v10, %v1400_v42  ;;  %v1405_v41 = vor.u32 %v1404_v12, %v1403_v46  ;;  %v5302_v17 = vld [vmem:[#allocation7 + $0x8] sm:$0xff] }
 0x484   :  { %v1408_v50 = vor.u32 %v1407_v39, %v1406_v56  ;;  %v1426_v43 = vand.u32 65535, %v5270_v4  ;;  %v1427_v22 = vshrl.u32 %v5270_v4, 16  ;;  %2512 = vmatpush.msrb.mxu0 %v5302_v17  ;;  %v5305_v56 = vld [vmem:[#allocation7] sm:$0xff] }
 0x485   :  { %v1417_v35 = vsel %vm1409_vm12, %v5264_v32, %v5266_v33  ;;  %v1421_v20 = vsel %vm1409_vm12, %v5266_v33, %v1402_v48  ;;  %v1418_v7 = vsel %vm1412_vm13, %v1405_v41, 920167782 }
 0x486   :  { %v1422_v27 = vsel %vm1412_vm13, %v1408_v50, 1326507024  ;;  %v1419_v54 = vsel %vm1411_vm14, %v1402_v48, %v1418_v7  ;;  %2513 = vmatpush.msrb.mxu0 %v5305_v56  ;;  %v2480_v50 = vld [vmem:[#allocation4 + $0x28] sm:$0xff] }
 0x487   :  { %v1423_v0 = vsel %vm1411_vm14, %v1405_v41, %v1422_v27  ;;  %v1420_v8 = vsel %vm1410_vm1, %v1417_v35, %v1419_v54  ;;  %2514 = vmatmul.f32.vlgmr.msrb.gmra.mxu0 %v2480_v50 }
 0x488   :  { %v1424_v9 = vsel %vm1410_vm1, %v1421_v20, %v1423_v0  ;;  %v1450_v46 = vand.u32 65535, %v1420_v8  ;;  %v1451_v12 = vshrl.u32 %v1420_v8, 16  ;;  %2968 = vmatpush.msra.mxu0 %v5204_v57  ;;  %v1414_v57 = vsel %vm1412_vm13, %v1402_v48, 2102212464 }
 0x489   :  { %v1428_v42 = vand.u32 65535, %v1424_v9  ;;  %v1429_v10 = vshrl.u32 %v1424_v9, 16 }
 0x48a   :  { %v1453_v35 = vmul.u32 %v1451_v12, %v1426_v43  ;;  %v1454_v20 = vmul.u32 %v1450_v46, %v1427_v22  ;;  %v1452_v0 = vmul.u32 %v1450_v46, %v1426_v43  ;;  %v1455_v58 = vmul.u32 %v1451_v12, %v1427_v22  ;;  %2969 = vmatpush.msra.mxu0 %v5207_v11 }
 0x48b   :  { %v1431_v39 = vmul.u32 %v1429_v10, %v1426_v43  ;;  %v1432_v41 = vmul.u32 %v1428_v42, %v1427_v22  ;;  %v1430_v7 = vmul.u32 %v1428_v42, %v1426_v43  ;;  %v1433_v54 = vmul.u32 %v1429_v10, %v1427_v22 }
 0x48c   :  { %v1456_v9 = vshll.u32 %v1453_v35, 16  ;;  %v1458_v52 = vshll.u32 %v1454_v20, 16  ;;  %2970 = vmatpush.msra.mxu0 %v5210_v38  ;;  %v1393_v11 = vshrl.u32 %v4172_v47, %v5239_v1  ;;  %v1459_v1 = vshrl.u32 %v1454_v20, 16 }
 0x48d   :  { %v1434_v27 = vshll.u32 %v1431_v39, 16  ;;  %v1436_v8 = vshll.u32 %v1432_v41, 16  ;;  %v1435_v22 = vshrl.u32 %v1431_v39, 16  ;;  %v1437_v48 = vshrl.u32 %v1432_v41, 16 }
 0x48e   :  { %vm1460_vm15 = vc.u32 %v1452_v0, %v1456_v9  ;;  %v1462_v49 = vadd.s32 %v1456_v9, %v1452_v0  ;;  %2971 = vmatpush.msra.mxu0 %v5215_v25  ;;  %v1413_v38 = vsel %vm1409_vm12, %v1393_v11, %v5264_v32 }
 0x48f   :  { %vm1438_vm3 = vc.u32 %v1430_v7, %v1434_v27  ;;  %v1440_v61 = vadd.s32 %v1434_v27, %v1430_v7  ;;  %v1461_v42 = vsel %vm1460_vm15, 1, %v4178_v31  ;;  %v5344_v27 = vld [vmem:[#allocation12 + $0x48] sm:$0xff] }
 0x490   :  { %v1439_v55 = vsel %vm1438_vm3, 1, %v4178_v31  ;;  %v1463_v10 = vadd.s32 %v1461_v42, %v1455_v58  ;;  %vm1464_vm7 = vc.u32 %v1462_v49, %v1458_v52  ;;  %v1415_v58 = vsel %vm1411_vm14, %v5266_v33, %v1414_v57  ;;  %2972 = vmatpush.msra.mxu0 %v5219_v36 }
 0x491   :  { %v1441_v44 = vadd.s32 %v1439_v55, %v1433_v54  ;;  %vm1442_vm6 = vc.u32 %v1440_v61, %v1436_v8  ;;  %v1465_v12 = vsel %vm1464_vm7, 1, %v4178_v31  ;;  %v1457_v55 = vshrl.u32 %v1453_v35, 16 }
 0x492   :  { %v1443_v43 = vsel %vm1442_vm6, 1, %v4178_v31  ;;  %v1467_v61 = vadd.s32 %v1465_v12, %v1463_v10  ;;  %v1466_v7 = vadd.s32 %v1462_v49, %v1458_v52  ;;  %2973 = vmatpush.msra.mxu0 %v5222_v28  ;;  %v1416_v25 = vsel %vm1410_vm1, %v1413_v38, %v1415_v58  ;;  %v5353_v10 = vld [vmem:[#allocation12 + $0x20] sm:$0xff] }
 0x493   :  { %v1445_v46 = vadd.s32 %v1443_v43, %v1441_v44  ;;  %v1470_v33 = vmul.u32 %v5270_v4, %v1416_v25  ;;  %vm1520_vm6 = vweird.f32 %v5213_v21 }
 0x494   :  { %v1468_v44 = vadd.s32 %v1467_v61, %v1457_v55  ;;  %2974 = vmatpush.msra.mxu0 %v5226_v2  ;;  %v5338_v2 = vld [vmem:[#allocation12 + $0x50] sm:$0xff] }
 0x495   :  { %v1446_v50 = vadd.s32 %v1445_v46, %v1435_v22  ;;  %1832 = vmatpush.msrb.mxu3 %v5338_v2  ;;  %v5357_v22 = vld [vmem:[#allocation12 + $0x18] sm:$0xff]  ;;  %v6528_v46 = vand.u32 2147483647, %v5213_v21  ;;  %v5371_v61 = vld [vmem:[#allocation12 + $0x10] sm:$0xff] }
 0x496   :  { %v1469_v35 = vadd.s32 %v1468_v44, %v1459_v1  ;;  %2975 = vmatpush.msra.mxu0 %v5229_v53 }
 0x497   :  { %v1447_v39 = vadd.s32 %v1446_v50, %v1437_v48  ;;  %1833 = vmatpush.msrb.mxu3 %v5344_v27  ;;  %vm5361_vm12 = vcmp.le.f32.partialorder %v6528_v46, 0.7853982 }
 0x498   :  { %v1473_v32 = vadd.s32 1, %v1469_v35  ;;  %2976 = vmatpush.msra.mxu0 %v5234_v29 }
 0x499   :  { %vm1472_vm8 = vc.u32 %v1447_v39, %v1466_v7 }
 0x49a   :  { %v1474_v41 = vsel %vm1472_vm8, %v1473_v32, %v1469_v35  ;;  %2977 = vmatpush.msra.mxu0 %v5237_v59 }
 0x49b   :  { %v1475_v36 = vadd.s32 %v1474_v41, %v1470_v33 }
 0x49c   :  { %2978 = vmatpush.msra.mxu0 %v5246_v3 }
 0x49d   :  { %v1476_v20 = vadd.s32 536870912, %v1475_v36 }
 0x49e   :  { %2979 = vmatpush.msra.mxu0 %v5262_v15  ;;  %v1471_v15 = vadd.s32 %v1466_v7, %v1447_v39 }
 0x49f   :  { %v1477_v49 = vshrl.u32 %v1476_v20, 30 }
 0x4a0   :  { %2980 = vmatpush.msra.mxu0 %v5272_v16 }
 0x4a1   :  { %v1478_v52 = vshll.u32 %v1477_v49, 30 }
 0x4a2   :  { %2981 = vmatpush.msra.mxu0 %v5288_v63  ;;  %v5347_v63 = vld [vmem:[#allocation12 + $0x40] sm:$0xff] }
 0x4a3   :  { %v1479_v28 = vsub.s32 %v1475_v36, %v1478_v52  ;;  %1834 = vmatpush.msrb.mxu3 %v5347_v63 }
 0x4a4   :  { %2982 = vmatpush.msra.mxu0 %v5302_v17 }
 0x4a5   :  { %vm1480_vm9 = vcmp.lt.s32.totalorder %v1479_v28, 0  ;;  %v1481_v53 = vsub.s32 0, %v1479_v28  ;;  %1835 = vmatpush.msrb.mxu3 %v5064_v45 }
 0x4a6   :  { %2983 = vmatpush.msra.mxu0 %v5305_v56 }
 0x4a7   :  { %v1482_v29 = vsel %vm1480_vm9, %v1481_v53, %v1479_v28  ;;  %1836 = vmatpush.msrb.mxu3 %v5067_v14  ;;  %v1501_v14 = vsub.s32 4, %v1477_v49 }
 0x4a8   :  { %v1483_v59 = vclz %v1482_v29 }
 0x4a9   :  { %1837 = vmatpush.msrb.mxu3 %v5070_v62  ;;  %v1502_v1 = vsel %vm1379_vm11, %v1501_v14, %v1477_v49 }
 0x4aa   :  { %v3926_v24 = vadd.s32 4294967294, %v1483_v59  ;;  %v1504_v35 = vsel %vm5361_vm12, 0, %v1502_v1 }
 0x4ab   :  { %1838 = vmatpush.msrb.mxu3 %v5353_v10  ;;  %v1521_v49 = vadd.s32 3, %v1504_v35 }
 0x4ac   :  { %vm3927_vm10 = vcmp.lt.s32.totalorder %v3926_v24, 0 }
 0x4ad   :  { %v1486_v3 = vsel %vm3927_vm10, 0, %v3926_v24  ;;  %1839 = vmatpush.msrb.mxu3 %v5357_v22 }
 0x4ae   :  { %v1487_v4 = vsub.s32 32, %v1486_v3  ;;  %v1491_v16 = vsub.s32 4294967266, %v1486_v3  ;;  %v1488_v54 = vshll.u32 %v1479_v28, %v1486_v3 }
 0x4af   :  { %1840 = vmatpush.msrb.mxu3 %v5371_v61 }
 0x4b0   :  { %v1489_v0 = vshrl.u32 %v1471_v15, %v1487_v4  ;;  %v1492_v9 = vadd.s32 127, %v1491_v16  ;;  %v6531_v4 = vmov 2475754826  }
 0x4b1   :  { %1841 = vmatpush.msrb.mxu3 %v5076_v51 }
 0x4b2   :  { %v1490_v8 = vor.u32 %v1489_v0, %v1488_v54  ;;  %v1493_v17 = vshll.u32 %v1492_v9, 23 }
 0x4b3   :  { %1842 = vmatpush.msrb.mxu3 %v5086_v18  ;;  %v5386_v18 = vand.u32 3, %v1521_v49 }
 0x4b4   :  { %v1494_v56 = vor.u32 4788187, %v1493_v17  ;;  %v1497_v57 = vcvt.s32.f32 %v1490_v8  ;;  %v6532_v8 = vmov 2131351028  }
 0x4b5   :  { %vm1523_vm7 = vcmp.lt.s32.totalorder %v5386_v18, 2  ;;  %vm1524_vm8 = vcmp.eq.s32.totalorder %v5386_v18, 0  ;;  %vm1527_vm9 = vcmp.eq.s32.totalorder %v5386_v18, 2 }
 0x4b6   :  { %v1495_v42 = vand.u32 2147483647, %v1494_v56 }
 0x4b8   :  { %v1498_v43 = vmul.f32 %v1497_v57, %v1495_v42  ;;  %v6533_v42 = vmov 2102212464  }
 0x4ba   :  { %v1499_v11 = vxor.u32 2147483648, %v1498_v43 }
 0x4bc   :  { %v1500_v12 = vsel %vm1379_vm11, %v1499_v11, %v1498_v43  ;;  %v6534_v11 = vmov 920167782  }
 0x4bd   :  { %v1503_v62 = vsel %vm5361_vm12, %v5213_v21, %v1500_v12  ;;  %v6535_v12 = vmov 1326507024  }
 0x4be   :  { %v1505_v38 = vmul.f32 %v1503_v62, %v1503_v62 }
 0x4c0   :  { %v1506_v44 = vmul.f32 -0.001358992, %v1505_v38  ;;  %v1513_v39 = vmul.f32 -0.00019511016, %v1505_v38 }
 0x4c1   :  { %v5369_v55 = vpop.f32.mrf.mxu1 }
 0x4c2   :  { %v2084_v58 = vand.u32 2147483647, %v5369_v55  ;;  %v2087_v48 = vand.u32 2139095040, %v5369_v55  ;;  %v1507_v32 = vadd.f32 0.041655596, %v1506_v44  ;;  %3989 = vtanh.f32 %v5369_v55 }
 0x4c3   :  { %v1514_v33 = vadd.f32 0.008332121, %v1513_v39 }
 0x4c4   :  { %v2088_v50 = vshrl.u32 %v2087_v48, 23  ;;  %v2091_v25 = vand.u32 8388607, %v2084_v58  ;;  %v1508_v36 = vmul.f32 %v1507_v32, %v1505_v38 }
 0x4c5   :  { %v1515_v20 = vmul.f32 %v1514_v33, %v1505_v38 }
 0x4c6   :  { %v3934_v7 = vadd.s32 4294967169, %v2088_v50  ;;  %v2092_v52 = vor.u32 8388608, %v2091_v25  ;;  %v1509_v28 = vadd.f32 -0.4999988, %v1508_v36 }
 0x4c7   :  { %v1516_v53 = vadd.f32 -0.16666654, %v1515_v20 }
 0x4c8   :  { %v2094_v41 = vadd.s32 1, %v3934_v7  ;;  %v5384_v3 = vshll.u32 %v2092_v52, 8  ;;  %v1510_v54 = vmul.f32 %v1509_v28, %v1505_v38 }
 0x4c9   :  { %v1517_v0 = vmul.f32 %v1516_v53, %v1505_v38 }
 0x4ca   :  { %vm2095_vm13 = vcmp.gt.s32.totalorder %v2094_v41, 0  ;;  %v1511_v39 = vadd.f32 1.0, %v1510_v54  ;;  %v2133_v32 = vand.u32 65535, %v5384_v3  ;;  %v2134_v49 = vshrl.u32 %v5384_v3, 16 }
 0x4cb   :  { %v2096_v51 = vsel %vm2095_vm13, %v2094_v41, 0  ;;  %v1518_v7 = vadd.f32 1.0, %v1517_v0 }
 0x4cc   :  { %v2098_v29 = vand.u32 31, %v2096_v51  ;;  %v5382_v59 = vshrl.u32 %v2096_v51, 5 }
 0x4cd   :  { %v1519_v36 = vmul.f32 %v1518_v7, %v1503_v62 }
 0x4ce   :  { %v2099_v24 = vsub.s32 32, %v2098_v29  ;;  %v2101_v15 = vshll.u32 %v4172_v47, %v2098_v29  ;;  %v2104_v16 = vshll.u32 %v6531_v4, %v2098_v29  ;;  %v2107_v56 = vshll.u32 %v6532_v8, %v2098_v29 }
 0x4cf   :  { %v2110_v43 = vshll.u32 %v6533_v42, %v2098_v29  ;;  %v2113_v45 = vshll.u32 %v6534_v11, %v2098_v29  ;;  %vm2116_vm14 = vcmp.lt.s32.totalorder %v5382_v59, 1  ;;  %vm2119_vm1 = vcmp.lt.s32.totalorder %v5382_v59, 4 }
 0x4d0   :  { %v2102_v9 = vshrl.u32 %v6531_v4, %v2099_v24  ;;  %v2105_v17 = vshrl.u32 %v6532_v8, %v2099_v24  ;;  %v2108_v57 = vshrl.u32 %v6533_v42, %v2099_v24  ;;  %v2111_v46 = vshrl.u32 %v6534_v11, %v2099_v24 }
 0x4d1   :  { %v2114_v14 = vshrl.u32 %v6535_v12, %v2099_v24  ;;  %vm2118_vm3 = vcmp.lt.s32.totalorder %v5382_v59, 3  ;;  %vm2117_vm15 = vcmp.lt.s32.totalorder %v5382_v59, 2  ;;  %v1525_v53 = vxor.u32 2147483648, %v1519_v36  ;;  %v5473_v59 = vld [vmem:[#allocation9 + $0x70] sm:$0xff] }
 0x4d2   :  { %v5398_v48 = vor.u32 %v2102_v9, %v2101_v15  ;;  %v5400_v50 = vor.u32 %v2105_v17, %v2104_v16  ;;  %v2109_v38 = vor.u32 %v2108_v57, %v2107_v56  ;;  %v2112_v1 = vor.u32 %v2111_v46, %v2110_v43 }
 0x4d3   :  { %v2115_v44 = vor.u32 %v2114_v14, %v2113_v45  ;;  %v1528_v29 = vxor.u32 2147483648, %v1511_v39  ;;  %v2100_v17 = vshrl.u32 %v4172_v47, %v2099_v24  ;;  %v1526_v43 = vsel %vm1524_vm8, %v1511_v39, %v1525_v53 }
 0x4d4   :  { %v2124_v25 = vsel %vm2116_vm14, %v5398_v48, %v5400_v50  ;;  %v2128_v35 = vsel %vm2116_vm14, %v5400_v50, %v2109_v38  ;;  %v2125_v33 = vsel %vm2119_vm1, %v2112_v1, 920167782  ;;  %v2121_v18 = vsel %vm2119_vm1, %v2109_v38, 2102212464 }
 0x4d5   :  { %v2129_v41 = vsel %vm2119_vm1, %v2115_v44, 1326507024  ;;  %v2126_v20 = vsel %vm2118_vm3, %v2109_v38, %v2125_v33 }
 0x4d6   :  { %v2130_v52 = vsel %vm2118_vm3, %v2112_v1, %v2129_v41  ;;  %v2127_v51 = vsel %vm2117_vm15, %v2124_v25, %v2126_v20  ;;  %v1529_v1 = vsel %vm1527_vm9, %v1528_v29, %v1519_v36 }
 0x4d7   :  { %v2131_v28 = vsel %vm2117_vm15, %v2128_v35, %v2130_v52  ;;  %v2157_v16 = vand.u32 65535, %v2127_v51  ;;  %v2158_v54 = vshrl.u32 %v2127_v51, 16  ;;  %v1530_v20 = vsel %vm1523_vm7, %v1526_v43, %v1529_v1  ;;  %v3988_v52 = vpop.eup %3987  ;;  %v1808_v1 = vpop.f32.mrf.mxu2 }
 0x4d8   :  { %v2135_v15 = vand.u32 65535, %v2131_v28  ;;  %v2136_v62 = vshrl.u32 %v2131_v28, 16  ;;  %v1531_v39 = vsel %vm1520_vm6, nan, %v1530_v20  ;;  %vm5547_vm6 = vcmp.le.f32.partialorder %v2084_v58, 0.7853982 }
 0x4d9   :  { %v2160_v56 = vmul.u32 %v2158_v54, %v2133_v32  ;;  %v2161_v57 = vmul.u32 %v2157_v16, %v2134_v49  ;;  %v2159_v7 = vmul.u32 %v2157_v16, %v2133_v32  ;;  %v2162_v25 = vmul.u32 %v2158_v54, %v2134_v49 }
 0x4da   :  { %v2138_v0 = vmul.u32 %v2136_v62, %v2133_v32  ;;  %v2139_v9 = vmul.u32 %v2135_v15, %v2134_v49  ;;  %v2137_v46 = vmul.u32 %v2135_v15, %v2133_v32  ;;  %v2140_v45 = vmul.u32 %v2136_v62, %v2134_v49 }
 0x4db   :  { %v2163_v35 = vshll.u32 %v2160_v56, 16  ;;  %v2165_v41 = vshll.u32 %v2161_v57, 16  ;;  %v1532_v36 = vsel %vm434_vm0, %v1531_v39, %v5213_v21  ;;  %v2164_v54 = vshrl.u32 %v2160_v56, 16  ;;  %v5451_v21 = vld [vmem:[%s6505_s6] ss:$0 sm:$0xff]  ;;  %v5467_v39 = vld [vmem:[#allocation9 + $0x78] sm:$0xff] }
 0x4dc   :  { %v2141_v14 = vshll.u32 %v2138_v0, 16  ;;  %v2143_v44 = vshll.u32 %v2139_v9, 16  ;;  %v2142_v29 = vshrl.u32 %v2138_v0, 16  ;;  %v1534_v16 = vsel %vm4797_vm4, %v3988_v52, %v1532_v36  ;;  %2534 = vmatpush.msrb.mxu1 %v5467_v39  ;;  %v5484_v36 = vld [vmem:[#allocation9 + $0x60] sm:$0xff] }
 0x4dd   :  { %vm2167_vm11 = vc.u32 %v2159_v7, %v2163_v35  ;;  %v2169_v51 = vadd.s32 %v2163_v35, %v2159_v7  ;;  %v1535_v38 = vmul.f32 %v5451_v21, %v1534_v16  ;;  %v2122_v0 = vsel %vm2118_vm3, %v5400_v50, %v2121_v18 }
 0x4de   :  { %vm2145_vm10 = vc.u32 %v2137_v46, %v2141_v14  ;;  %v2147_v33 = vadd.s32 %v2141_v14, %v2137_v46  ;;  %v2168_v32 = vsel %vm2167_vm11, 1, %v4178_v31  ;;  %v2120_v46 = vsel %vm2116_vm14, %v2100_v17, %v5398_v48  ;;  %2535 = vmatpush.msrb.mxu1 %v5473_v59 }
 0x4df   :  { %v2146_v24 = vsel %vm2145_vm10, 1, %v4178_v31  ;;  %v2170_v53 = vadd.s32 %v2168_v32, %v2162_v25  ;;  %vm2171_vm13 = vc.u32 %v2169_v51, %v2165_v41  ;;  %v2166_v56 = vshrl.u32 %v2161_v57, 16  ;;  %1538 = vst [vmem:[#allocation13 + $0x10] sm:$0xff] %v1535_v38  ;;  %v5465_v57 = vld [vmem:[#allocation10 + $0x70] sm:$0xff]  ;;  %v5482_v32 = vld [vmem:[#allocation10 + $0x60] sm:$0xff] }
 0x4e0   :  { %v2148_v28 = vadd.s32 %v2146_v24, %v2140_v45  ;;  %vm2149_vm12 = vc.u32 %v2147_v33, %v2143_v44  ;;  %v2172_v62 = vsel %vm2171_vm13, 1, %v4178_v31  ;;  %v2144_v45 = vshrl.u32 %v2139_v9, 16  ;;  %v5463_v24 = vld [vmem:[#allocation10 + $0x78] sm:$0xff] }
 0x4e1   :  { %v2150_v49 = vsel %vm2149_vm12, 1, %v4178_v31  ;;  %v2174_v43 = vadd.s32 %v2172_v62, %v2170_v53  ;;  %v1809_v7 = vadd.f32 %v1808_v1, %v1535_v38  ;;  %v2173_v35 = vadd.s32 %v2169_v51, %v2165_v41  ;;  %2261 = vmatpush.msra.mxu2 %v5463_v24  ;;  %v5475_v41 = vld [vmem:[#allocation10 + $0x68] sm:$0xff]  ;;  %v5490_v53 = vld [vmem:[#allocation9 + $0x58] sm:$0xff]  ;;  %v5496_v62 = vld [vmem:[#allocation9 + $0x50] sm:$0xff] }
 0x4e2   :  { %v2152_v15 = vadd.s32 %v2150_v49, %v2148_v28  ;;  %v2123_v33 = vsel %vm2117_vm15, %v2120_v46, %v2122_v0  ;;  %v5488_v49 = vld [vmem:[#allocation10 + $0x58] sm:$0xff]  ;;  %v5502_v38 = vld [vmem:[#allocation9 + $0x48] sm:$0xff]  ;;  %v5506_v0 = vld [vmem:[#allocation10 + $0x40] sm:$0xff]  ;;  %vm2086_vm15 = vcmp.lt.s32.totalorder %v5369_v55, 0  ;;  %vm2227_vm10 = vweird.f32 %v5369_v55 }
 0x4e3   :  { %v2175_v44 = vadd.s32 %v2174_v43, %v2164_v54  ;;  %1843 = vmatmul.f32.vlgmr.msrb.gmra.mxu3 %v1809_v7  ;;  %v2177_v17 = vmul.u32 %v5384_v3, %v2123_v33  ;;  %v5477_v3 = vld [vmem:[#allocation9 + $0x68] sm:$0xff]  ;;  %2262 = vmatpush.msra.mxu2 %v5465_v57  ;;  %v5516_v33 = vld [vmem:[#allocation10 + $0x30] sm:$0xff] }
 0x4e4   :  { %v2153_v14 = vadd.s32 %v2152_v15, %v2142_v29  ;;  %2536 = vmatpush.msrb.mxu1 %v5477_v3  ;;  %v5494_v15 = vld [vmem:[#allocation10 + $0x50] sm:$0xff]  ;;  %v5500_v43 = vld [vmem:[#allocation10 + $0x48] sm:$0xff] }
 0x4e5   :  { %v2176_v20 = vadd.s32 %v2175_v44, %v2166_v56  ;;  %2263 = vmatpush.msra.mxu2 %v5475_v41 }
 0x4e6   :  { %v2154_v25 = vadd.s32 %v2153_v14, %v2144_v45  ;;  %2537 = vmatpush.msrb.mxu1 %v5484_v36  ;;  %v5508_v45 = vld [vmem:[#allocation9 + $0x40] sm:$0xff]  ;;  %v5512_v14 = vld [vmem:[#allocation10 + $0x38] sm:$0xff] }
 0x4e7   :  { %v2180_v48 = vadd.s32 1, %v2176_v20  ;;  %2264 = vmatpush.msra.mxu2 %v5482_v32 }
 0x4e8   :  { %vm2179_vm1 = vc.u32 %v2154_v25, %v2173_v35  ;;  %2538 = vmatpush.msrb.mxu1 %v5490_v53  ;;  %v2178_v56 = vadd.s32 %v2173_v35, %v2154_v25  ;;  %v5524_v25 = vld [vmem:[#allocation10 + $0x20] sm:$0xff] }
 0x4e9   :  { %v2181_v52 = vsel %vm2179_vm1, %v2180_v48, %v2176_v20  ;;  %2265 = vmatpush.msra.mxu2 %v5488_v49 }
 0x4ea   :  { %v2182_v50 = vadd.s32 %v2181_v52, %v2177_v17  ;;  %2539 = vmatpush.msrb.mxu1 %v5496_v62  ;;  %v5520_v52 = vld [vmem:[#allocation10 + $0x28] sm:$0xff] }
 0x4eb   :  { %2266 = vmatpush.msra.mxu2 %v5494_v15 }
 0x4ec   :  { %v2183_v9 = vadd.s32 536870912, %v2182_v50  ;;  %2540 = vmatpush.msrb.mxu1 %v5502_v38 }
 0x4ed   :  { %2267 = vmatpush.msra.mxu2 %v5500_v43 }
 0x4ee   :  { %v5469_v28 = vshrl.u32 %v2183_v9, 30  ;;  %2541 = vmatpush.msrb.mxu1 %v5508_v45 }
 0x4ef   :  { %2268 = vmatpush.msra.mxu2 %v5506_v0 }
 0x4f0   :  { %v2185_v51 = vshll.u32 %v5469_v28, 30  ;;  %2542 = vmatpush.msrb.mxu1 %v5168_v6 }
 0x4f1   :  { %2269 = vmatpush.msra.mxu2 %v5512_v14 }
 0x4f2   :  { %v2186_v18 = vsub.s32 %v2182_v50, %v2185_v51  ;;  %2543 = vmatpush.msrb.mxu1 %v5170_v5  ;;  %v5528_v51 = vld [vmem:[#allocation10 + $0x18] sm:$0xff] }
 0x4f3   :  { %2270 = vmatpush.msra.mxu2 %v5516_v33 }
 0x4f4   :  { %vm2187_vm14 = vcmp.lt.s32.totalorder %v2186_v18, 0  ;;  %v2188_v29 = vsub.s32 0, %v2186_v18  ;;  %2544 = vmatpush.msrb.mxu1 %v5173_v40 }
 0x4f5   :  { %2271 = vmatpush.msra.mxu2 %v5520_v52 }
 0x4f6   :  { %v2189_v16 = vsel %vm2187_vm14, %v2188_v29, %v2186_v18  ;;  %2545 = vmatpush.msrb.mxu1 %v5176_v60  ;;  %v5532_v29 = vld [vmem:[#allocation10 + $0x10] sm:$0xff] }
 0x4f7   :  { %v2190_v54 = vclz %v2189_v16  ;;  %2272 = vmatpush.msra.mxu2 %v5524_v25  ;;  %v5536_v16 = vld [vmem:[#allocation10 + $0x8] sm:$0xff] }
 0x4f8   :  { %2546 = vmatpush.msrb.mxu1 %v5179_v34 }
 0x4f9   :  { %v3935_v46 = vadd.s32 4294967294, %v2190_v54  ;;  %2273 = vmatpush.msra.mxu2 %v5528_v51  ;;  %v5540_v54 = vld [vmem:[#allocation10] sm:$0xff] }
 0x4fa   :  { %2547 = vmatpush.msrb.mxu1 %v5182_v37 }
 0x4fb   :  { %vm3936_vm3 = vcmp.lt.s32.totalorder %v3935_v46, 0  ;;  %2274 = vmatpush.msra.mxu2 %v5532_v29 }
 0x4fc   :  { %v2193_v1 = vsel %vm3936_vm3, 0, %v3935_v46  ;;  %2548 = vmatpush.msrb.mxu1 %v5186_v26  ;;  %v2208_v46 = vsub.s32 4, %v5469_v28 }
 0x4fd   :  { %v2194_v44 = vsub.s32 32, %v2193_v1  ;;  %v2198_v7 = vsub.s32 4294967266, %v2193_v1  ;;  %v2195_v20 = vshll.u32 %v2186_v18, %v2193_v1  ;;  %2275 = vmatpush.msra.mxu2 %v5536_v16 }
 0x4fe   :  { %2549 = vmatpush.msrb.mxu1 %v5188_v30 }
 0x4ff   :  { %v2196_v48 = vshrl.u32 %v2178_v56, %v2194_v44  ;;  %v2199_v17 = vadd.s32 127, %v2198_v7  ;;  %2276 = vmatpush.msra.mxu2 %v5540_v54  ;;  %v2209_v56 = vsel %vm2086_vm15, %v2208_v46, %v5469_v28 }
 0x500   :  { %3004 = vmatpush.msra.mxu1 %v5467_v39  ;;  %v2211_v30 = vsel %vm5547_vm6, 0, %v2209_v56 }
 0x501   :  { %v2197_v50 = vor.u32 %v2196_v48, %v2195_v20  ;;  %v2200_v9 = vshll.u32 %v2199_v17, 23  ;;  %2731 = vmatpush.msrb.mxu2 %v5463_v24  ;;  %v2228_v28 = vadd.s32 3, %v2211_v30 }
 0x502   :  { %3005 = vmatpush.msra.mxu1 %v5473_v59 }
 0x503   :  { %v2201_v35 = vor.u32 4788187, %v2200_v9  ;;  %v2204_v18 = vcvt.s32.f32 %v2197_v50  ;;  %2732 = vmatpush.msrb.mxu2 %v5465_v57 }
 0x504   :  { %3006 = vmatpush.msra.mxu1 %v5477_v3 }
 0x505   :  { %v2202_v6 = vand.u32 2147483647, %v2201_v35  ;;  %2733 = vmatpush.msrb.mxu2 %v5475_v41 }
 0x506   :  { %3007 = vmatpush.msra.mxu1 %v5484_v36 }
 0x507   :  { %v2205_v5 = vmul.f32 %v2204_v18, %v2202_v6  ;;  %2734 = vmatpush.msrb.mxu2 %v5482_v32  ;;  %v2229_v32 = vand.u32 3, %v2228_v28 }
 0x508   :  { %3008 = vmatpush.msra.mxu1 %v5490_v53 }
 0x509   :  { %v2206_v40 = vxor.u32 2147483648, %v2205_v5  ;;  %2735 = vmatpush.msrb.mxu2 %v5488_v49  ;;  %vm2231_vm7 = vcmp.eq.s32.totalorder %v2229_v32, 0  ;;  %vm2234_vm8 = vcmp.eq.s32.totalorder %v2229_v32, 2  ;;  %vm2230_vm9 = vcmp.lt.s32.totalorder %v2229_v32, 2 }
 0x50a   :  { %3009 = vmatpush.msra.mxu1 %v5496_v62 }
 0x50b   :  { %v2207_v34 = vsel %vm2086_vm15, %v2206_v40, %v2205_v5  ;;  %2736 = vmatpush.msrb.mxu2 %v5494_v15 }
 0x50c   :  { %v2210_v37 = vsel %vm5547_vm6, %v5369_v55, %v2207_v34  ;;  %3010 = vmatpush.msra.mxu1 %v5502_v38  ;;  %v3990_v38 = vpop.eup %3989 }
 0x50d   :  { %v2212_v26 = vmul.f32 %v2210_v37, %v2210_v37  ;;  %2737 = vmatpush.msrb.mxu2 %v5500_v43 }
 0x50e   :  { %3011 = vmatpush.msra.mxu1 %v5508_v45 }
 0x50f   :  { %v2213_v58 = vmul.f32 -0.001358992, %v2212_v26  ;;  %v2220_v1 = vmul.f32 -0.00019511016, %v2212_v26  ;;  %2738 = vmatpush.msrb.mxu2 %v5506_v0 }
 0x511   :  { %v2214_v44 = vadd.f32 0.041655596, %v2213_v58  ;;  %v2221_v7 = vadd.f32 0.008332121, %v2220_v1  ;;  %2739 = vmatpush.msrb.mxu2 %v5512_v14  ;;  %v2515_v14 = vpop.f32.mrf.mxu0 }
 0x513   :  { %v2215_v24 = vmul.f32 %v2214_v44, %v2212_v26  ;;  %v2222_v39 = vmul.f32 %v2221_v7, %v2212_v26  ;;  %2740 = vmatpush.msrb.mxu2 %v5516_v33  ;;  %v5594_v33 = vld [vmem:[%s6502_s3] ss:$0 sm:$0xff] }
 0x515   :  { %v2216_v57 = vadd.f32 -0.4999988, %v2215_v24  ;;  %v2223_v59 = vadd.f32 -0.16666654, %v2222_v39  ;;  %2741 = vmatpush.msrb.mxu2 %v5520_v52 }
 0x517   :  { %v2217_v20 = vmul.f32 %v2216_v57, %v2212_v26  ;;  %v2224_v41 = vmul.f32 %v2223_v59, %v2212_v26  ;;  %2742 = vmatpush.msrb.mxu2 %v5524_v25 }
 0x519   :  { %v2218_v3 = vadd.f32 1.0, %v2217_v20  ;;  %v2225_v48 = vadd.f32 1.0, %v2224_v41  ;;  %2743 = vmatpush.msrb.mxu2 %v5528_v51 }
 0x51b   :  { %v2226_v36 = vmul.f32 %v2225_v48, %v2210_v37  ;;  %v2235_v17 = vxor.u32 2147483648, %v2218_v3  ;;  %2744 = vmatpush.msrb.mxu2 %v5532_v29 }
 0x51d   :  { %v2232_v49 = vxor.u32 2147483648, %v2226_v36  ;;  %v2236_v15 = vsel %vm2234_vm8, %v2235_v17, %v2226_v36  ;;  %2745 = vmatpush.msrb.mxu2 %v5536_v16 }
 0x51f   :  { %v2233_v53 = vsel %vm2231_vm7, %v2218_v3, %v2232_v49  ;;  %2746 = vmatpush.msrb.mxu2 %v5540_v54  ;;  %v2950_v3 = vld [vmem:[#allocation4 + $0x30] sm:$0xff] }
 0x520   :  { %v2237_v62 = vsel %vm2230_vm9, %v2233_v53, %v2236_v15  ;;  %2984 = vmatmul.f32.vlgmr.msra.gmra.mxu0 %v2950_v3 }
 0x521   :  { %v2238_v43 = vsel %vm2227_vm10, nan, %v2237_v62 }
 0x522   :  { %v2239_v0 = vsel %vm196_vm2, %v2238_v43, %v5369_v55 }
 0x523   :  { %v2241_v45 = vsel %vm4522_vm5, %v3990_v38, %v2239_v0 }
 0x524   :  { %v2242_v50 = vmul.f32 %v5594_v33, %v2241_v45 }
 0x526   :  { %v2516_v52 = vadd.f32 %v2515_v14, %v2242_v50  ;;  %2277 = vmatmul.f32.vlgmr.msra.gmra.mxu2 %v2242_v50 }
 0x528   :  { %2550 = vmatmul.f32.vlgmr.msrb.gmra.mxu1 %v2516_v52 }
 0x566   :  { %v5601_v55 = vpop.f32.mrf.mxu3 }
 0x567   :  { %v1850_v9 = vand.u32 2139095040, %v5601_v55  ;;  %v1847_v6 = vand.u32 2147483647, %v5601_v55  ;;  %3991 = vtanh.f32 %v5601_v55 }
 0x569   :  { %v1851_v25 = vshrl.u32 %v1850_v9, 23  ;;  %v1854_v51 = vand.u32 8388607, %v1847_v6 }
 0x56b   :  { %v3931_v35 = vadd.s32 4294967169, %v1851_v25  ;;  %v1855_v16 = vor.u32 8388608, %v1854_v51 }
 0x56d   :  { %v1857_v18 = vadd.s32 1, %v3931_v35  ;;  %v5627_v28 = vshll.u32 %v1855_v16, 8 }
 0x56f   :  { %vm1858_vm11 = vcmp.gt.s32.totalorder %v1857_v18, 0  ;;  %v1896_v15 = vand.u32 65535, %v5627_v28  ;;  %v1897_v62 = vshrl.u32 %v5627_v28, 16 }
 0x570   :  { %v1859_v5 = vsel %vm1858_vm11, %v1857_v18, 0 }
 0x571   :  { %v1861_v29 = vand.u32 31, %v1859_v5  ;;  %v5609_v60 = vshrl.u32 %v1859_v5, 5 }
 0x573   :  { %v5607_v40 = vsub.s32 32, %v1861_v29  ;;  %v1864_v54 = vshll.u32 %v4172_v47, %v1861_v29  ;;  %v1867_v34 = vshll.u32 %v6531_v4, %v1861_v29  ;;  %v1870_v26 = vshll.u32 %v6532_v8, %v1861_v29 }
 0x574   :  { %v1873_v1 = vshll.u32 %v6533_v42, %v1861_v29  ;;  %v1876_v44 = vshll.u32 %v6534_v11, %v1861_v29  ;;  %vm1879_vm12 = vcmp.lt.s32.totalorder %v5609_v60, 1  ;;  %vm1882_vm13 = vcmp.lt.s32.totalorder %v5609_v60, 4 }
 0x575   :  { %v1865_v37 = vshrl.u32 %v6531_v4, %v5607_v40  ;;  %v1868_v46 = vshrl.u32 %v6532_v8, %v5607_v40  ;;  %v1871_v58 = vshrl.u32 %v6533_v42, %v5607_v40  ;;  %v1874_v56 = vshrl.u32 %v6534_v11, %v5607_v40 }
 0x576   :  { %v1877_v7 = vshrl.u32 %v6535_v12, %v5607_v40  ;;  %vm1881_vm1 = vcmp.lt.s32.totalorder %v5609_v60, 3  ;;  %vm1880_vm14 = vcmp.lt.s32.totalorder %v5609_v60, 2 }
 0x577   :  { %v1866_v30 = vor.u32 %v1865_v37, %v1864_v54  ;;  %v1869_v24 = vor.u32 %v1868_v46, %v1867_v34  ;;  %v1872_v39 = vor.u32 %v1871_v58, %v1870_v26  ;;  %v1875_v57 = vor.u32 %v1874_v56, %v1873_v1 }
 0x578   :  { %v1878_v59 = vor.u32 %v1877_v7, %v1876_v44  ;;  %v1863_v7 = vshrl.u32 %v4172_v47, %v5607_v40 }
 0x579   :  { %v1887_v20 = vsel %vm1879_vm12, %v1866_v30, %v1869_v24  ;;  %v1891_v41 = vsel %vm1879_vm12, %v1869_v24, %v1872_v39  ;;  %v1888_v48 = vsel %vm1882_vm13, %v1875_v57, 920167782  ;;  %v1884_v1 = vsel %vm1882_vm13, %v1872_v39, 2102212464 }
 0x57a   :  { %v1892_v32 = vsel %vm1882_vm13, %v1878_v59, 1326507024  ;;  %v1889_v36 = vsel %vm1881_vm1, %v1872_v39, %v1888_v48  ;;  %v1883_v48 = vsel %vm1879_vm12, %v1863_v7, %v1866_v30  ;;  %vm1849_vm12 = vcmp.lt.s32.totalorder %v5601_v55, 0 }
 0x57b   :  { %v1893_v17 = vsel %vm1881_vm1, %v1875_v57, %v1892_v32  ;;  %v1890_v49 = vsel %vm1880_vm14, %v1887_v20, %v1889_v36  ;;  %v1885_v32 = vsel %vm1881_vm1, %v1869_v24, %v1884_v1  ;;  %vm5697_vm13 = vcmp.le.f32.partialorder %v1847_v6, 0.7853982 }
 0x57c   :  { %v1894_v53 = vsel %vm1880_vm14, %v1891_v41, %v1893_v17  ;;  %v1920_v0 = vand.u32 65535, %v1890_v49  ;;  %v1921_v45 = vshrl.u32 %v1890_v49, 16  ;;  %v1886_v40 = vsel %vm1880_vm14, %v1883_v48, %v1885_v32 }
 0x57d   :  { %v1898_v43 = vand.u32 65535, %v1894_v53  ;;  %v1899_v38 = vshrl.u32 %v1894_v53, 16 }
 0x57e   :  { %v1923_v52 = vmul.u32 %v1921_v45, %v1896_v15  ;;  %v1924_v9 = vmul.u32 %v1920_v0, %v1897_v62  ;;  %v1922_v51 = vmul.u32 %v1920_v0, %v1896_v15  ;;  %v1925_v54 = vmul.u32 %v1921_v45, %v1897_v62  ;;  %v2296_v45 = vld [vmem:[#allocation12 + $0x78] sm:$0xff] }
 0x57f   :  { %v1901_v14 = vmul.u32 %v1899_v38, %v1896_v15  ;;  %v1902_v50 = vmul.u32 %v1898_v43, %v1897_v62  ;;  %v1900_v25 = vmul.u32 %v1898_v43, %v1896_v15  ;;  %v1903_v18 = vmul.u32 %v1899_v38, %v1897_v62  ;;  %2297 = vmatpush.msra.mxu3 %v2296_v45 }
 0x580   :  { %v1926_v5 = vshll.u32 %v1923_v52, 16  ;;  %v1928_v37 = vshll.u32 %v1924_v9, 16  ;;  %v1927_v41 = vshrl.u32 %v1923_v52, 16  ;;  %v1929_v17 = vshrl.u32 %v1924_v9, 16 }
 0x581   :  { %v1904_v35 = vshll.u32 %v1901_v14, 16  ;;  %v1906_v29 = vshll.u32 %v1902_v50, 16  ;;  %v1905_v57 = vshrl.u32 %v1901_v14, 16  ;;  %v1907_v39 = vshrl.u32 %v1902_v50, 16  ;;  %v2295_v14 = vld [vmem:[#allocation12 + $0x70] sm:$0xff]  ;;  %v5665_v50 = vld [vmem:[#allocation12 + $0x68] sm:$0xff] }
 0x582   :  { %vm1930_vm15 = vc.u32 %v1922_v51, %v1926_v5  ;;  %v1932_v46 = vadd.s32 %v1926_v5, %v1922_v51  ;;  %v1940_v38 = vmul.u32 %v5627_v28, %v1886_v40  ;;  %2298 = vmatpush.msra.mxu3 %v2295_v14  ;;  %v5671_v51 = vld [vmem:[#allocation12 + $0x58] sm:$0xff]  ;;  %v5710_v14 = vld [vmem:[#allocation12 + $0x8] sm:$0xff] }
 0x583   :  { %vm1908_vm3 = vc.u32 %v1900_v25, %v1904_v35  ;;  %v1910_v16 = vadd.s32 %v1904_v35, %v1900_v25  ;;  %v1931_v58 = vsel %vm1930_vm15, 1, %v4178_v31  ;;  %v5668_v35 = vld [vmem:[#allocation12 + $0x60] sm:$0xff] }
 0x584   :  { %v1909_v34 = vsel %vm1908_vm3, 1, %v4178_v31  ;;  %v1933_v44 = vadd.s32 %v1931_v58, %v1925_v54  ;;  %vm1934_vm7 = vc.u32 %v1932_v46, %v1928_v37  ;;  %v1936_v15 = vadd.s32 %v1932_v46, %v1928_v37  ;;  %2299 = vmatpush.msra.mxu3 %v5665_v50 }
 0x585   :  { %v1911_v26 = vadd.s32 %v1909_v34, %v1903_v18  ;;  %vm1912_vm6 = vc.u32 %v1910_v16, %v1906_v29  ;;  %v1935_v20 = vsel %vm1934_vm7, 1, %v4178_v31 }
 0x586   :  { %v1913_v56 = vsel %vm1912_vm6, 1, %v4178_v31  ;;  %v1937_v3 = vadd.s32 %v1935_v20, %v1933_v44  ;;  %2300 = vmatpush.msra.mxu3 %v5668_v35  ;;  %v5681_v44 = vld [vmem:[#allocation12 + $0x38] sm:$0xff] }
 0x587   :  { %v1915_v59 = vadd.s32 %v1913_v56, %v1911_v26 }
 0x588   :  { %v1938_v49 = vadd.s32 %v1937_v3, %v1927_v41  ;;  %2301 = vmatpush.msra.mxu3 %v5671_v51 }
 0x589   :  { %v1916_v36 = vadd.s32 %v1915_v59, %v1905_v57 }
 0x58a   :  { %v1939_v62 = vadd.s32 %v1938_v49, %v1929_v17  ;;  %2302 = vmatpush.msra.mxu3 %v5338_v2 }
 0x58b   :  { %v1917_v53 = vadd.s32 %v1916_v36, %v1907_v39 }
 0x58c   :  { %v1943_v43 = vadd.s32 1, %v1939_v62  ;;  %2303 = vmatpush.msra.mxu3 %v5344_v27  ;;  %v5684_v27 = vld [vmem:[#allocation12 + $0x30] sm:$0xff] }
 0x58d   :  { %vm1942_vm8 = vc.u32 %v1917_v53, %v1936_v15  ;;  %v1941_v54 = vadd.s32 %v1936_v15, %v1917_v53 }
 0x58e   :  { %v1944_v0 = vsel %vm1942_vm8, %v1943_v43, %v1939_v62  ;;  %2304 = vmatpush.msra.mxu3 %v5347_v63  ;;  %v5689_v63 = vld [vmem:[#allocation12 + $0x28] sm:$0xff] }
 0x58f   :  { %v1945_v30 = vadd.s32 %v1944_v0, %v1940_v38 }
 0x590   :  { %2305 = vmatpush.msra.mxu3 %v5681_v44 }
 0x591   :  { %v1946_v24 = vadd.s32 536870912, %v1945_v30 }
 0x592   :  { %2306 = vmatpush.msra.mxu3 %v5684_v27 }
 0x593   :  { %v1947_v52 = vshrl.u32 %v1946_v24, 30 }
 0x594   :  { %2307 = vmatpush.msra.mxu3 %v5689_v63 }
 0x595   :  { %v1948_v9 = vshll.u32 %v1947_v52, 30  ;;  %v1971_v39 = vsub.s32 4, %v1947_v52 }
 0x596   :  { %2308 = vmatpush.msra.mxu3 %v5353_v10 }
 0x597   :  { %v1949_v60 = vsub.s32 %v1945_v30, %v1948_v9  ;;  %v1972_v62 = vsel %vm1849_vm12, %v1971_v39, %v1947_v52 }
 0x598   :  { %2309 = vmatpush.msra.mxu3 %v5357_v22 }
 0x599   :  { %vm1950_vm9 = vcmp.lt.s32.totalorder %v1949_v60, 0  ;;  %v1951_v25 = vsub.s32 0, %v1949_v60 }
 0x59a   :  { %2310 = vmatpush.msra.mxu3 %v5371_v61 }
 0x59b   :  { %v1952_v18 = vsel %vm1950_vm9, %v1951_v25, %v1949_v60 }
 0x59c   :  { %v1953_v28 = vclz %v1952_v18  ;;  %2311 = vmatpush.msra.mxu3 %v5710_v14 }
 0x59e   :  { %v3932_v5 = vadd.s32 4294967294, %v1953_v28 }
 0x5a0   :  { %vm3933_vm10 = vcmp.lt.s32.totalorder %v3932_v5, 0 }
 0x5a1   :  { %v1956_v29 = vsel %vm3933_vm10, 0, %v3932_v5  ;;  %v5728_v5 = vld [vmem:[#allocation12] sm:$0xff] }
 0x5a2   :  { %v1957_v34 = vsub.s32 32, %v1956_v29  ;;  %v1961_v37 = vsub.s32 4294967266, %v1956_v29  ;;  %v1958_v58 = vshll.u32 %v1949_v60, %v1956_v29  ;;  %2312 = vmatpush.msra.mxu3 %v5728_v5 }
 0x5a4   :  { %v1959_v1 = vshrl.u32 %v1941_v54, %v1957_v34  ;;  %v1962_v56 = vadd.s32 127, %v1961_v37  ;;  %v1974_v37 = vsel %vm5697_vm13, 0, %v1972_v62 }
 0x5a5   :  { %v5675_v16 = vpop.f32.mrf.mxu1 }
 0x5a6   :  { %v2554_v46 = vand.u32 2147483647, %v5675_v16  ;;  %v2557_v26 = vand.u32 2139095040, %v5675_v16  ;;  %v1960_v7 = vor.u32 %v1959_v1, %v1958_v58  ;;  %v1963_v57 = vshll.u32 %v1962_v56, 23 }
 0x5a7   :  { %3993 = vtanh.f32 %v5675_v16 }
 0x5a8   :  { %v2558_v2 = vshrl.u32 %v2557_v26, 23  ;;  %v2561_v20 = vand.u32 8388607, %v2554_v46  ;;  %v1964_v41 = vor.u32 4788187, %v1963_v57  ;;  %v1967_v32 = vcvt.s32.f32 %v1960_v7 }
 0x5aa   :  { %v3940_v59 = vadd.s32 4294967169, %v2558_v2  ;;  %v1965_v48 = vand.u32 2147483647, %v1964_v41  ;;  %v2562_v36 = vor.u32 8388608, %v2561_v20 }
 0x5ac   :  { %v2564_v3 = vadd.s32 1, %v3940_v59  ;;  %v1968_v17 = vmul.f32 %v1967_v32, %v1965_v48  ;;  %v5704_v0 = vshll.u32 %v2562_v36, 8 }
 0x5ae   :  { %vm2565_vm11 = vcmp.gt.s32.totalorder %v2564_v3, 0  ;;  %v1969_v40 = vxor.u32 2147483648, %v1968_v17  ;;  %v2603_v34 = vand.u32 65535, %v5704_v0  ;;  %v2604_v36 = vshrl.u32 %v5704_v0, 16 }
 0x5af   :  { %v2566_v49 = vsel %vm2565_vm11, %v2564_v3, 0 }
 0x5b0   :  { %v2568_v53 = vand.u32 31, %v2566_v49  ;;  %v5701_v43 = vshrl.u32 %v2566_v49, 5  ;;  %v1970_v45 = vsel %vm1849_vm12, %v1969_v40, %v1968_v17 }
 0x5b1   :  { %v5715_v24 = vsel %vm5697_vm13, %v5601_v55, %v1970_v45 }
 0x5b2   :  { %v2569_v38 = vsub.s32 32, %v2568_v53  ;;  %v2571_v10 = vshll.u32 %v4172_v47, %v2568_v53  ;;  %v2574_v22 = vshll.u32 %v6531_v4, %v2568_v53  ;;  %v2577_v30 = vshll.u32 %v6532_v8, %v2568_v53 }
 0x5b3   :  { %v2580_v6 = vshll.u32 %v6533_v42, %v2568_v53  ;;  %v2583_v61 = vshll.u32 %v6534_v11, %v2568_v53  ;;  %v5723_v60 = vmul.f32 %v5715_v24, %v5715_v24  ;;  %vm2586_vm1 = vcmp.lt.s32.totalorder %v5701_v43, 1 }
 0x5b4   :  { %v2572_v52 = vshrl.u32 %v6531_v4, %v2569_v38  ;;  %v2575_v9 = vshrl.u32 %v6532_v8, %v2569_v38  ;;  %v2578_v25 = vshrl.u32 %v6533_v42, %v2569_v38  ;;  %v2581_v18 = vshrl.u32 %v6534_v11, %v2569_v38 }
 0x5b5   :  { %v2584_v28 = vshrl.u32 %v6535_v12, %v2569_v38  ;;  %vm2589_vm14 = vcmp.lt.s32.totalorder %v5701_v43, 4  ;;  %v1976_v2 = vmul.f32 -0.001358992, %v5723_v60  ;;  %v1983_v7 = vmul.f32 -0.00019511016, %v5723_v60 }
 0x5b6   :  { %v5730_v29 = vor.u32 %v2572_v52, %v2571_v10  ;;  %v5732_v54 = vor.u32 %v2575_v9, %v2574_v22  ;;  %v2579_v26 = vor.u32 %v2578_v25, %v2577_v30  ;;  %v2582_v58 = vor.u32 %v2581_v18, %v2580_v6 }
 0x5b7   :  { %v2585_v1 = vor.u32 %v2584_v28, %v2583_v61  ;;  %vm2588_vm3 = vcmp.lt.s32.totalorder %v5701_v43, 3  ;;  %vm2587_vm15 = vcmp.lt.s32.totalorder %v5701_v43, 2  ;;  %v1977_v48 = vadd.f32 0.041655596, %v1976_v2 }
 0x5b8   :  { %v2594_v56 = vsel %vm2586_vm1, %v5730_v29, %v5732_v54  ;;  %v2595_v57 = vsel %vm2589_vm14, %v2582_v58, 920167782  ;;  %v2598_v59 = vsel %vm2586_vm1, %v5732_v54, %v2579_v26  ;;  %v1984_v17 = vadd.f32 0.008332121, %v1983_v7 }
 0x5b9   :  { %v2599_v20 = vsel %vm2589_vm14, %v2585_v1, 1326507024  ;;  %v2596_v41 = vsel %vm2588_vm3, %v2579_v26, %v2595_v57  ;;  %v1978_v45 = vmul.f32 %v1977_v48, %v5723_v60  ;;  %v2570_v30 = vshrl.u32 %v4172_v47, %v2569_v38 }
 0x5ba   :  { %v2600_v3 = vsel %vm2588_vm3, %v2582_v58, %v2599_v20  ;;  %v2597_v32 = vsel %vm2587_vm15, %v2594_v56, %v2596_v41  ;;  %v1985_v22 = vmul.f32 %v1984_v17, %v5723_v60  ;;  %v1991_v9 = vadd.s32 3, %v1974_v37 }
 0x5bb   :  { %v2601_v39 = vsel %vm2587_vm15, %v2598_v59, %v2600_v3  ;;  %v2627_v15 = vand.u32 65535, %v2597_v32  ;;  %v2628_v40 = vshrl.u32 %v2597_v32, 16  ;;  %v2591_v61 = vsel %vm2589_vm14, %v2579_v26, 2102212464 }
 0x5bc   :  { %v2605_v49 = vand.u32 65535, %v2601_v39  ;;  %v2606_v53 = vshrl.u32 %v2601_v39, 16  ;;  %v1979_v57 = vadd.f32 -0.4999988, %v1978_v45  ;;  %v1986_v59 = vadd.f32 -0.16666654, %v1985_v22 }
 0x5bd   :  { %v2630_v6 = vmul.u32 %v2628_v40, %v2603_v34  ;;  %v2631_v52 = vmul.u32 %v2627_v15, %v2604_v36  ;;  %v2629_v1 = vmul.u32 %v2627_v15, %v2603_v34  ;;  %v2632_v56 = vmul.u32 %v2628_v40, %v2604_v36 }
 0x5be   :  { %v2608_v62 = vmul.u32 %v2606_v53, %v2603_v34  ;;  %v2609_v10 = vmul.u32 %v2605_v49, %v2604_v36  ;;  %v2607_v25 = vmul.u32 %v2605_v49, %v2603_v34  ;;  %v2610_v18 = vmul.u32 %v2606_v53, %v2604_v36 }
 0x5bf   :  { %v2633_v2 = vshll.u32 %v2630_v6, 16  ;;  %v2635_v38 = vshll.u32 %v2631_v52, 16  ;;  %v1980_v3 = vmul.f32 %v1979_v57, %v5723_v60  ;;  %v1987_v49 = vmul.f32 %v1986_v59, %v5723_v60  ;;  %v3992_v59 = vpop.eup %3991 }
 0x5c0   :  { %v2611_v28 = vshll.u32 %v2608_v62, 16  ;;  %v2613_v58 = vshll.u32 %v2609_v10, 16  ;;  %v2612_v48 = vshrl.u32 %v2608_v62, 16  ;;  %v2590_v53 = vsel %vm2586_vm1, %v2570_v30, %v5730_v29 }
 0x5c1   :  { %vm2637_vm7 = vc.u32 %v2629_v1, %v2633_v2  ;;  %v2639_v41 = vadd.s32 %v2633_v2, %v2629_v1  ;;  %v1981_v17 = vadd.f32 1.0, %v1980_v3  ;;  %v2634_v15 = vshrl.u32 %v2630_v6, 16  ;;  %v2278_v3 = vpop.f32.mrf.mxu2 }
 0x5c2   :  { %vm2615_vm6 = vc.u32 %v2607_v25, %v2611_v28  ;;  %v2617_v7 = vadd.s32 %v2611_v28, %v2607_v25  ;;  %v2638_v26 = vsel %vm2637_vm7, 1, %v4178_v31  ;;  %v2592_v62 = vsel %vm2588_vm3, %v5732_v54, %v2591_v61 }
 0x5c3   :  { %v2616_v20 = vsel %vm2615_vm6, 1, %v4178_v31  ;;  %v2640_v32 = vadd.s32 %v2638_v26, %v2632_v56  ;;  %vm2641_vm9 = vc.u32 %v2639_v41, %v2635_v38  ;;  %v2614_v45 = vshrl.u32 %v2609_v10, 16 }
 0x5c4   :  { %v2618_v37 = vadd.s32 %v2616_v20, %v2610_v18  ;;  %vm2619_vm8 = vc.u32 %v2617_v7, %v2613_v58  ;;  %v2642_v36 = vsel %vm2641_vm9, 1, %v4178_v31  ;;  %v1988_v25 = vadd.f32 1.0, %v1987_v49 }
 0x5c5   :  { %v2620_v34 = vsel %vm2619_vm8, 1, %v4178_v31  ;;  %v2644_v40 = vadd.s32 %v2642_v36, %v2640_v32  ;;  %v2636_v18 = vshrl.u32 %v2631_v52, 16  ;;  %v1992_v58 = vand.u32 3, %v1991_v9 }
 0x5c6   :  { %v2622_v39 = vadd.s32 %v2620_v34, %v2618_v37  ;;  %v2643_v56 = vadd.s32 %v2639_v41, %v2635_v38  ;;  %v1989_v60 = vmul.f32 %v1988_v25, %v5715_v24  ;;  %v1998_v2 = vxor.u32 2147483648, %v1981_v17  ;;  %v5793_v41 = vld [vmem:[#allocation9 + $0x38] sm:$0xff]  ;;  %v5795_v37 = vld [vmem:[#allocation9 + $0x30] sm:$0xff]  ;;  %v5798_v34 = vld [vmem:[#allocation9 + $0x28] sm:$0xff] }
 0x5c7   :  { %v2645_v28 = vadd.s32 %v2644_v40, %v2634_v15  ;;  %v2593_v29 = vsel %vm2587_vm15, %v2590_v53, %v2592_v62  ;;  %vm1994_vm11 = vcmp.eq.s32.totalorder %v1992_v58, 0  ;;  %vm1997_vm12 = vcmp.eq.s32.totalorder %v1992_v58, 2  ;;  %3012 = vmatpush.msra.mxu1 %v5793_v41 }
 0x5c8   :  { %v2623_v22 = vadd.s32 %v2622_v39, %v2612_v48  ;;  %v1995_v6 = vxor.u32 2147483648, %v1989_v60  ;;  %v2647_v10 = vmul.u32 %v5704_v0, %v2593_v29  ;;  %vm1993_vm13 = vcmp.lt.s32.totalorder %v1992_v58, 2 }
 0x5c9   :  { %v2646_v30 = vadd.s32 %v2645_v28, %v2636_v18  ;;  %v1999_v9 = vsel %vm1997_vm12, %v1998_v2, %v1989_v60  ;;  %vm1990_vm1 = vweird.f32 %v5601_v55  ;;  %3013 = vmatpush.msra.mxu1 %v5795_v37  ;;  %vm2556_vm15 = vcmp.lt.s32.totalorder %v5675_v16, 0 }
 0x5ca   :  { %v2624_v1 = vadd.s32 %v2623_v22, %v2614_v45  ;;  %v1996_v52 = vsel %vm1994_vm11, %v1981_v17, %v1995_v6  ;;  %v5807_v17 = vld [vmem:[#allocation9 + $0x10] sm:$0xff]  ;;  %v5811_v6 = vld [vmem:[#allocation9 + $0x8] sm:$0xff]  ;;  %vm2555_vm6 = vcmp.le.f32.partialorder %v2554_v46, 0.7853982 }
 0x5cb   :  { %v2650_v54 = vadd.s32 1, %v2646_v30  ;;  %v2000_v24 = vsel %vm1993_vm13, %v1996_v52, %v1999_v9  ;;  %3014 = vmatpush.msra.mxu1 %v5798_v34 }
 0x5cc   :  { %vm2649_vm10 = vc.u32 %v2624_v1, %v2643_v56  ;;  %v2001_v57 = vsel %vm1990_vm1, nan, %v2000_v24  ;;  %v2648_v62 = vadd.s32 %v2643_v56, %v2624_v1 }
 0x5cd   :  { %v2651_v61 = vsel %vm2649_vm10, %v2650_v54, %v2646_v30  ;;  %v2002_v43 = vsel %vm434_vm0, %v2001_v57, %v5601_v55  ;;  %v5801_v55 = vld [vmem:[#allocation9 + $0x20] sm:$0xff]  ;;  %vm2697_vm10 = vweird.f32 %v5675_v16 }
 0x5ce   :  { %v2652_v7 = vadd.s32 %v2651_v61, %v2647_v10  ;;  %v2004_v38 = vsel %vm4797_vm4, %v3992_v59, %v2002_v43  ;;  %3015 = vmatpush.msra.mxu1 %v5801_v55  ;;  %v5813_v54 = vld [vmem:[#allocation9] sm:$0xff] }
 0x5cf   :  { %v2005_v0 = vmul.f32 %v5451_v21, %v2004_v38  ;;  %v5804_v21 = vld [vmem:[#allocation9 + $0x18] sm:$0xff] }
 0x5d0   :  { %v2653_v20 = vadd.s32 536870912, %v2652_v7  ;;  %3016 = vmatpush.msra.mxu1 %v5804_v21 }
 0x5d1   :  { %2008 = vst [vmem:[#allocation13 + $0x18] sm:$0xff] %v2005_v0  ;;  %v2279_v48 = vadd.f32 %v2278_v3, %v2005_v0 }
 0x5d2   :  { %v2654_v26 = vshrl.u32 %v2653_v20, 30  ;;  %3017 = vmatpush.msra.mxu1 %v5807_v17 }
 0x5d3   :  { %2313 = vmatmul.f32.vlgmr.msra.gmra.mxu3 %v2279_v48 }
 0x5d4   :  { %v2655_v32 = vshll.u32 %v2654_v26, 30  ;;  %3018 = vmatpush.msra.mxu1 %v5811_v6  ;;  %v2678_v9 = vsub.s32 4, %v2654_v26 }
 0x5d6   :  { %v2656_v39 = vsub.s32 %v2652_v7, %v2655_v32  ;;  %3019 = vmatpush.msra.mxu1 %v5813_v54  ;;  %v2679_v57 = vsel %vm2556_vm15, %v2678_v9, %v2654_v26  ;;  %v3430_v9 = vld [vmem:[#allocation7 + $0x48] sm:$0xff] }
 0x5d7   :  { %v2681_v20 = vsel %vm2555_vm6, 0, %v2679_v57 }
 0x5d8   :  { %vm2657_vm14 = vcmp.lt.s32.totalorder %v2656_v39, 0  ;;  %v2658_v36 = vsub.s32 0, %v2656_v39  ;;  %v2698_v32 = vadd.s32 3, %v2681_v20  ;;  %v3425_v20 = vld [vmem:[#allocation7 + $0x20] sm:$0xff] }
 0x5da   :  { %v2659_v49 = vsel %vm2657_vm14, %v2658_v36, %v2656_v39 }
 0x5db   :  { %v2660_v53 = vclz %v2659_v49 }
 0x5dd   :  { %v3941_v15 = vadd.s32 4294967294, %v2660_v53  ;;  %v2699_v53 = vand.u32 3, %v2698_v32  ;;  %v3423_v32 = vld [vmem:[#allocation7 + $0x10] sm:$0xff] }
 0x5df   :  { %vm3942_vm3 = vcmp.lt.s32.totalorder %v3941_v15, 0  ;;  %vm2701_vm7 = vcmp.eq.s32.totalorder %v2699_v53, 0  ;;  %vm2704_vm8 = vcmp.eq.s32.totalorder %v2699_v53, 2  ;;  %vm2700_vm9 = vcmp.lt.s32.totalorder %v2699_v53, 2  ;;  %v3421_v53 = vld [vmem:[#allocation7] sm:$0xff] }
 0x5e0   :  { %v2663_v40 = vsel %vm3942_vm3, 0, %v3941_v15 }
 0x5e1   :  { %v2664_v45 = vsub.s32 32, %v2663_v40  ;;  %v2668_v22 = vsub.s32 4294967266, %v2663_v40  ;;  %v2665_v25 = vshll.u32 %v2656_v39, %v2663_v40 }
 0x5e3   :  { %v2666_v18 = vshrl.u32 %v2648_v62, %v2664_v45  ;;  %v2669_v28 = vadd.s32 127, %v2668_v22 }
 0x5e5   :  { %v2667_v58 = vor.u32 %v2666_v18, %v2665_v25  ;;  %v2670_v60 = vshll.u32 %v2669_v28, 23  ;;  %v3994_v18 = vpop.eup %3993 }
 0x5e7   :  { %v2671_v2 = vor.u32 4788187, %v2670_v60  ;;  %v2674_v30 = vcvt.s32.f32 %v2667_v58  ;;  %v2985_v60 = vpop.f32.mrf.mxu0 }
 0x5e9   :  { %v2672_v29 = vand.u32 2147483647, %v2671_v2 }
 0x5eb   :  { %v2675_v10 = vmul.f32 %v2674_v30, %v2672_v29  ;;  %v3436_v30 = vld [vmem:[#allocation7 + $0x78] sm:$0xff] }
 0x5ec   :  { %3438 = vmatpush.msrb.mxu0 %v3436_v30 }
 0x5ed   :  { %v2676_v52 = vxor.u32 2147483648, %v2675_v10 }
 0x5ef   :  { %v2677_v1 = vsel %vm2556_vm15, %v2676_v52, %v2675_v10  ;;  %v3435_v10 = vld [vmem:[#allocation7 + $0x70] sm:$0xff]  ;;  %v3434_v52 = vld [vmem:[#allocation7 + $0x68] sm:$0xff] }
 0x5f0   :  { %v2680_v56 = vsel %vm2555_vm6, %v5675_v16, %v2677_v1  ;;  %3439 = vmatpush.msrb.mxu0 %v3435_v10  ;;  %v3433_v1 = vld [vmem:[#allocation7 + $0x60] sm:$0xff] }
 0x5f1   :  { %v2682_v61 = vmul.f32 %v2680_v56, %v2680_v56 }
 0x5f2   :  { %3440 = vmatpush.msrb.mxu0 %v3434_v52 }
 0x5f3   :  { %v2683_v24 = vmul.f32 -0.001358992, %v2682_v61  ;;  %v2690_v7 = vmul.f32 -0.00019511016, %v2682_v61 }
 0x5f4   :  { %3441 = vmatpush.msrb.mxu0 %v3433_v1 }
 0x5f5   :  { %v2684_v59 = vadd.f32 0.041655596, %v2683_v24  ;;  %v2691_v43 = vadd.f32 0.008332121, %v2690_v7  ;;  %v3427_v7 = vld [vmem:[#allocation7 + $0x30] sm:$0xff] }
 0x5f7   :  { %v2685_v38 = vmul.f32 %v2684_v59, %v2682_v61  ;;  %v2692_v0 = vmul.f32 %v2691_v43, %v2682_v61  ;;  %v3426_v59 = vld [vmem:[#allocation7 + $0x28] sm:$0xff] }
 0x5f9   :  { %v2686_v3 = vadd.f32 -0.4999988, %v2685_v38  ;;  %v2693_v48 = vadd.f32 -0.16666654, %v2692_v0 }
 0x5fb   :  { %v2687_v39 = vmul.f32 %v2686_v3, %v2682_v61  ;;  %v2694_v36 = vmul.f32 %v2693_v48, %v2682_v61  ;;  %v3429_v61 = vld [vmem:[#allocation7 + $0x40] sm:$0xff]  ;;  %v3424_v3 = vld [vmem:[#allocation7 + $0x18] sm:$0xff] }
 0x5fd   :  { %v2688_v49 = vadd.f32 1.0, %v2687_v39  ;;  %v2695_v46 = vadd.f32 1.0, %v2694_v36 }
 0x5ff   :  { %v2696_v15 = vmul.f32 %v2695_v46, %v2680_v56  ;;  %v2705_v40 = vxor.u32 2147483648, %v2688_v49  ;;  %v3432_v56 = vld [vmem:[#allocation7 + $0x58] sm:$0xff] }
 0x600   :  { %3442 = vmatpush.msrb.mxu0 %v3432_v56 }
 0x601   :  { %v2702_v62 = vxor.u32 2147483648, %v2696_v15  ;;  %v2706_v45 = vsel %vm2704_vm8, %v2705_v40, %v2696_v15  ;;  %v3420_v40 = vld [vmem:[#allocation4 + $0x38] sm:$0xff] }
 0x603   :  { %v2703_v26 = vsel %vm2701_vm7, %v2688_v49, %v2702_v62  ;;  %v3422_v49 = vld [vmem:[#allocation7 + $0x8] sm:$0xff] }
 0x604   :  { %v2707_v22 = vsel %vm2700_vm9, %v2703_v26, %v2706_v45 }
 0x605   :  { %v2708_v25 = vsel %vm2697_vm10, nan, %v2707_v22 }
 0x606   :  { %v2709_v28 = vsel %vm196_vm2, %v2708_v25, %v5675_v16  ;;  %v3431_v16 = vld [vmem:[#allocation7 + $0x50] sm:$0xff] }
 0x607   :  { %v2711_v58 = vsel %vm4522_vm5, %v3994_v18, %v2709_v28  ;;  %3443 = vmatpush.msrb.mxu0 %v3431_v16 }
 0x608   :  { %v2712_v2 = vmul.f32 %v5594_v33, %v2711_v58  ;;  %v3428_v33 = vld [vmem:[#allocation7 + $0x38] sm:$0xff] }
 0x609   :  { %3444 = vmatpush.msrb.mxu0 %v3430_v9 }
 0x60a   :  { %v2986_v29 = vadd.f32 %v2985_v60, %v2712_v2  ;;  %2747 = vmatmul.f32.vlgmr.msrb.gmra.mxu2 %v2712_v2 }
 0x60b   :  { %3445 = vmatpush.msrb.mxu0 %v3429_v61 }
 0x60c   :  { %3020 = vmatmul.f32.vlgmr.msra.gmra.mxu1 %v2986_v29 }
 0x60d   :  { %3446 = vmatpush.msrb.mxu0 %v3428_v33 }
 0x60f   :  { %3447 = vmatpush.msrb.mxu0 %v3427_v7 }
 0x611   :  { %3448 = vmatpush.msrb.mxu0 %v3426_v59 }
 0x613   :  { %3449 = vmatpush.msrb.mxu0 %v3425_v20 }
 0x615   :  { %3450 = vmatpush.msrb.mxu0 %v3424_v3 }
 0x617   :  { %3451 = vmatpush.msrb.mxu0 %v3423_v32 }
 0x619   :  { %3452 = vmatpush.msrb.mxu0 %v3422_v49 }
 0x61b   :  { %3453 = vmatpush.msrb.mxu0 %v3421_v53 }
 0x61c   :  { %3454 = vmatmul.f32.vlgmr.msrb.gmra.mxu0 %v3420_v40 }
 0x656   :  { %v5829_v24 = vpop.f32.mrf.mxu3 }
 0x657   :  { %v2320_v57 = vand.u32 2139095040, %v5829_v24  ;;  %v2317_v0 = vand.u32 2147483647, %v5829_v24  ;;  %3995 = vtanh.f32 %v5829_v24 }
 0x659   :  { %v2321_v43 = vshrl.u32 %v2320_v57, 23  ;;  %v2324_v39 = vand.u32 8388607, %v2317_v0 }
 0x65b   :  { %v3937_v38 = vadd.s32 4294967169, %v2321_v43  ;;  %v2325_v62 = vor.u32 8388608, %v2324_v39 }
 0x65d   :  { %v2327_v48 = vadd.s32 1, %v3937_v38  ;;  %v5855_v9 = vshll.u32 %v2325_v62, 8 }
 0x65f   :  { %vm2328_vm11 = vcmp.gt.s32.totalorder %v2327_v48, 0  ;;  %v2366_v3 = vand.u32 65535, %v5855_v9 }
 0x660   :  { %v2329_v36 = vsel %vm2328_vm11, %v2327_v48, 0  ;;  %v2367_v48 = vshrl.u32 %v5855_v9, 16 }
 0x661   :  { %v2331_v46 = vand.u32 31, %v2329_v36  ;;  %v5837_v26 = vshrl.u32 %v2329_v36, 5 }
 0x663   :  { %v5835_v15 = vsub.s32 32, %v2331_v46  ;;  %v2334_v45 = vshll.u32 %v4172_v47, %v2331_v46  ;;  %v2337_v22 = vshll.u32 %v6531_v4, %v2331_v46  ;;  %v2340_v28 = vshll.u32 %v6532_v8, %v2331_v46 }
 0x664   :  { %v2343_v60 = vshll.u32 %v6533_v42, %v2331_v46  ;;  %v2346_v29 = vshll.u32 %v6534_v11, %v2331_v46  ;;  %vm2349_vm12 = vcmp.lt.s32.totalorder %v5837_v26, 1  ;;  %vm2352_vm13 = vcmp.lt.s32.totalorder %v5837_v26, 4 }
 0x665   :  { %v2335_v25 = vshrl.u32 %v6531_v4, %v5835_v15  ;;  %v2338_v18 = vshrl.u32 %v6532_v8, %v5835_v15  ;;  %v2341_v58 = vshrl.u32 %v6533_v42, %v5835_v15  ;;  %v2344_v2 = vshrl.u32 %v6534_v11, %v5835_v15 }
 0x666   :  { %v2347_v30 = vshrl.u32 %v6535_v12, %v5835_v15  ;;  %vm2351_vm1 = vcmp.lt.s32.totalorder %v5837_v26, 3  ;;  %vm2350_vm14 = vcmp.lt.s32.totalorder %v5837_v26, 2 }
 0x667   :  { %v2336_v10 = vor.u32 %v2335_v25, %v2334_v45  ;;  %v2339_v52 = vor.u32 %v2338_v18, %v2337_v22  ;;  %v2342_v1 = vor.u32 %v2341_v58, %v2340_v28  ;;  %v2345_v56 = vor.u32 %v2344_v2, %v2343_v60 }
 0x668   :  { %v2348_v16 = vor.u32 %v2347_v30, %v2346_v29 }
 0x669   :  { %v2357_v61 = vsel %vm2349_vm12, %v2336_v10, %v2339_v52  ;;  %v2361_v33 = vsel %vm2349_vm12, %v2339_v52, %v2342_v1  ;;  %v2358_v7 = vsel %vm2352_vm13, %v2345_v56, 920167782 }
 0x66a   :  { %v2362_v57 = vsel %vm2352_vm13, %v2348_v16, 1326507024  ;;  %v2359_v59 = vsel %vm2351_vm1, %v2342_v1, %v2358_v7 }
 0x66b   :  { %v2363_v43 = vsel %vm2351_vm1, %v2345_v56, %v2362_v57  ;;  %v2360_v20 = vsel %vm2350_vm14, %v2357_v61, %v2359_v59  ;;  %v2333_v59 = vshrl.u32 %v4172_v47, %v5835_v15 }
 0x66c   :  { %v2364_v38 = vsel %vm2350_vm14, %v2361_v33, %v2363_v43  ;;  %v2390_v36 = vand.u32 65535, %v2360_v20  ;;  %v2391_v49 = vshrl.u32 %v2360_v20, 16  ;;  %v2354_v33 = vsel %vm2352_vm13, %v2342_v1, 2102212464 }
 0x66d   :  { %v2368_v32 = vand.u32 65535, %v2364_v38  ;;  %v2369_v39 = vshrl.u32 %v2364_v38, 16  ;;  %vm2319_vm13 = vcmp.lt.s32.totalorder %v5829_v24, 0 }
 0x66e   :  { %v2393_v40 = vmul.u32 %v2391_v49, %v2366_v3  ;;  %v2394_v62 = vmul.u32 %v2390_v36, %v2367_v48  ;;  %v2392_v18 = vmul.u32 %v2390_v36, %v2366_v3  ;;  %v2395_v2 = vmul.u32 %v2391_v49, %v2367_v48 }
 0x66f   :  { %v2371_v46 = vmul.u32 %v2369_v39, %v2366_v3  ;;  %v2372_v53 = vmul.u32 %v2368_v32, %v2367_v48  ;;  %v2370_v45 = vmul.u32 %v2368_v32, %v2366_v3  ;;  %v2373_v25 = vmul.u32 %v2369_v39, %v2367_v48 }
 0x670   :  { %v2396_v28 = vshll.u32 %v2393_v40, 16  ;;  %v2398_v30 = vshll.u32 %v2394_v62, 16  ;;  %v2397_v3 = vshrl.u32 %v2393_v40, 16  ;;  %v2353_v32 = vsel %vm2349_vm12, %v2333_v59, %v2336_v10 }
 0x671   :  { %v2374_v22 = vshll.u32 %v2371_v46, 16  ;;  %v2376_v58 = vshll.u32 %v2372_v53, 16  ;;  %v2375_v43 = vshrl.u32 %v2371_v46, 16  ;;  %v2355_v39 = vsel %vm2351_vm1, %v2339_v52, %v2354_v33  ;;  %v5896_v52 = vld [vmem:[#allocation12 + $0x70] sm:$0xff] }
 0x672   :  { %vm2400_vm15 = vc.u32 %v2392_v18, %v2396_v28  ;;  %v2402_v56 = vadd.s32 %v2396_v28, %v2392_v18  ;;  %v2377_v1 = vshrl.u32 %v2372_v53, 16  ;;  %v2399_v49 = vshrl.u32 %v2394_v62, 16 }
 0x673   :  { %vm2378_vm3 = vc.u32 %v2370_v45, %v2374_v22  ;;  %v2380_v60 = vadd.s32 %v2374_v22, %v2370_v45  ;;  %v2401_v61 = vsel %vm2400_vm15, 1, %v4178_v31  ;;  %v2356_v15 = vsel %vm2350_vm14, %v2353_v32, %v2355_v39 }
 0x674   :  { %v2379_v29 = vsel %vm2378_vm3, 1, %v4178_v31  ;;  %v2403_v57 = vadd.s32 %v2401_v61, %v2395_v2  ;;  %vm2404_vm7 = vc.u32 %v2402_v56, %v2398_v30  ;;  %v2410_v40 = vmul.u32 %v5855_v9, %v2356_v15 }
 0x675   :  { %v2381_v16 = vadd.s32 %v2379_v29, %v2373_v25  ;;  %vm2382_vm6 = vc.u32 %v2380_v60, %v2376_v58  ;;  %v2405_v38 = vsel %vm2404_vm7, 1, %v4178_v31  ;;  %v2406_v25 = vadd.s32 %v2402_v56, %v2398_v30  ;;  %v5893_v58 = vld [vmem:[#allocation12 + $0x78] sm:$0xff] }
 0x676   :  { %v2383_v7 = vsel %vm2382_vm6, 1, %v4178_v31  ;;  %v2407_v48 = vadd.s32 %v2405_v38, %v2403_v57  ;;  %2767 = vmatpush.msrb.mxu3 %v5893_v58  ;;  %v5915_v57 = vld [vmem:[#allocation12 + $0x40] sm:$0xff]  ;;  %vm5997_vm15 = vcmp.le.f32.partialorder %v2317_v0, 0.7853982 }
 0x677   :  { %v2385_v20 = vadd.s32 %v2383_v7, %v2381_v16  ;;  %v5909_v16 = vld [vmem:[#allocation12 + $0x50] sm:$0xff] }
 0x678   :  { %v2408_v45 = vadd.s32 %v2407_v48, %v2397_v3  ;;  %2768 = vmatpush.msrb.mxu3 %v5896_v52 }
 0x679   :  { %v2386_v36 = vadd.s32 %v2385_v20, %v2375_v43 }
 0x67a   :  { %v2409_v46 = vadd.s32 %v2408_v45, %v2399_v49  ;;  %2769 = vmatpush.msrb.mxu3 %v5665_v50  ;;  %v5912_v50 = vld [vmem:[#allocation12 + $0x48] sm:$0xff] }
 0x67b   :  { %v2387_v22 = vadd.s32 %v2386_v36, %v2377_v1 }
 0x67c   :  { %v2413_v18 = vadd.s32 1, %v2409_v46  ;;  %2770 = vmatpush.msrb.mxu3 %v5668_v35 }
 0x67d   :  { %vm2412_vm8 = vc.u32 %v2387_v22, %v2406_v25  ;;  %v2411_v38 = vadd.s32 %v2406_v25, %v2387_v22 }
 0x67e   :  { %v2414_v28 = vsel %vm2412_vm8, %v2413_v18, %v2409_v46  ;;  %2771 = vmatpush.msrb.mxu3 %v5671_v51 }
 0x67f   :  { %v2415_v10 = vadd.s32 %v2414_v28, %v2410_v40  ;;  %v5933_v40 = vld [vmem:[#allocation12 + $0x20] sm:$0xff] }
 0x680   :  { %2772 = vmatpush.msrb.mxu3 %v5909_v16 }
 0x681   :  { %v2416_v53 = vadd.s32 536870912, %v2415_v10 }
 0x682   :  { %2773 = vmatpush.msrb.mxu3 %v5912_v50 }
 0x683   :  { %v5899_v62 = vshrl.u32 %v2416_v53, 30 }
 0x684   :  { %2774 = vmatpush.msrb.mxu3 %v5915_v57 }
 0x685   :  { %v2418_v26 = vshll.u32 %v5899_v62, 30 }
 0x686   :  { %2775 = vmatpush.msrb.mxu3 %v5681_v44 }
 0x687   :  { %v2419_v2 = vsub.s32 %v2415_v10, %v2418_v26 }
 0x688   :  { %2776 = vmatpush.msrb.mxu3 %v5684_v27 }
 0x689   :  { %v5903_v60 = vpop.f32.mrf.mxu1  ;;  %vm2420_vm9 = vcmp.lt.s32.totalorder %v2419_v2, 0  ;;  %v2421_v30 = vsub.s32 0, %v2419_v2 }
 0x68a   :  { %v3027_v9 = vand.u32 2139095040, %v5903_v60  ;;  %v3024_v56 = vand.u32 2147483647, %v5903_v60  ;;  %2777 = vmatpush.msrb.mxu3 %v5689_v63  ;;  %3997 = vtanh.f32 %v5903_v60 }
 0x68b   :  { %v2422_v33 = vsel %vm2420_vm9, %v2421_v30, %v2419_v2 }
 0x68c   :  { %v3028_v29 = vshrl.u32 %v3027_v9, 23  ;;  %v2423_v7 = vclz %v2422_v33  ;;  %v3031_v51 = vand.u32 8388607, %v3024_v56  ;;  %2778 = vmatpush.msrb.mxu3 %v5933_v40 }
 0x68e   :  { %v3946_v61 = vadd.s32 4294967169, %v3028_v29  ;;  %v3938_v59 = vadd.s32 4294967294, %v2423_v7  ;;  %v3032_v48 = vor.u32 8388608, %v3031_v51  ;;  %v5947_v29 = vld [vmem:[#allocation12 + $0x18] sm:$0xff]  ;;  %v2441_v7 = vsub.s32 4, %v5899_v62 }
 0x68f   :  { %2779 = vmatpush.msrb.mxu3 %v5947_v29 }
 0x690   :  { %v3034_v35 = vadd.s32 1, %v3946_v61  ;;  %vm3939_vm11 = vcmp.lt.s32.totalorder %v3938_v59, 0 }
 0x691   :  { %v2426_v3 = vsel %vm3939_vm11, 0, %v3938_v59  ;;  %v5955_v59 = vshll.u32 %v3032_v48, 8 }
 0x692   :  { %vm3035_vm10 = vcmp.gt.s32.totalorder %v3034_v35, 0  ;;  %v2427_v32 = vsub.s32 32, %v2426_v3  ;;  %v2431_v39 = vsub.s32 4294967266, %v2426_v3  ;;  %v2428_v49 = vshll.u32 %v2419_v2, %v2426_v3 }
 0x693   :  { %v3036_v43 = vsel %vm3035_vm10, %v3034_v35, 0 }
 0x694   :  { %v3038_v20 = vand.u32 31, %v3036_v43  ;;  %v5921_v1 = vshrl.u32 %v3036_v43, 5  ;;  %v2429_v18 = vshrl.u32 %v2411_v38, %v2427_v32  ;;  %v2432_v44 = vadd.s32 127, %v2431_v39  ;;  %v5958_v43 = vld [vmem:[#allocation12 + $0x10] sm:$0xff] }
 0x695   :  { %2780 = vmatpush.msrb.mxu3 %v5958_v43 }
 0x696   :  { %v5923_v36 = vsub.s32 32, %v3038_v20  ;;  %v3041_v45 = vshll.u32 %v4172_v47, %v3038_v20  ;;  %v3044_v15 = vshll.u32 %v6531_v4, %v3038_v20  ;;  %v3047_v46 = vshll.u32 %v6532_v8, %v3038_v20 }
 0x697   :  { %v3050_v25 = vshll.u32 %v6533_v42, %v3038_v20  ;;  %v3053_v53 = vshll.u32 %v6534_v11, %v3038_v20  ;;  %v2430_v26 = vor.u32 %v2429_v18, %v2428_v49  ;;  %v2433_v9 = vshll.u32 %v2432_v44, 23  ;;  %2781 = vmatpush.msrb.mxu3 %v5710_v14 }
 0x698   :  { %v3042_v22 = vshrl.u32 %v6531_v4, %v5923_v36  ;;  %v3045_v27 = vshrl.u32 %v6532_v8, %v5923_v36  ;;  %v3048_v28 = vshrl.u32 %v6533_v42, %v5923_v36  ;;  %v3051_v10 = vshrl.u32 %v6534_v11, %v5923_v36 }
 0x699   :  { %v3054_v63 = vshrl.u32 %v6535_v12, %v5923_v36  ;;  %v2434_v35 = vor.u32 4788187, %v2433_v9  ;;  %vm3056_vm12 = vcmp.lt.s32.totalorder %v5921_v1, 1  ;;  %v2437_v20 = vcvt.s32.f32 %v2430_v26  ;;  %2782 = vmatpush.msrb.mxu3 %v5728_v5 }
 0x69a   :  { %v5942_v2 = vor.u32 %v3042_v22, %v3041_v45  ;;  %v5949_v30 = vor.u32 %v3045_v27, %v3044_v15  ;;  %v5951_v61 = vor.u32 %v3048_v28, %v3047_v46  ;;  %v3052_v33 = vor.u32 %v3051_v10, %v3050_v25 }
 0x69b   :  { %v3055_v51 = vor.u32 %v3054_v63, %v3053_v53  ;;  %vm3059_vm1 = vcmp.lt.s32.totalorder %v5921_v1, 4  ;;  %v2435_v3 = vand.u32 2147483647, %v2434_v35  ;;  %vm3058_vm14 = vcmp.lt.s32.totalorder %v5921_v1, 3  ;;  %3237 = vmatpush.msra.mxu3 %v5893_v58 }
 0x69c   :  { %v3064_v38 = vsel %vm3056_vm12, %v5942_v2, %v5949_v30  ;;  %v3065_v48 = vsel %vm3059_vm1, %v3052_v33, 920167782  ;;  %v3068_v32 = vsel %vm3056_vm12, %v5949_v30, %v5951_v61  ;;  %vm3057_vm3 = vcmp.lt.s32.totalorder %v5921_v1, 2 }
 0x69d   :  { %v3066_v39 = vsel %vm3058_vm14, %v5951_v61, %v3065_v48  ;;  %v3069_v49 = vsel %vm3059_vm1, %v3055_v51, 1326507024  ;;  %v5983_v45 = vsel %vm2319_vm13, %v2441_v7, %v5899_v62  ;;  %v2438_v15 = vmul.f32 %v2437_v20, %v2435_v3  ;;  %3238 = vmatpush.msra.mxu3 %v5896_v52 }
 0x69e   :  { %v3067_v46 = vsel %vm3057_vm3, %v3064_v38, %v3066_v39  ;;  %v3070_v18 = vsel %vm3058_vm14, %v3052_v33, %v3069_v49  ;;  %v3073_v44 = vand.u32 65535, %v5955_v59  ;;  %v3074_v25 = vshrl.u32 %v5955_v59, 16 }
 0x69f   :  { %v3071_v22 = vsel %vm3057_vm3, %v3068_v32, %v3070_v18  ;;  %v3097_v27 = vand.u32 65535, %v3067_v46  ;;  %v3098_v28 = vshrl.u32 %v3067_v46, 16  ;;  %v2439_v62 = vxor.u32 2147483648, %v2438_v15 }
 0x6a0   :  { %v3075_v10 = vand.u32 65535, %v3071_v22  ;;  %v3076_v53 = vshrl.u32 %v3071_v22, 16  ;;  %v2444_v35 = vsel %vm5997_vm15, 0, %v5983_v45  ;;  %v3040_v0 = vshrl.u32 %v4172_v47, %v5923_v36 }
 0x6a1   :  { %v3100_v9 = vmul.u32 %v3098_v28, %v3073_v44  ;;  %v3101_v14 = vmul.u32 %v3097_v27, %v3074_v25  ;;  %v2440_v63 = vsel %vm2319_vm13, %v2439_v62, %v2438_v15  ;;  %v3099_v51 = vmul.u32 %v3097_v27, %v3073_v44 }
 0x6a2   :  { %v3078_v33 = vmul.u32 %v3076_v53, %v3073_v44  ;;  %v3079_v7 = vmul.u32 %v3075_v10, %v3074_v25  ;;  %v2443_v5 = vsel %vm5997_vm15, %v5829_v24, %v2440_v63  ;;  %v3077_v38 = vmul.u32 %v3075_v10, %v3073_v44 }
 0x6a3   :  { %v3103_v20 = vshll.u32 %v3100_v9, 16  ;;  %v2445_v58 = vmul.f32 %v2443_v5, %v2443_v5  ;;  %v3102_v48 = vmul.u32 %v3098_v28, %v3074_v25  ;;  %v3080_v32 = vmul.u32 %v3076_v53, %v3074_v25 }
 0x6a4   :  { %v3081_v3 = vshll.u32 %v3078_v33, 16  ;;  %v3083_v39 = vshll.u32 %v3079_v7, 16  ;;  %v3105_v49 = vshll.u32 %v3101_v14, 16  ;;  %v3061_v52 = vsel %vm3059_vm1, %v5951_v61, 2102212464 }
 0x6a5   :  { %vm3107_vm6 = vc.u32 %v3099_v51, %v3103_v20  ;;  %v3109_v46 = vadd.s32 %v3103_v20, %v3099_v51  ;;  %v2446_v22 = vmul.f32 -0.001358992, %v2445_v58  ;;  %v2453_v27 = vmul.f32 -0.00019511016, %v2445_v58 }
 0x6a6   :  { %vm3085_vm7 = vc.u32 %v3077_v38, %v3081_v3  ;;  %v3087_v45 = vadd.s32 %v3081_v3, %v3077_v38  ;;  %v3108_v15 = vsel %vm3107_vm6, 1, %v4178_v31  ;;  %v3082_v53 = vshrl.u32 %v3078_v33, 16 }
 0x6a7   :  { %v3086_v18 = vsel %vm3085_vm7, 1, %v4178_v31  ;;  %v3110_v36 = vadd.s32 %v3108_v15, %v3102_v48  ;;  %vm3111_vm9 = vc.u32 %v3109_v46, %v3105_v49  ;;  %v2447_v62 = vadd.f32 0.041655596, %v2446_v22 }
 0x6a8   :  { %v3088_v44 = vadd.s32 %v3086_v18, %v3080_v32  ;;  %vm3089_vm8 = vc.u32 %v3087_v45, %v3083_v39  ;;  %v3112_v28 = vsel %vm3111_vm9, 1, %v4178_v31  ;;  %v2454_v10 = vadd.f32 0.008332121, %v2453_v27 }
 0x6a9   :  { %v3090_v25 = vsel %vm3089_vm8, 1, %v4178_v31  ;;  %v3104_v63 = vshrl.u32 %v3100_v9, 16  ;;  %v3114_v51 = vadd.s32 %v3112_v28, %v3110_v36  ;;  %v3060_v20 = vsel %vm3056_vm12, %v3040_v0, %v5942_v2 }
 0x6aa   :  { %v3092_v26 = vadd.s32 %v3090_v25, %v3088_v44  ;;  %v3062_v61 = vsel %vm3058_vm14, %v5949_v30, %v3061_v52  ;;  %v2448_v38 = vmul.f32 %v2447_v62, %v2445_v58  ;;  %v2455_v3 = vmul.f32 %v2454_v10, %v2445_v58  ;;  %v6038_v62 = vld [vmem:[#allocation10 + $0x70] sm:$0xff]  ;;  %v3473_v10 = vld [vmem:[#allocation9 + $0x78] sm:$0xff] }
 0x6ab   :  { %v3084_v48 = vshrl.u32 %v3079_v7, 16  ;;  %v3106_v39 = vshrl.u32 %v3101_v14, 16  ;;  %v3115_v45 = vadd.s32 %v3114_v51, %v3104_v63  ;;  %v2461_v33 = vadd.s32 3, %v2444_v35  ;;  %3474 = vmatpush.msrb.mxu1 %v3473_v10  ;;  %v6044_v51 = vld [vmem:[#allocation10 + $0x68] sm:$0xff] }
 0x6ac   :  { %v3093_v32 = vadd.s32 %v3092_v26, %v3082_v53  ;;  %v2449_v15 = vadd.f32 -0.4999988, %v2448_v38  ;;  %v2456_v18 = vadd.f32 -0.16666654, %v2455_v3  ;;  %v3063_v9 = vsel %vm3057_vm3, %v3060_v20, %v3062_v61  ;;  %v3471_v20 = vld [vmem:[#allocation9 + $0x68] sm:$0xff]  ;;  %v3996_v3 = vpop.eup %3995 }
 0x6ad   :  { %v6030_v22 = vadd.s32 %v3109_v46, %v3105_v49  ;;  %v3116_v2 = vadd.s32 %v3115_v45, %v3106_v39  ;;  %v3117_v14 = vmul.u32 %v5955_v59, %v3063_v9  ;;  %v2462_v35 = vand.u32 3, %v2461_v33  ;;  %v3470_v39 = vld [vmem:[#allocation9 + $0x60] sm:$0xff]  ;;  %v6062_v9 = vld [vmem:[#allocation10 + $0x58] sm:$0xff] }
 0x6ae   :  { %v6028_v36 = vadd.s32 %v3093_v32, %v3084_v48  ;;  %v2450_v0 = vmul.f32 %v2449_v15, %v2445_v58  ;;  %v2457_v27 = vmul.f32 %v2456_v18, %v2445_v58  ;;  %v6036_v58 = vld [vmem:[#allocation10 + $0x78] sm:$0xff]  ;;  %vm2460_vm1 = vweird.f32 %v5829_v24  ;;  %v6051_v32 = vld [vmem:[#allocation10 + $0x60] sm:$0xff] }
 0x6af   :  { %v3120_v30 = vadd.s32 1, %v3116_v2  ;;  %vm2464_vm11 = vcmp.eq.s32.totalorder %v2462_v35, 0  ;;  %vm2467_vm12 = vcmp.eq.s32.totalorder %v2462_v35, 2  ;;  %vm2463_vm13 = vcmp.lt.s32.totalorder %v2462_v35, 2  ;;  %3201 = vmatpush.msra.mxu2 %v6036_v58  ;;  %v6059_v18 = vld [vmem:[%s6505_s6] ss:$0 sm:$0xff] }
 0x6b0   :  { %vm3119_vm10 = vc.u32 %v6028_v36, %v6030_v22  ;;  %v2451_v7 = vadd.f32 1.0, %v2450_v0  ;;  %v2458_v52 = vadd.f32 1.0, %v2457_v27  ;;  %v2748_v0 = vpop.f32.mrf.mxu2  ;;  %v3467_v35 = vld [vmem:[#allocation9 + $0x48] sm:$0xff]  ;;  %v3118_v10 = vadd.s32 %v6030_v22, %v6028_v36  ;;  %v6087_v36 = vld [vmem:[#allocation10 + $0x20] sm:$0xff] }
 0x6b1   :  { %v3121_v44 = vsel %vm3119_vm10, %v3120_v30, %v3116_v2  ;;  %3202 = vmatpush.msra.mxu2 %v6038_v62  ;;  %v6065_v30 = vld [vmem:[#allocation10 + $0x50] sm:$0xff]  ;;  %vm3026_vm15 = vcmp.lt.s32.totalorder %v5903_v60, 0  ;;  %vm6108_vm6 = vcmp.le.f32.partialorder %v3024_v56, 0.7853982  ;;  %vm3167_vm10 = vweird.f32 %v5903_v60 }
 0x6b2   :  { %v3122_v25 = vadd.s32 %v3121_v44, %v3117_v14  ;;  %v2459_v1 = vmul.f32 %v2458_v52, %v2443_v5  ;;  %v2468_v28 = vxor.u32 2147483648, %v2451_v7  ;;  %v3472_v5 = vld [vmem:[#allocation9 + $0x70] sm:$0xff]  ;;  %v6068_v44 = vld [vmem:[#allocation10 + $0x48] sm:$0xff] }
 0x6b3   :  { %3475 = vmatpush.msrb.mxu1 %v3472_v5  ;;  %3203 = vmatpush.msra.mxu2 %v6044_v51  ;;  %v3468_v14 = vld [vmem:[#allocation9 + $0x50] sm:$0xff] }
 0x6b4   :  { %v3123_v49 = vadd.s32 536870912, %v3122_v25  ;;  %v2465_v46 = vxor.u32 2147483648, %v2459_v1  ;;  %v2469_v26 = vsel %vm2467_vm12, %v2468_v28, %v2459_v1  ;;  %v6071_v1 = vld [vmem:[#allocation10 + $0x40] sm:$0xff]  ;;  %v6079_v5 = vld [vmem:[#allocation10 + $0x30] sm:$0xff] }
 0x6b5   :  { %3476 = vmatpush.msrb.mxu1 %v3471_v20  ;;  %3204 = vmatpush.msra.mxu2 %v6051_v32  ;;  %v3466_v28 = vld [vmem:[#allocation9 + $0x40] sm:$0xff] }
 0x6b6   :  { %v6040_v53 = vshrl.u32 %v3123_v49, 30  ;;  %v2466_v59 = vsel %vm2464_vm11, %v2451_v7, %v2465_v46  ;;  %v6074_v49 = vld [vmem:[#allocation10 + $0x38] sm:$0xff] }
 0x6b7   :  { %v2470_v63 = vsel %vm2463_vm13, %v2466_v59, %v2469_v26  ;;  %3477 = vmatpush.msrb.mxu1 %v3470_v39  ;;  %3205 = vmatpush.msra.mxu2 %v6062_v9  ;;  %v6091_v39 = vld [vmem:[#allocation10 + $0x18] sm:$0xff] }
 0x6b8   :  { %v3125_v61 = vshll.u32 %v6040_v53, 30  ;;  %v2471_v38 = vsel %vm2460_vm1, nan, %v2470_v63 }
 0x6b9   :  { %v2472_v48 = vsel %vm434_vm0, %v2471_v38, %v5829_v24  ;;  %v3469_v24 = vld [vmem:[#allocation9 + $0x58] sm:$0xff]  ;;  %3206 = vmatpush.msra.mxu2 %v6065_v30  ;;  %v6083_v38 = vld [vmem:[#allocation10 + $0x28] sm:$0xff] }
 0x6ba   :  { %v3126_v45 = vsub.s32 %v3122_v25, %v3125_v61  ;;  %v2474_v15 = vsel %vm4797_vm4, %v3996_v3, %v2472_v48  ;;  %3478 = vmatpush.msrb.mxu1 %v3469_v24  ;;  %v3184_v24 = vld [vmem:[#allocation10] sm:$0xff] }
 0x6bb   :  { %v2475_v33 = vmul.f32 %v6059_v18, %v2474_v15  ;;  %3207 = vmatpush.msra.mxu2 %v6068_v44  ;;  %v6095_v15 = vld [vmem:[#allocation10 + $0x10] sm:$0xff] }
 0x6bc   :  { %vm3127_vm14 = vcmp.lt.s32.totalorder %v3126_v45, 0  ;;  %v3128_v2 = vsub.s32 0, %v3126_v45  ;;  %3479 = vmatpush.msrb.mxu1 %v3468_v14 }
 0x6bd   :  { %2478 = vst [vmem:[#allocation13 + $0x20] sm:$0xff] %v2475_v33  ;;  %v2749_v27 = vadd.f32 %v2748_v0, %v2475_v33  ;;  %3208 = vmatpush.msra.mxu2 %v6071_v1  ;;  %v6099_v33 = vld [vmem:[#allocation10 + $0x8] sm:$0xff] }
 0x6be   :  { %v3129_v7 = vsel %vm3127_vm14, %v3128_v2, %v3126_v45  ;;  %3480 = vmatpush.msrb.mxu1 %v3467_v35 }
 0x6bf   :  { %v3130_v52 = vclz %v3129_v7  ;;  %2783 = vmatmul.f32.vlgmr.msrb.gmra.mxu3 %v2749_v27  ;;  %3209 = vmatpush.msra.mxu2 %v6074_v49 }
 0x6c0   :  { %3481 = vmatpush.msrb.mxu1 %v3466_v28 }
 0x6c1   :  { %v3947_v25 = vadd.s32 4294967294, %v3130_v52  ;;  %3210 = vmatpush.msra.mxu2 %v6079_v5 }
 0x6c2   :  { %3482 = vmatpush.msrb.mxu1 %v5793_v41 }
 0x6c3   :  { %vm3948_vm3 = vcmp.lt.s32.totalorder %v3947_v25, 0  ;;  %3211 = vmatpush.msra.mxu2 %v6083_v38 }
 0x6c4   :  { %v3133_v46 = vsel %vm3948_vm3, 0, %v3947_v25  ;;  %3483 = vmatpush.msrb.mxu1 %v5795_v37 }
 0x6c5   :  { %v3134_v59 = vsub.s32 32, %v3133_v46  ;;  %v3138_v26 = vsub.s32 4294967266, %v3133_v46  ;;  %v3135_v63 = vshll.u32 %v3126_v45, %v3133_v46  ;;  %3212 = vmatpush.msra.mxu2 %v6087_v36 }
 0x6c6   :  { %3484 = vmatpush.msrb.mxu1 %v5798_v34 }
 0x6c7   :  { %v3136_v20 = vshrl.u32 %v3118_v10, %v3134_v59  ;;  %v3139_v61 = vadd.s32 127, %v3138_v26  ;;  %3213 = vmatpush.msra.mxu2 %v6091_v39 }
 0x6c8   :  { %3485 = vmatpush.msrb.mxu1 %v5801_v55 }
 0x6c9   :  { %v3137_v3 = vor.u32 %v3136_v20, %v3135_v63  ;;  %v3140_v48 = vshll.u32 %v3139_v61, 23  ;;  %3214 = vmatpush.msra.mxu2 %v6095_v15  ;;  %v3998_v20 = vpop.eup %3997  ;;  %v3455_v61 = vpop.f32.mrf.mxu0 }
 0x6ca   :  { %3486 = vmatpush.msrb.mxu1 %v5804_v21 }
 0x6cb   :  { %v3141_v22 = vor.u32 4788187, %v3140_v48  ;;  %v3144_v45 = vcvt.s32.f32 %v3137_v3  ;;  %3215 = vmatpush.msra.mxu2 %v6099_v33 }
 0x6cc   :  { %3487 = vmatpush.msrb.mxu1 %v5807_v17  ;;  %v3148_v17 = vsub.s32 4, %v6040_v53 }
 0x6cd   :  { %v3142_v41 = vand.u32 2147483647, %v3141_v22  ;;  %3216 = vmatpush.msra.mxu2 %v3184_v24 }
 0x6ce   :  { %3488 = vmatpush.msrb.mxu1 %v5811_v6  ;;  %v3149_v56 = vsel %vm3026_vm15, %v3148_v17, %v6040_v53 }
 0x6cf   :  { %v3145_v37 = vmul.f32 %v3144_v45, %v3142_v41  ;;  %3671 = vmatpush.msrb.mxu2 %v6036_v58  ;;  %v3151_v52 = vsel %vm6108_vm6, 0, %v3149_v56 }
 0x6d0   :  { %3489 = vmatpush.msrb.mxu1 %v5813_v54  ;;  %v3168_v58 = vadd.s32 3, %v3151_v52 }
 0x6d1   :  { %v3146_v34 = vxor.u32 2147483648, %v3145_v37  ;;  %3672 = vmatpush.msrb.mxu2 %v6038_v62 }
 0x6d3   :  { %v3147_v21 = vsel %vm3026_vm15, %v3146_v34, %v3145_v37  ;;  %3673 = vmatpush.msrb.mxu2 %v6044_v51  ;;  %v3169_v51 = vand.u32 3, %v3168_v58 }
 0x6d4   :  { %v3150_v2 = vsel %vm6108_vm6, %v5903_v60, %v3147_v21 }
 0x6d5   :  { %v3152_v0 = vmul.f32 %v3150_v2, %v3150_v2  ;;  %3674 = vmatpush.msrb.mxu2 %v6051_v32  ;;  %vm3171_vm7 = vcmp.eq.s32.totalorder %v3169_v51, 0  ;;  %vm3174_vm8 = vcmp.eq.s32.totalorder %v3169_v51, 2  ;;  %vm3170_vm9 = vcmp.lt.s32.totalorder %v3169_v51, 2 }
 0x6d7   :  { %v3153_v6 = vmul.f32 -0.001358992, %v3152_v0  ;;  %v3160_v27 = vmul.f32 -0.00019511016, %v3152_v0  ;;  %3675 = vmatpush.msrb.mxu2 %v6062_v9 }
 0x6d9   :  { %v3154_v14 = vadd.f32 0.041655596, %v3153_v6  ;;  %v3161_v7 = vadd.f32 0.008332121, %v3160_v27  ;;  %3676 = vmatpush.msrb.mxu2 %v6065_v30 }
 0x6db   :  { %v3155_v35 = vmul.f32 %v3154_v14, %v3152_v0  ;;  %v3162_v25 = vmul.f32 %v3161_v7, %v3152_v0  ;;  %3677 = vmatpush.msrb.mxu2 %v6068_v44 }
 0x6dd   :  { %v3156_v54 = vadd.f32 -0.4999988, %v3155_v35  ;;  %v3163_v28 = vadd.f32 -0.16666654, %v3162_v25  ;;  %3678 = vmatpush.msrb.mxu2 %v6071_v1 }
 0x6df   :  { %v3157_v46 = vmul.f32 %v3156_v54, %v3152_v0  ;;  %v3164_v62 = vmul.f32 %v3163_v28, %v3152_v0  ;;  %3679 = vmatpush.msrb.mxu2 %v6074_v49 }
 0x6e1   :  { %v3158_v53 = vadd.f32 1.0, %v3157_v46  ;;  %v3165_v10 = vadd.f32 1.0, %v3164_v62  ;;  %3680 = vmatpush.msrb.mxu2 %v6079_v5  ;;  %v6142_v5 = vld [vmem:[%s6502_s3] ss:$0 sm:$0xff] }
 0x6e3   :  { %v3166_v59 = vmul.f32 %v3165_v10, %v3150_v2  ;;  %v3175_v26 = vxor.u32 2147483648, %v3158_v53  ;;  %3681 = vmatpush.msrb.mxu2 %v6083_v38 }
 0x6e5   :  { %v3172_v32 = vxor.u32 2147483648, %v3166_v59  ;;  %v3176_v63 = vsel %vm3174_vm8, %v3175_v26, %v3166_v59  ;;  %3682 = vmatpush.msrb.mxu2 %v6087_v36 }
 0x6e7   :  { %v3173_v9 = vsel %vm3171_vm7, %v3158_v53, %v3172_v32  ;;  %3683 = vmatpush.msrb.mxu2 %v6091_v39 }
 0x6e8   :  { %v3177_v30 = vsel %vm3170_vm9, %v3173_v9, %v3176_v63 }
 0x6e9   :  { %v3178_v44 = vsel %vm3167_vm10, nan, %v3177_v30  ;;  %3684 = vmatpush.msrb.mxu2 %v6095_v15 }
 0x6ea   :  { %v3179_v1 = vsel %vm196_vm2, %v3178_v44, %v5903_v60 }
 0x6eb   :  { %v3181_v49 = vsel %vm4522_vm5, %v3998_v20, %v3179_v1  ;;  %3685 = vmatpush.msrb.mxu2 %v6099_v33 }
 0x6ec   :  { %v3182_v3 = vmul.f32 %v6142_v5, %v3181_v49 }
 0x6ed   :  { %3686 = vmatpush.msrb.mxu2 %v3184_v24 }
 0x6ee   :  { %v3456_v38 = vadd.f32 %v3455_v61, %v3182_v3  ;;  %3217 = vmatmul.f32.vlgmr.msra.gmra.mxu2 %v3182_v3 }
 0x6f0   :  { %3490 = vmatmul.f32.vlgmr.msrb.gmra.mxu1 %v3456_v38 }
 0x742   :  { %v6148_v60 = vpop.f32.mrf.mxu3 }
 0x743   :  { %v2790_v48 = vand.u32 2139095040, %v6148_v60  ;;  %v2787_v41 = vand.u32 2147483647, %v6148_v60  ;;  %3999 = vtanh.f32 %v6148_v60 }
 0x745   :  { %v2791_v36 = vshrl.u32 %v2790_v48, 23  ;;  %v2794_v39 = vand.u32 8388607, %v2787_v41 }
 0x747   :  { %v3943_v22 = vadd.s32 4294967169, %v2791_v36  ;;  %v2795_v55 = vor.u32 8388608, %v2794_v39 }
 0x749   :  { %v2797_v45 = vadd.s32 1, %v3943_v22  ;;  %v6167_v58 = vshll.u32 %v2795_v55, 8 }
 0x74b   :  { %vm2798_vm11 = vcmp.gt.s32.totalorder %v2797_v45, 0  ;;  %v2836_v9 = vand.u32 65535, %v6167_v58  ;;  %v2837_v63 = vshrl.u32 %v6167_v58, 16 }
 0x74c   :  { %v2799_v37 = vsel %vm2798_vm11, %v2797_v45, 0 }
 0x74d   :  { %v2801_v34 = vand.u32 31, %v2799_v37  ;;  %v6154_v21 = vshrl.u32 %v2799_v37, 5 }
 0x74f   :  { %v2802_v15 = vsub.s32 32, %v2801_v34  ;;  %v2804_v33 = vshll.u32 %v4172_v47, %v2801_v34  ;;  %v2807_v24 = vshll.u32 %v6531_v4, %v2801_v34  ;;  %v2810_v0 = vshll.u32 %v6532_v8, %v2801_v34 }
 0x750   :  { %v2813_v27 = vshll.u32 %v6533_v42, %v2801_v34  ;;  %v2816_v14 = vshll.u32 %v6534_v11, %v2801_v34  ;;  %vm2819_vm12 = vcmp.lt.s32.totalorder %v6154_v21, 1  ;;  %vm2822_vm13 = vcmp.lt.s32.totalorder %v6154_v21, 4 }
 0x751   :  { %v2805_v2 = vshrl.u32 %v6531_v4, %v2802_v15  ;;  %v2808_v17 = vshrl.u32 %v6532_v8, %v2802_v15  ;;  %v2811_v6 = vshrl.u32 %v6533_v42, %v2802_v15  ;;  %v2814_v56 = vshrl.u32 %v6534_v11, %v2802_v15 }
 0x752   :  { %v2817_v7 = vshrl.u32 %v6535_v12, %v2802_v15  ;;  %vm2821_vm1 = vcmp.lt.s32.totalorder %v6154_v21, 3  ;;  %vm2820_vm14 = vcmp.lt.s32.totalorder %v6154_v21, 2 }
 0x753   :  { %v2806_v52 = vor.u32 %v2805_v2, %v2804_v33  ;;  %v2809_v35 = vor.u32 %v2808_v17, %v2807_v24  ;;  %v2812_v25 = vor.u32 %v2811_v6, %v2810_v0  ;;  %v2815_v54 = vor.u32 %v2814_v56, %v2813_v27 }
 0x754   :  { %v2818_v28 = vor.u32 %v2817_v7, %v2816_v14  ;;  %v2803_v14 = vshrl.u32 %v4172_v47, %v2802_v15 }
 0x755   :  { %v2827_v46 = vsel %vm2819_vm12, %v2806_v52, %v2809_v35  ;;  %v2831_v62 = vsel %vm2819_vm12, %v2809_v35, %v2812_v25  ;;  %v2828_v53 = vsel %vm2822_vm13, %v2815_v54, 920167782  ;;  %v2824_v6 = vsel %vm2822_vm13, %v2812_v25, 2102212464 }
 0x756   :  { %v2832_v10 = vsel %vm2822_vm13, %v2818_v28, 1326507024  ;;  %v2829_v51 = vsel %vm2821_vm1, %v2812_v25, %v2828_v53  ;;  %v2823_v53 = vsel %vm2819_vm12, %v2803_v14, %v2806_v52 }
 0x757   :  { %v2833_v59 = vsel %vm2821_vm1, %v2815_v54, %v2832_v10  ;;  %v2830_v26 = vsel %vm2820_vm14, %v2827_v46, %v2829_v51  ;;  %v2825_v10 = vsel %vm2821_vm1, %v2809_v35, %v2824_v6 }
 0x758   :  { %v2834_v32 = vsel %vm2820_vm14, %v2831_v62, %v2833_v59  ;;  %v2860_v20 = vand.u32 65535, %v2830_v26  ;;  %v2861_v1 = vshrl.u32 %v2830_v26, 16  ;;  %v2826_v15 = vsel %vm2820_vm14, %v2823_v53, %v2825_v10 }
 0x759   :  { %v2838_v30 = vand.u32 65535, %v2834_v32  ;;  %v2839_v44 = vshrl.u32 %v2834_v32, 16 }
 0x75a   :  { %v2863_v3 = vmul.u32 %v2861_v1, %v2836_v9  ;;  %v2864_v38 = vmul.u32 %v2860_v20, %v2837_v63  ;;  %v2862_v45 = vmul.u32 %v2860_v20, %v2836_v9  ;;  %v2865_v55 = vmul.u32 %v2861_v1, %v2837_v63 }
 0x75b   :  { %v2841_v49 = vmul.u32 %v2839_v44, %v2836_v9  ;;  %v2842_v61 = vmul.u32 %v2838_v30, %v2837_v63  ;;  %v2840_v48 = vmul.u32 %v2838_v30, %v2836_v9  ;;  %v2843_v22 = vmul.u32 %v2839_v44, %v2837_v63 }
 0x75c   :  { %v2866_v39 = vshll.u32 %v2863_v3, 16  ;;  %v2868_v24 = vshll.u32 %v2864_v38, 16  ;;  %v2867_v46 = vshrl.u32 %v2863_v3, 16  ;;  %v2869_v59 = vshrl.u32 %v2864_v38, 16 }
 0x75d   :  { %v2844_v36 = vshll.u32 %v2841_v49, 16  ;;  %v2846_v37 = vshll.u32 %v2842_v61, 16  ;;  %v2845_v7 = vshrl.u32 %v2841_v49, 16  ;;  %v2847_v51 = vshrl.u32 %v2842_v61, 16 }
 0x75e   :  { %vm2870_vm15 = vc.u32 %v2862_v45, %v2866_v39  ;;  %v2872_v2 = vadd.s32 %v2866_v39, %v2862_v45  ;;  %v2880_v44 = vmul.u32 %v6167_v58, %v2826_v15 }
 0x75f   :  { %vm2848_vm3 = vc.u32 %v2840_v48, %v2844_v36  ;;  %v2850_v34 = vadd.s32 %v2844_v36, %v2840_v48  ;;  %v2871_v0 = vsel %vm2870_vm15, 1, %v4178_v31  ;;  %vm2789_vm15 = vcmp.lt.s32.totalorder %v6148_v60, 0 }
 0x760   :  { %v2849_v33 = vsel %vm2848_vm3, 1, %v4178_v31  ;;  %v2873_v56 = vadd.s32 %v2871_v0, %v2865_v55  ;;  %vm2874_vm7 = vc.u32 %v2872_v2, %v2868_v24  ;;  %v2876_v9 = vadd.s32 %v2872_v2, %v2868_v24 }
 0x761   :  { %v2851_v17 = vadd.s32 %v2849_v33, %v2843_v22  ;;  %vm2852_vm6 = vc.u32 %v2850_v34, %v2846_v37  ;;  %v2875_v28 = vsel %vm2874_vm7, 1, %v4178_v31  ;;  %vm6258_vm3 = vcmp.le.f32.partialorder %v2787_v41, 0.7853982 }
 0x762   :  { %v2853_v27 = vsel %vm2852_vm6, 1, %v4178_v31  ;;  %v2877_v62 = vadd.s32 %v2875_v28, %v2873_v56 }
 0x763   :  { %v2855_v54 = vadd.s32 %v2853_v27, %v2851_v17 }
 0x764   :  { %v2878_v26 = vadd.s32 %v2877_v62, %v2867_v46 }
 0x765   :  { %v2856_v25 = vadd.s32 %v2855_v54, %v2845_v7 }
 0x766   :  { %v2879_v63 = vadd.s32 %v2878_v26, %v2869_v59 }
 0x767   :  { %v2857_v32 = vadd.s32 %v2856_v25, %v2847_v51 }
 0x768   :  { %v2883_v30 = vadd.s32 1, %v2879_v63 }
 0x769   :  { %vm2882_vm8 = vc.u32 %v2857_v32, %v2876_v9  ;;  %v2881_v55 = vadd.s32 %v2876_v9, %v2857_v32 }
 0x76a   :  { %v2884_v20 = vsel %vm2882_vm8, %v2883_v30, %v2879_v63 }
 0x76b   :  { %v2885_v1 = vadd.s32 %v2884_v20, %v2880_v44 }
 0x76d   :  { %v6204_v52 = vpop.f32.mrf.mxu1  ;;  %v2886_v49 = vadd.s32 536870912, %v2885_v1 }
 0x76e   :  { %v3497_v35 = vand.u32 2139095040, %v6204_v52  ;;  %v3494_v38 = vand.u32 2147483647, %v6204_v52  ;;  %4001 = vtanh.f32 %v6204_v52 }
 0x76f   :  { %v6207_v3 = vshrl.u32 %v2886_v49, 30 }
 0x770   :  { %v3498_v61 = vshrl.u32 %v3497_v35, 23  ;;  %v3501_v58 = vand.u32 8388607, %v3494_v38 }
 0x771   :  { %v2888_v21 = vshll.u32 %v6207_v3, 30 }
 0x772   :  { %v3952_v48 = vadd.s32 4294967169, %v3498_v61  ;;  %v3502_v24 = vor.u32 8388608, %v3501_v58 }
 0x773   :  { %v2889_v22 = vsub.s32 %v2885_v1, %v2888_v21 }
 0x774   :  { %v3504_v36 = vadd.s32 1, %v3952_v48  ;;  %v6227_v25 = vshll.u32 %v3502_v24, 8 }
 0x775   :  { %vm2890_vm10 = vcmp.lt.s32.totalorder %v2889_v22, 0  ;;  %v2891_v45 = vsub.s32 0, %v2889_v22 }
 0x776   :  { %vm3505_vm9 = vcmp.gt.s32.totalorder %v3504_v36, 0 }
 0x777   :  { %v3506_v39 = vsel %vm3505_vm9, %v3504_v36, 0  ;;  %v2892_v34 = vsel %vm2890_vm10, %v2891_v45, %v2889_v22 }
 0x778   :  { %v3508_v37 = vand.u32 31, %v3506_v39  ;;  %v2893_v33 = vclz %v2892_v34  ;;  %v6213_v17 = vshrl.u32 %v3506_v39, 5  ;;  %v6249_v39 = vld [vmem:[#allocation12 + $0x68] sm:$0xff]  ;;  %v3543_v34 = vand.u32 65535, %v6227_v25 }
 0x779   :  { %3239 = vmatpush.msra.mxu3 %v6249_v39 }
 0x77a   :  { %v3509_v2 = vsub.s32 32, %v3508_v37  ;;  %v3511_v0 = vshll.u32 %v4172_v47, %v3508_v37  ;;  %v3514_v6 = vshll.u32 %v6531_v4, %v3508_v37  ;;  %v3517_v27 = vshll.u32 %v6532_v8, %v3508_v37 }
 0x77b   :  { %v3944_v56 = vadd.s32 4294967294, %v2893_v33  ;;  %v3520_v54 = vshll.u32 %v6533_v42, %v3508_v37  ;;  %v3523_v62 = vshll.u32 %v6534_v11, %v3508_v37  ;;  %vm3526_vm12 = vcmp.lt.s32.totalorder %v6213_v17, 1 }
 0x77c   :  { %v3512_v14 = vshrl.u32 %v6531_v4, %v3509_v2  ;;  %v3515_v7 = vshrl.u32 %v6532_v8, %v3509_v2  ;;  %v3518_v28 = vshrl.u32 %v6533_v42, %v3509_v2  ;;  %v3521_v46 = vshrl.u32 %v6534_v11, %v3509_v2 }
 0x77d   :  { %v3524_v53 = vshrl.u32 %v6535_v12, %v3509_v2  ;;  %vm3945_vm11 = vcmp.lt.s32.totalorder %v3944_v56, 0  ;;  %vm3529_vm13 = vcmp.lt.s32.totalorder %v6213_v17, 4  ;;  %vm3527_vm1 = vcmp.lt.s32.totalorder %v6213_v17, 2 }
 0x77e   :  { %v3513_v10 = vor.u32 %v3512_v14, %v3511_v0  ;;  %v6225_v51 = vor.u32 %v3515_v7, %v3514_v6  ;;  %v2896_v59 = vsel %vm3945_vm11, 0, %v3944_v56  ;;  %v3519_v26 = vor.u32 %v3518_v28, %v3517_v27  ;;  %v6263_v56 = vld [vmem:[#allocation12 + $0x60] sm:$0xff] }
 0x77f   :  { %v3522_v32 = vor.u32 %v3521_v46, %v3520_v54  ;;  %v3525_v9 = vor.u32 %v3524_v53, %v3523_v62  ;;  %v2897_v15 = vsub.s32 32, %v2896_v59  ;;  %v2901_v63 = vsub.s32 4294967266, %v2896_v59  ;;  %3240 = vmatpush.msra.mxu3 %v6263_v56 }
 0x780   :  { %vm3528_vm14 = vcmp.lt.s32.totalorder %v6213_v17, 3  ;;  %v3534_v30 = vsel %vm3526_vm12, %v3513_v10, %v6225_v51  ;;  %v2898_v20 = vshll.u32 %v2889_v22, %v2896_v59  ;;  %v3538_v48 = vsel %vm3526_vm12, %v6225_v51, %v3519_v26  ;;  %v6268_v59 = vld [vmem:[#allocation12 + $0x58] sm:$0xff] }
 0x781   :  { %v3535_v44 = vsel %vm3529_vm13, %v3522_v32, 920167782  ;;  %v2899_v1 = vshrl.u32 %v2881_v55, %v2897_v15  ;;  %v2902_v35 = vadd.s32 127, %v2901_v63  ;;  %v3539_v21 = vsel %vm3529_vm13, %v3525_v9, 1326507024  ;;  %3241 = vmatpush.msra.mxu3 %v6268_v59 }
 0x782   :  { %v3536_v49 = vsel %vm3528_vm14, %v3519_v26, %v3535_v44  ;;  %v3540_v22 = vsel %vm3528_vm14, %v3522_v32, %v3539_v21  ;;  %v3544_v55 = vshrl.u32 %v6227_v25, 16  ;;  %v3510_v14 = vshrl.u32 %v4172_v47, %v3509_v2 }
 0x783   :  { %v3537_v61 = vsel %vm3527_vm1, %v3534_v30, %v3536_v49  ;;  %v2900_v36 = vor.u32 %v2899_v1, %v2898_v20  ;;  %v2903_v58 = vshll.u32 %v2902_v35, 23  ;;  %v3541_v37 = vsel %vm3527_vm1, %v3538_v48, %v3540_v22  ;;  %3242 = vmatpush.msra.mxu3 %v5909_v16 }
 0x784   :  { %v3567_v45 = vand.u32 65535, %v3537_v61  ;;  %v3568_v33 = vshrl.u32 %v3537_v61, 16  ;;  %v3545_v6 = vand.u32 65535, %v3541_v37  ;;  %v3546_v27 = vshrl.u32 %v3541_v37, 16 }
 0x785   :  { %v2904_v0 = vor.u32 4788187, %v2903_v58  ;;  %v2911_v28 = vsub.s32 4, %v6207_v3  ;;  %v2907_v41 = vcvt.s32.f32 %v2900_v36  ;;  %v3530_v32 = vsel %vm3526_vm12, %v3510_v14, %v3513_v10  ;;  %3243 = vmatpush.msra.mxu3 %v5912_v50 }
 0x786   :  { %v3570_v7 = vmul.u32 %v3568_v33, %v3543_v34  ;;  %v3571_v54 = vmul.u32 %v3567_v45, %v3544_v55  ;;  %v3548_v62 = vmul.u32 %v3546_v27, %v3543_v34  ;;  %v3549_v53 = vmul.u32 %v3545_v6, %v3544_v55 }
 0x787   :  { %v2905_v46 = vand.u32 2147483647, %v2904_v0  ;;  %v3569_v9 = vmul.u32 %v3567_v45, %v3543_v34  ;;  %v3572_v15 = vmul.u32 %v3568_v33, %v3544_v55  ;;  %v3547_v30 = vmul.u32 %v3545_v6, %v3543_v34  ;;  %3244 = vmatpush.msra.mxu3 %v5915_v57 }
 0x788   :  { %v3573_v63 = vshll.u32 %v3570_v7, 16  ;;  %v3550_v44 = vmul.u32 %v3546_v27, %v3544_v55  ;;  %v3551_v20 = vshll.u32 %v3548_v62, 16  ;;  %v3553_v1 = vshll.u32 %v3549_v53, 16  ;;  %v6290_v27 = vld [vmem:[#allocation12 + $0x38] sm:$0xff] }
 0x789   :  { %v2908_v2 = vmul.f32 %v2907_v41, %v2905_v46  ;;  %v3575_v35 = vshll.u32 %v3571_v54, 16  ;;  %v3531_v21 = vsel %vm3529_vm13, %v3519_v26, 2102212464  ;;  %v3574_v26 = vshrl.u32 %v3570_v7, 16  ;;  %3245 = vmatpush.msra.mxu3 %v6290_v27 }
 0x78a   :  { %vm3577_vm6 = vc.u32 %v3569_v9, %v3573_v63  ;;  %v3579_v49 = vadd.s32 %v3573_v63, %v3569_v9  ;;  %vm3555_vm7 = vc.u32 %v3547_v30, %v3551_v20  ;;  %v3557_v48 = vadd.s32 %v3551_v20, %v3547_v30  ;;  %v6296_v63 = vld [vmem:[#allocation12 + $0x30] sm:$0xff]  ;;  %v6301_v20 = vld [vmem:[#allocation12 + $0x28] sm:$0xff] }
 0x78b   :  { %v2909_v61 = vxor.u32 2147483648, %v2908_v2  ;;  %v3578_v10 = vsel %vm3577_vm6, 1, %v4178_v31  ;;  %v3556_v36 = vsel %vm3555_vm7, 1, %v4178_v31  ;;  %v3532_v50 = vsel %vm3528_vm14, %v6225_v51, %v3531_v21  ;;  %3246 = vmatpush.msra.mxu3 %v6296_v63 }
 0x78c   :  { %v3580_v58 = vadd.s32 %v3578_v10, %v3572_v15  ;;  %vm3581_vm8 = vc.u32 %v3579_v49, %v3575_v35  ;;  %v3558_v45 = vadd.s32 %v3556_v36, %v3550_v44  ;;  %vm3559_vm9 = vc.u32 %v3557_v48, %v3553_v1 }
 0x78d   :  { %v2910_v22 = vsel %vm2789_vm15, %v2909_v61, %v2908_v2  ;;  %v3582_v16 = vsel %vm3581_vm8, 1, %v4178_v31  ;;  %v3560_v34 = vsel %vm3559_vm9, 1, %v4178_v31  ;;  %v3552_v0 = vshrl.u32 %v3548_v62, 16  ;;  %3247 = vmatpush.msra.mxu3 %v6301_v20 }
 0x78e   :  { %v2913_v37 = vsel %vm6258_vm3, %v6148_v60, %v2910_v22  ;;  %v3584_v55 = vadd.s32 %v3582_v16, %v3580_v58  ;;  %v3562_v6 = vadd.s32 %v3560_v34, %v3558_v45  ;;  %v3576_v14 = vshrl.u32 %v3571_v54, 16  ;;  %v6310_v22 = vld [vmem:[#allocation12 + $0x8] sm:$0xff] }
 0x78f   :  { %v2915_v33 = vmul.f32 %v2913_v37, %v2913_v37  ;;  %v2912_v41 = vsel %vm2789_vm15, %v2911_v28, %v6207_v3  ;;  %v3554_v7 = vshrl.u32 %v3549_v53, 16  ;;  %v3533_v51 = vsel %vm3527_vm1, %v3530_v32, %v3532_v50  ;;  %3248 = vmatpush.msra.mxu3 %v5933_v40 }
 0x790   :  { %v3585_v46 = vadd.s32 %v3584_v55, %v3574_v26  ;;  %v3563_v9 = vadd.s32 %v3562_v6, %v3552_v0  ;;  %v3583_v2 = vadd.s32 %v3579_v49, %v3575_v35  ;;  %v2914_v28 = vsel %vm6258_vm3, 0, %v2912_v41  ;;  %v6313_v26 = vld [vmem:[#allocation12] sm:$0xff] }
 0x791   :  { %v2916_v57 = vmul.f32 -0.001358992, %v2915_v33  ;;  %v2923_v15 = vmul.f32 -0.00019511016, %v2915_v33  ;;  %v3587_v53 = vmul.u32 %v6227_v25, %v3533_v51  ;;  %v2931_v48 = vadd.s32 3, %v2914_v28  ;;  %3249 = vmatpush.msra.mxu3 %v5947_v29 }
 0x792   :  { %v3586_v62 = vadd.s32 %v3585_v46, %v3576_v14  ;;  %v3564_v54 = vadd.s32 %v3563_v9, %v3554_v7  ;;  %vm2930_vm14 = vweird.f32 %v6148_v60  ;;  %v4000_v14 = vpop.eup %3999  ;;  %vm3496_vm15 = vcmp.lt.s32.totalorder %v6204_v52, 0 }
 0x793   :  { %v2917_v30 = vadd.f32 0.041655596, %v2916_v57  ;;  %v2924_v44 = vadd.f32 0.008332121, %v2923_v15  ;;  %3250 = vmatpush.msra.mxu3 %v5958_v43  ;;  %v2932_v45 = vand.u32 3, %v2931_v48  ;;  %v3218_v15 = vpop.f32.mrf.mxu2 }
 0x794   :  { %v3590_v3 = vadd.s32 1, %v3586_v62  ;;  %vm3589_vm10 = vc.u32 %v3564_v54, %v3583_v2  ;;  %vm3495_vm6 = vcmp.le.f32.partialorder %v3494_v38, 0.7853982 }
 0x795   :  { %v2918_v17 = vmul.f32 %v2917_v30, %v2915_v33  ;;  %v2925_v32 = vmul.f32 %v2924_v44, %v2915_v33  ;;  %3251 = vmatpush.msra.mxu3 %v6310_v22  ;;  %vm2933_vm11 = vcmp.lt.s32.totalorder %v2932_v45, 2  ;;  %vm2934_vm12 = vcmp.eq.s32.totalorder %v2932_v45, 0 }
 0x796   :  { %v3591_v1 = vsel %vm3589_vm10, %v3590_v3, %v3586_v62  ;;  %vm2937_vm13 = vcmp.eq.s32.totalorder %v2932_v45, 2  ;;  %v3588_v30 = vadd.s32 %v3583_v2, %v3564_v54  ;;  %vm3637_vm10 = vweird.f32 %v6204_v52 }
 0x797   :  { %v3592_v61 = vadd.s32 %v3591_v1, %v3587_v53  ;;  %v2919_v35 = vadd.f32 -0.4999988, %v2918_v17  ;;  %v2926_v49 = vadd.f32 -0.16666654, %v2925_v32  ;;  %3252 = vmatpush.msra.mxu3 %v6313_v26 }
 0x799   :  { %v3593_v10 = vadd.s32 536870912, %v3592_v61  ;;  %v2920_v21 = vmul.f32 %v2919_v35, %v2915_v33  ;;  %v2927_v24 = vmul.f32 %v2926_v49, %v2915_v33 }
 0x79b   :  { %v3594_v36 = vshrl.u32 %v3593_v10, 30  ;;  %v2921_v58 = vadd.f32 1.0, %v2920_v21  ;;  %v2928_v25 = vadd.f32 1.0, %v2927_v24 }
 0x79d   :  { %v3595_v40 = vshll.u32 %v3594_v36, 30  ;;  %v2929_v16 = vmul.f32 %v2928_v25, %v2913_v37  ;;  %v2938_v34 = vxor.u32 2147483648, %v2921_v58  ;;  %v3618_v54 = vsub.s32 4, %v3594_v36 }
 0x79f   :  { %v3596_v29 = vsub.s32 %v3592_v61, %v3595_v40  ;;  %v2935_v55 = vxor.u32 2147483648, %v2929_v16  ;;  %v2939_v50 = vsel %vm2937_vm13, %v2938_v34, %v2929_v16 }
 0x7a1   :  { %vm3597_vm1 = vcmp.lt.s32.totalorder %v3596_v29, 0  ;;  %v3598_v43 = vsub.s32 0, %v3596_v29  ;;  %v2936_v33 = vsel %vm2934_vm12, %v2921_v58, %v2935_v55  ;;  %v3619_v58 = vsel %vm3496_vm15, %v3618_v54, %v3594_v36 }
 0x7a2   :  { %v2940_v0 = vsel %vm2933_vm11, %v2936_v33, %v2939_v50  ;;  %v3621_v40 = vsel %vm3495_vm6, 0, %v3619_v58 }
 0x7a3   :  { %v3599_v37 = vsel %vm3597_vm1, %v3598_v43, %v3596_v29  ;;  %v2941_v6 = vsel %vm2930_vm14, nan, %v2940_v0  ;;  %v3638_v43 = vadd.s32 3, %v3621_v40 }
 0x7a4   :  { %v3600_v46 = vclz %v3599_v37  ;;  %v2942_v41 = vsel %vm434_vm0, %v2941_v6, %v6148_v60 }
 0x7a5   :  { %v2944_v7 = vsel %vm4797_vm4, %v4000_v14, %v2942_v41  ;;  %v3639_v37 = vand.u32 3, %v3638_v43 }
 0x7a6   :  { %v3953_v9 = vadd.s32 4294967294, %v3600_v46  ;;  %v2945_v57 = vmul.f32 %v6059_v18, %v2944_v7 }
 0x7a7   :  { %vm3641_vm7 = vcmp.eq.s32.totalorder %v3639_v37, 0  ;;  %vm3644_vm8 = vcmp.eq.s32.totalorder %v3639_v37, 2  ;;  %vm3640_vm9 = vcmp.lt.s32.totalorder %v3639_v37, 2 }
 0x7a8   :  { %vm3954_vm3 = vcmp.lt.s32.totalorder %v3953_v9, 0  ;;  %2948 = vst [vmem:[#allocation13 + $0x28] sm:$0xff] %v2945_v57  ;;  %v3219_v51 = vadd.f32 %v3218_v15, %v2945_v57  ;;  %v4002_v57 = vpop.eup %4001 }
 0x7a9   :  { %v3603_v62 = vsel %vm3954_vm3, 0, %v3953_v9 }
 0x7aa   :  { %v3604_v44 = vsub.s32 32, %v3603_v62  ;;  %v3608_v3 = vsub.s32 4294967266, %v3603_v62  ;;  %3253 = vmatmul.f32.vlgmr.msra.gmra.mxu3 %v3219_v51  ;;  %v3605_v28 = vshll.u32 %v3596_v29, %v3603_v62 }
 0x7ac   :  { %v3606_v53 = vshrl.u32 %v3588_v30, %v3604_v44  ;;  %v3609_v17 = vadd.s32 127, %v3608_v3 }
 0x7ae   :  { %v3607_v32 = vor.u32 %v3606_v53, %v3605_v28  ;;  %v3610_v60 = vshll.u32 %v3609_v17, 23 }
 0x7b0   :  { %v3611_v1 = vor.u32 4788187, %v3610_v60  ;;  %v3614_v35 = vcvt.s32.f32 %v3607_v32 }
 0x7b2   :  { %v3612_v61 = vand.u32 2147483647, %v3611_v1 }
 0x7b4   :  { %v3615_v49 = vmul.f32 %v3614_v35, %v3612_v61 }
 0x7b6   :  { %v3616_v48 = vxor.u32 2147483648, %v3615_v49 }
 0x7b8   :  { %v3617_v18 = vsel %vm3496_vm15, %v3616_v48, %v3615_v49 }
 0x7b9   :  { %v3620_v2 = vsel %vm3495_vm6, %v6204_v52, %v3617_v18 }
 0x7ba   :  { %v3622_v10 = vmul.f32 %v3620_v2, %v3620_v2 }
 0x7bc   :  { %v3623_v21 = vmul.f32 -0.001358992, %v3622_v10  ;;  %v3630_v24 = vmul.f32 -0.00019511016, %v3622_v10 }
 0x7be   :  { %v3624_v25 = vadd.f32 0.041655596, %v3623_v21  ;;  %v3631_v45 = vadd.f32 0.008332121, %v3630_v24 }
 0x7c0   :  { %v3625_v16 = vmul.f32 %v3624_v25, %v3622_v10  ;;  %v3632_v34 = vmul.f32 %v3631_v45, %v3622_v10 }
 0x7c2   :  { %v3626_v29 = vadd.f32 -0.4999988, %v3625_v16  ;;  %v3633_v55 = vadd.f32 -0.16666654, %v3632_v34 }
 0x7c4   :  { %v3627_v33 = vmul.f32 %v3626_v29, %v3622_v10  ;;  %v3634_v50 = vmul.f32 %v3633_v55, %v3622_v10 }
 0x7c6   :  { %v3628_v0 = vadd.f32 1.0, %v3627_v33  ;;  %v3635_v38 = vadd.f32 1.0, %v3634_v50 }
 0x7c8   :  { %v3636_v6 = vmul.f32 %v3635_v38, %v3620_v2  ;;  %v3645_v14 = vxor.u32 2147483648, %v3628_v0 }
 0x7ca   :  { %v3642_v46 = vxor.u32 2147483648, %v3636_v6  ;;  %v3646_v41 = vsel %vm3644_vm8, %v3645_v14, %v3636_v6 }
 0x7cc   :  { %v3643_v36 = vsel %vm3641_vm7, %v3628_v0, %v3642_v46 }
 0x7cd   :  { %v3647_v7 = vsel %vm3640_vm9, %v3643_v36, %v3646_v41 }
 0x7ce   :  { %v3648_v9 = vsel %vm3637_vm10, nan, %v3647_v7 }
 0x7cf   :  { %v3649_v15 = vsel %vm196_vm2, %v3648_v9, %v6204_v52 }
 0x7d0   :  { %v3651_v51 = vsel %vm4522_vm5, %v4002_v57, %v3649_v15 }
 0x7d1   :  { %v3652_v62 = vmul.f32 %v6142_v5, %v3651_v51 }
 0x7d3   :  { %3687 = vmatmul.f32.vlgmr.msrb.gmra.mxu2 %v3652_v62 }
 0x82d   :  { %v6336_v30 = vpop.f32.mrf.mxu3 }
 0x82e   :  { %v3260_v44 = vand.u32 2139095040, %v6336_v30  ;;  %v3257_v53 = vand.u32 2147483647, %v6336_v30  ;;  %vm3259_vm9 = vcmp.lt.s32.totalorder %v6336_v30, 0  ;;  %4003 = vtanh.f32 %v6336_v30 }
 0x830   :  { %v3261_v3 = vshrl.u32 %v3260_v44, 23  ;;  %v3264_v32 = vand.u32 8388607, %v3257_v53  ;;  %vm6398_vm10 = vcmp.le.f32.partialorder %v3257_v53, 0.7853982 }
 0x832   :  { %v3949_v28 = vadd.s32 4294967169, %v3261_v3  ;;  %v3265_v1 = vor.u32 8388608, %v3264_v32 }
 0x834   :  { %v3267_v17 = vadd.s32 1, %v3949_v28  ;;  %v6355_v34 = vshll.u32 %v3265_v1, 8 }
 0x836   :  { %vm3268_vm11 = vcmp.gt.s32.totalorder %v3267_v17, 0  ;;  %v3306_v6 = vand.u32 65535, %v6355_v34  ;;  %v3307_v14 = vshrl.u32 %v6355_v34, 16 }
 0x837   :  { %v3269_v52 = vsel %vm3268_vm11, %v3267_v17, 0 }
 0x838   :  { %v3271_v60 = vand.u32 31, %v3269_v52  ;;  %v6342_v61 = vshrl.u32 %v3269_v52, 5 }
 0x83a   :  { %v3272_v23 = vsub.s32 32, %v3271_v60  ;;  %v3274_v5 = vshll.u32 %v4172_v47, %v3271_v60  ;;  %v3277_v35 = vshll.u32 %v6531_v4, %v3271_v60  ;;  %v3280_v18 = vshll.u32 %v6532_v8, %v3271_v60 }
 0x83b   :  { %v3283_v2 = vshll.u32 %v6533_v42, %v3271_v60  ;;  %v3286_v21 = vshll.u32 %v6534_v11, %v3271_v60  ;;  %vm3289_vm2 = vcmp.lt.s32.totalorder %v6342_v61, 1  ;;  %vm3292_vm5 = vcmp.lt.s32.totalorder %v6342_v61, 4 }
 0x83c   :  { %v3275_v49 = vshrl.u32 %v6531_v4, %v3272_v23  ;;  %v3278_v48 = vshrl.u32 %v6532_v8, %v3272_v23  ;;  %v3281_v54 = vshrl.u32 %v6533_v42, %v3272_v23  ;;  %v3284_v10 = vshrl.u32 %v6534_v11, %v3272_v23 }
 0x83d   :  { %v3287_v24 = vshrl.u32 %v6535_v12, %v3272_v23  ;;  %vm3291_vm12 = vcmp.lt.s32.totalorder %v6342_v61, 3  ;;  %vm3290_vm13 = vcmp.lt.s32.totalorder %v6342_v61, 2 }
 0x83e   :  { %v3276_v58 = vor.u32 %v3275_v49, %v3274_v5  ;;  %v3279_v25 = vor.u32 %v3278_v48, %v3277_v35  ;;  %v3282_v45 = vor.u32 %v3281_v54, %v3280_v18  ;;  %v3285_v40 = vor.u32 %v3284_v10, %v3283_v2 }
 0x83f   :  { %v3288_v16 = vor.u32 %v3287_v24, %v3286_v21  ;;  %v3273_v10 = vshrl.u32 %v4172_v47, %v3272_v23 }
 0x840   :  { %v3297_v29 = vsel %vm3289_vm2, %v3276_v58, %v3279_v25  ;;  %v3301_v55 = vsel %vm3289_vm2, %v3279_v25, %v3282_v45  ;;  %v3298_v43 = vsel %vm3292_vm5, %v3285_v40, 920167782  ;;  %v3294_v18 = vsel %vm3292_vm5, %v3282_v45, 2102212464 }
 0x841   :  { %v3302_v33 = vsel %vm3292_vm5, %v3288_v16, 1326507024  ;;  %v3299_v50 = vsel %vm3291_vm12, %v3282_v45, %v3298_v43  ;;  %v3295_v43 = vsel %vm3291_vm12, %v3279_v25, %v3294_v18  ;;  %v3701_v18 = vld [vmem:[#allocation12 + $0x50] sm:$0xff] }
 0x842   :  { %v3303_v0 = vsel %vm3291_vm12, %v3285_v40, %v3302_v33  ;;  %v3300_v38 = vsel %vm3290_vm13, %v3297_v29, %v3299_v50  ;;  %vm3400_vm12 = vweird.f32 %v6336_v30 }
 0x843   :  { %v3304_v37 = vsel %vm3290_vm13, %v3301_v55, %v3303_v0  ;;  %v3330_v41 = vand.u32 65535, %v3300_v38  ;;  %v3331_v7 = vshrl.u32 %v3300_v38, 16  ;;  %v3293_v55 = vsel %vm3289_vm2, %v3273_v10, %v3276_v58  ;;  %v3699_v10 = vld [vmem:[#allocation12 + $0x40] sm:$0xff] }
 0x844   :  { %v3308_v46 = vand.u32 65535, %v3304_v37  ;;  %v3309_v36 = vshrl.u32 %v3304_v37, 16  ;;  %v3296_v23 = vsel %vm3290_vm13, %v3293_v55, %v3295_v43  ;;  %v3695_v55 = vld [vmem:[#allocation12 + $0x20] sm:$0xff] }
 0x845   :  { %v3333_v15 = vmul.u32 %v3331_v7, %v3306_v6  ;;  %v3334_v51 = vmul.u32 %v3330_v41, %v3307_v14  ;;  %v3332_v28 = vmul.u32 %v3330_v41, %v3306_v6  ;;  %v3335_v60 = vmul.u32 %v3331_v7, %v3307_v14 }
 0x846   :  { %v3311_v9 = vmul.u32 %v3309_v36, %v3306_v6  ;;  %v3312_v57 = vmul.u32 %v3308_v46, %v3307_v14  ;;  %v3310_v62 = vmul.u32 %v3308_v46, %v3306_v6  ;;  %v3313_v3 = vmul.u32 %v3309_v36, %v3307_v14 }
 0x847   :  { %v3336_v17 = vshll.u32 %v3333_v15, 16  ;;  %v3338_v5 = vshll.u32 %v3334_v51, 16  ;;  %v3337_v16 = vshrl.u32 %v3333_v15, 16  ;;  %v3339_v50 = vshrl.u32 %v3334_v51, 16 }
 0x848   :  { %v3314_v44 = vshll.u32 %v3311_v9, 16  ;;  %v3316_v32 = vshll.u32 %v3312_v57, 16  ;;  %v3315_v21 = vshrl.u32 %v3311_v9, 16  ;;  %v3317_v33 = vshrl.u32 %v3312_v57, 16 }
 0x849   :  { %vm3340_vm14 = vc.u32 %v3332_v28, %v3336_v17  ;;  %v3342_v35 = vadd.s32 %v3336_v17, %v3332_v28  ;;  %v3350_v46 = vmul.u32 %v6355_v34, %v3296_v23 }
 0x84a   :  { %vm3318_vm1 = vc.u32 %v3310_v62, %v3314_v44  ;;  %v3320_v52 = vadd.s32 %v3314_v44, %v3310_v62  ;;  %v3341_v48 = vsel %vm3340_vm14, 1, %v4178_v31  ;;  %v3706_v44 = vld [vmem:[#allocation12 + $0x78] sm:$0xff] }
 0x84b   :  { %v3319_v1 = vsel %vm3318_vm1, 1, %v4178_v31  ;;  %v3343_v2 = vadd.s32 %v3341_v48, %v3335_v60  ;;  %vm3344_vm15 = vc.u32 %v3342_v35, %v3338_v5  ;;  %v3346_v37 = vadd.s32 %v3342_v35, %v3338_v5  ;;  %3707 = vmatpush.msrb.mxu3 %v3706_v44 }
 0x84c   :  { %v3321_v49 = vadd.s32 %v3319_v1, %v3313_v3  ;;  %vm3322_vm3 = vc.u32 %v3320_v52, %v3316_v32  ;;  %v3345_v40 = vsel %vm3344_vm15, 1, %v4178_v31  ;;  %v3705_v32 = vld [vmem:[#allocation12 + $0x70] sm:$0xff] }
 0x84d   :  { %v3323_v54 = vsel %vm3322_vm3, 1, %v4178_v31  ;;  %v3347_v29 = vadd.s32 %v3345_v40, %v3343_v2  ;;  %3708 = vmatpush.msrb.mxu3 %v3705_v32 }
 0x84e   :  { %v3325_v24 = vadd.s32 %v3323_v54, %v3321_v49  ;;  %v3700_v54 = vld [vmem:[#allocation12 + $0x48] sm:$0xff] }
 0x84f   :  { %v3348_v0 = vadd.s32 %v3347_v29, %v3337_v16  ;;  %3709 = vmatpush.msrb.mxu3 %v6249_v39 }
 0x850   :  { %v3326_v45 = vadd.s32 %v3325_v24, %v3315_v21 }
 0x851   :  { %v3349_v6 = vadd.s32 %v3348_v0, %v3339_v50  ;;  %3710 = vmatpush.msrb.mxu3 %v6263_v56 }
 0x852   :  { %v3327_v38 = vadd.s32 %v3326_v45, %v3317_v33  ;;  %v3694_v45 = vld [vmem:[#allocation12 + $0x18] sm:$0xff] }
 0x853   :  { %v3353_v14 = vadd.s32 1, %v3349_v6  ;;  %3711 = vmatpush.msrb.mxu3 %v6268_v59 }
 0x854   :  { %vm3352_vm6 = vc.u32 %v3327_v38, %v3346_v37  ;;  %v3351_v3 = vadd.s32 %v3346_v37, %v3327_v38  ;;  %v3693_v37 = vld [vmem:[#allocation12 + $0x10] sm:$0xff] }
 0x855   :  { %v3354_v36 = vsel %vm3352_vm6, %v3353_v14, %v3349_v6  ;;  %3712 = vmatpush.msrb.mxu3 %v3701_v18 }
 0x856   :  { %v3355_v41 = vadd.s32 %v3354_v36, %v3350_v46 }
 0x857   :  { %3713 = vmatpush.msrb.mxu3 %v3700_v54 }
 0x858   :  { %v3356_v58 = vadd.s32 536870912, %v3355_v41 }
 0x859   :  { %3714 = vmatpush.msrb.mxu3 %v3699_v10 }
 0x85a   :  { %v3357_v7 = vshrl.u32 %v3356_v58, 30 }
 0x85b   :  { %3715 = vmatpush.msrb.mxu3 %v6290_v27 }
 0x85c   :  { %v3358_v9 = vshll.u32 %v3357_v7, 30  ;;  %v3381_v24 = vsub.s32 4, %v3357_v7 }
 0x85d   :  { %3716 = vmatpush.msrb.mxu3 %v6296_v63 }
 0x85e   :  { %v3359_v25 = vsub.s32 %v3355_v41, %v3358_v9  ;;  %v3382_v43 = vsel %vm3259_vm9, %v3381_v24, %v3357_v7 }
 0x85f   :  { %3717 = vmatpush.msrb.mxu3 %v6301_v20  ;;  %v3384_v50 = vsel %vm6398_vm10, 0, %v3382_v43 }
 0x860   :  { %vm3360_vm7 = vcmp.lt.s32.totalorder %v3359_v25, 0  ;;  %v3361_v57 = vsub.s32 0, %v3359_v25  ;;  %v3401_v63 = vadd.s32 3, %v3384_v50 }
 0x861   :  { %3718 = vmatpush.msrb.mxu3 %v3695_v55 }
 0x862   :  { %v3362_v15 = vsel %vm3360_vm7, %v3361_v57, %v3359_v25  ;;  %v3402_v36 = vand.u32 3, %v3401_v63 }
 0x863   :  { %v3363_v51 = vclz %v3362_v15  ;;  %3719 = vmatpush.msrb.mxu3 %v3694_v45 }
 0x864   :  { %vm3404_vm11 = vcmp.eq.s32.totalorder %v3402_v36, 0  ;;  %vm3407_vm2 = vcmp.eq.s32.totalorder %v3402_v36, 2  ;;  %vm3403_vm5 = vcmp.lt.s32.totalorder %v3402_v36, 2 }
 0x865   :  { %v3950_v62 = vadd.s32 4294967294, %v3363_v51  ;;  %3720 = vmatpush.msrb.mxu3 %v3693_v37 }
 0x867   :  { %vm3951_vm8 = vcmp.lt.s32.totalorder %v3950_v62, 0  ;;  %3721 = vmatpush.msrb.mxu3 %v6310_v22  ;;  %v4004_v22 = vpop.eup %4003 }
 0x868   :  { %v3366_v61 = vsel %vm3951_vm8, 0, %v3950_v62  ;;  %v6422_v62 = vld [vmem:[%s6505_s6] ss:$0 sm:$0xff]  ;;  %s4179_s6 = smov [#allocation13]  }
 0x869   :  { %v3367_v28 = vsub.s32 32, %v3366_v61  ;;  %v3371_v17 = vsub.s32 4294967266, %v3366_v61  ;;  %v3368_v34 = vshll.u32 %v3359_v25, %v3366_v61  ;;  %3722 = vmatpush.msrb.mxu3 %v6313_v26  ;;  %v3688_v61 = vpop.f32.mrf.mxu2  ;;  %s3893_s15 = sshll.u32 %s4179_s6, 4  ;;  %s3894_s15 = int_to_ptr.vmem [resolvable:$true] %s3893_s15 }
 0x86b   :  { %v3369_v52 = vshrl.u32 %v3351_v3, %v3367_v28  ;;  %v3372_v60 = vadd.s32 127, %v3371_v17 }
 0x86d   :  { %v3370_v1 = vor.u32 %v3369_v52, %v3368_v34  ;;  %v3373_v5 = vshll.u32 %v3372_v60, 23 }
 0x86f   :  { %v3374_v35 = vor.u32 4788187, %v3373_v5  ;;  %v3377_v48 = vcvt.s32.f32 %v3370_v1 }
 0x871   :  { %v3375_v49 = vand.u32 2147483647, %v3374_v35 }
 0x873   :  { %v3378_v2 = vmul.f32 %v3377_v48, %v3375_v49 }
 0x875   :  { %v3379_v21 = vxor.u32 2147483648, %v3378_v2 }
 0x877   :  { %v3380_v56 = vsel %vm3259_vm9, %v3379_v21, %v3378_v2 }
 0x878   :  { %v3383_v59 = vsel %vm6398_vm10, %v6336_v30, %v3380_v56 }
 0x879   :  { %v3385_v40 = vmul.f32 %v3383_v59, %v3383_v59 }
 0x87b   :  { %v3386_v16 = vmul.f32 -0.001358992, %v3385_v40  ;;  %v3393_v29 = vmul.f32 -0.00019511016, %v3385_v40 }
 0x87d   :  { %v3387_v53 = vadd.f32 0.041655596, %v3386_v16  ;;  %v3394_v33 = vadd.f32 0.008332121, %v3393_v29 }
 0x87f   :  { %v3388_v0 = vmul.f32 %v3387_v53, %v3385_v40  ;;  %v3395_v38 = vmul.f32 %v3394_v33, %v3385_v40 }
 0x881   :  { %v3389_v27 = vadd.f32 -0.4999988, %v3388_v0  ;;  %v3396_v23 = vadd.f32 -0.16666654, %v3395_v38 }
 0x883   :  { %v3390_v6 = vmul.f32 %v3389_v27, %v3385_v40  ;;  %v3397_v14 = vmul.f32 %v3396_v23, %v3385_v40 }
 0x885   :  { %v3391_v20 = vadd.f32 1.0, %v3390_v6  ;;  %v3398_v46 = vadd.f32 1.0, %v3397_v14 }
 0x887   :  { %v3399_v41 = vmul.f32 %v3398_v46, %v3383_v59  ;;  %v3408_v58 = vxor.u32 2147483648, %v3391_v20 }
 0x889   :  { %v3405_v7 = vxor.u32 2147483648, %v3399_v41  ;;  %v3409_v25 = vsel %vm3407_vm2, %v3408_v58, %v3399_v41 }
 0x88b   :  { %v3406_v9 = vsel %vm3404_vm11, %v3391_v20, %v3405_v7 }
 0x88c   :  { %v3410_v57 = vsel %vm3403_vm5, %v3406_v9, %v3409_v25 }
 0x88d   :  { %v3411_v15 = vsel %vm3400_vm12, nan, %v3410_v57 }
 0x88e   :  { %v3412_v51 = vsel %vm434_vm0, %v3411_v15, %v6336_v30 }
 0x88f   :  { %v3414_v26 = vsel %vm4797_vm4, %v4004_v22, %v3412_v51 }
 0x890   :  { %v3415_v44 = vmul.f32 %v6422_v62, %v3414_v26 }
 0x892   :  { %3418 = vst [vmem:[#allocation13 + $0x30] sm:$0xff] %v3415_v44  ;;  %v3689_v3 = vadd.f32 %v3688_v61, %v3415_v44 }
 0x894   :  { %3723 = vmatmul.f32.vlgmr.msrb.gmra.mxu3 %v3689_v3 }
 0x917   :  { %v6425_v28 = vpop.f32.mrf.mxu3 }
 0x918   :  { %v3730_v17 = vand.u32 2139095040, %v6425_v28  ;;  %v3727_v34 = vand.u32 2147483647, %v6425_v28  ;;  %vm3729_vm5 = vcmp.lt.s32.totalorder %v6425_v28, 0  ;;  %4005 = vtanh.f32 %v6425_v28 }
 0x91a   :  { %v3731_v32 = vshrl.u32 %v3730_v17, 23  ;;  %v3734_v60 = vand.u32 8388607, %v3727_v34  ;;  %vm3728_vm12 = vcmp.le.f32.partialorder %v3727_v34, 0.7853982 }
 0x91c   :  { %v3955_v30 = vadd.s32 4294967169, %v3731_v32  ;;  %v3735_v49 = vor.u32 8388608, %v3734_v60 }
 0x91e   :  { %v3737_v52 = vadd.s32 1, %v3955_v30 }
 0x920   :  { %vm3738_vm13 = vcmp.gt.s32.totalorder %v3737_v52, 0 }
 0x921   :  { %v3739_v1 = vsel %vm3738_vm13, %v3737_v52, 0 }
 0x922   :  { %v3741_v5 = vand.u32 31, %v3739_v1  ;;  %v6431_v48 = vshrl.u32 %v3739_v1, 5 }
 0x924   :  { %v3742_v35 = vsub.s32 32, %v3741_v5  ;;  %v3744_v18 = vshll.u32 %v4172_v47, %v3741_v5  ;;  %v3747_v54 = vshll.u32 %v6531_v4, %v3741_v5  ;;  %v3750_v21 = vshll.u32 %v6532_v8, %v3741_v5 }
 0x925   :  { %v3753_v56 = vshll.u32 %v6533_v42, %v3741_v5  ;;  %v3756_v24 = vshll.u32 %v6534_v11, %v3741_v5  ;;  %vm3759_vm1 = vcmp.lt.s32.totalorder %v6431_v48, 1  ;;  %vm3762_vm14 = vcmp.lt.s32.totalorder %v6431_v48, 4 }
 0x926   :  { %v3745_v2 = vshrl.u32 %v6531_v4, %v3742_v35  ;;  %v3748_v10 = vshrl.u32 %v6532_v8, %v3742_v35  ;;  %v3751_v39 = vshrl.u32 %v6533_v42, %v3742_v35  ;;  %v3754_v59 = vshrl.u32 %v6534_v11, %v3742_v35 }
 0x927   :  { %v3757_v40 = vshrl.u32 %v6535_v12, %v3742_v35  ;;  %v6444_v4 = vshll.u32 %v3735_v49, 8  ;;  %vm3761_vm3 = vcmp.lt.s32.totalorder %v6431_v48, 3  ;;  %vm3760_vm15 = vcmp.lt.s32.totalorder %v6431_v48, 2 }
 0x928   :  { %v3746_v16 = vor.u32 %v3745_v2, %v3744_v18  ;;  %v3749_v29 = vor.u32 %v3748_v10, %v3747_v54  ;;  %v3752_v55 = vor.u32 %v3751_v39, %v3750_v21  ;;  %v3755_v43 = vor.u32 %v3754_v59, %v3753_v56 }
 0x929   :  { %v3758_v53 = vor.u32 %v3757_v40, %v3756_v24  ;;  %v3776_v38 = vand.u32 65535, %v6444_v4  ;;  %v3777_v37 = vshrl.u32 %v6444_v4, 16  ;;  %v3743_v52 = vshrl.u32 %v4172_v47, %v3742_v35 }
 0x92a   :  { %v3767_v8 = vsel %vm3759_vm1, %v3746_v16, %v3749_v29  ;;  %v3771_v42 = vsel %vm3759_vm1, %v3749_v29, %v3752_v55  ;;  %v3768_v11 = vsel %vm3762_vm14, %v3755_v43, 920167782  ;;  %v3764_v17 = vsel %vm3762_vm14, %v3752_v55, 2102212464 }
 0x92b   :  { %v3772_v12 = vsel %vm3762_vm14, %v3758_v53, 1326507024  ;;  %v3769_v33 = vsel %vm3761_vm3, %v3752_v55, %v3768_v11  ;;  %v3763_v54 = vsel %vm3759_vm1, %v3743_v52, %v3746_v16  ;;  %v3765_v2 = vsel %vm3761_vm3, %v3749_v29, %v3764_v17 }
 0x92c   :  { %v3773_v45 = vsel %vm3761_vm3, %v3755_v43, %v3772_v12  ;;  %v3770_v50 = vsel %vm3760_vm15, %v3767_v8, %v3769_v33  ;;  %v3766_v47 = vsel %vm3760_vm15, %v3763_v54, %v3765_v2  ;;  %vm3870_vm3 = vweird.f32 %v6425_v28 }
 0x92d   :  { %v3774_v0 = vsel %vm3760_vm15, %v3771_v42, %v3773_v45  ;;  %v3800_v63 = vand.u32 65535, %v3770_v50  ;;  %v3801_v6 = vshrl.u32 %v3770_v50, 16  ;;  %v3820_v40 = vmul.u32 %v6444_v4, %v3766_v47 }
 0x92e   :  { %v3778_v27 = vand.u32 65535, %v3774_v0  ;;  %v3779_v23 = vshrl.u32 %v3774_v0, 16 }
 0x92f   :  { %v3803_v46 = vmul.u32 %v3801_v6, %v3776_v38  ;;  %v3804_v36 = vmul.u32 %v3800_v63, %v3777_v37  ;;  %v3802_v9 = vmul.u32 %v3800_v63, %v3776_v38  ;;  %v3805_v22 = vmul.u32 %v3801_v6, %v3777_v37 }
 0x930   :  { %v3781_v14 = vmul.u32 %v3779_v23, %v3776_v38  ;;  %v3782_v20 = vmul.u32 %v3778_v27, %v3777_v37  ;;  %v3780_v41 = vmul.u32 %v3778_v27, %v3776_v38  ;;  %v3783_v7 = vmul.u32 %v3779_v23, %v3777_v37 }
 0x931   :  { %v3806_v25 = vshll.u32 %v3803_v46, 16  ;;  %v3808_v26 = vshll.u32 %v3804_v36, 16  ;;  %v3807_v49 = vshrl.u32 %v3803_v46, 16  ;;  %v3809_v39 = vshrl.u32 %v3804_v36, 16 }
 0x932   :  { %v3784_v58 = vshll.u32 %v3781_v14, 16  ;;  %v3786_v57 = vshll.u32 %v3782_v20, 16  ;;  %v3785_v60 = vshrl.u32 %v3781_v14, 16  ;;  %v3787_v10 = vshrl.u32 %v3782_v20, 16 }
 0x933   :  { %vm3810_vm7 = vc.u32 %v3802_v9, %v3806_v25  ;;  %v3812_v44 = vadd.s32 %v3806_v25, %v3802_v9 }
 0x934   :  { %vm3788_vm6 = vc.u32 %v3780_v41, %v3784_v58  ;;  %v3790_v15 = vadd.s32 %v3784_v58, %v3780_v41  ;;  %v3811_v3 = vsel %vm3810_vm7, 1, %v4178_v31 }
 0x935   :  { %v3789_v51 = vsel %vm3788_vm6, 1, %v4178_v31  ;;  %v3813_v30 = vadd.s32 %v3811_v3, %v3805_v22  ;;  %vm3814_vm9 = vc.u32 %v3812_v44, %v3808_v26  ;;  %v3816_v24 = vadd.s32 %v3812_v44, %v3808_v26 }
 0x936   :  { %v3791_v61 = vadd.s32 %v3789_v51, %v3783_v7  ;;  %vm3792_vm8 = vc.u32 %v3790_v15, %v3786_v57  ;;  %v3815_v5 = vsel %vm3814_vm9, 1, %v4178_v31 }
 0x937   :  { %v3793_v32 = vsel %vm3792_vm8, 1, %v4178_v31  ;;  %v3817_v18 = vadd.s32 %v3815_v5, %v3813_v30 }
 0x938   :  { %v3795_v1 = vadd.s32 %v3793_v32, %v3791_v61 }
 0x939   :  { %v3818_v56 = vadd.s32 %v3817_v18, %v3807_v49 }
 0x93a   :  { %v3796_v21 = vadd.s32 %v3795_v1, %v3785_v60 }
 0x93b   :  { %v3819_v35 = vadd.s32 %v3818_v56, %v3809_v39 }
 0x93c   :  { %v3797_v59 = vadd.s32 %v3796_v21, %v3787_v10  ;;  %v4006_v21 = vpop.eup %4005 }
 0x93d   :  { %v3823_v31 = vadd.s32 1, %v3819_v35 }
 0x93e   :  { %vm3822_vm10 = vc.u32 %v3797_v59, %v3816_v24  ;;  %v3821_v48 = vadd.s32 %v3816_v24, %v3797_v59 }
 0x93f   :  { %v3824_v55 = vsel %vm3822_vm10, %v3823_v31, %v3819_v35 }
 0x940   :  { %v3825_v43 = vadd.s32 %v3824_v55, %v3820_v40 }
 0x942   :  { %v3826_v16 = vadd.s32 536870912, %v3825_v43 }
 0x944   :  { %v3827_v53 = vshrl.u32 %v3826_v16, 30 }
 0x946   :  { %v3828_v8 = vshll.u32 %v3827_v53, 30  ;;  %v3851_v41 = vsub.s32 4, %v3827_v53 }
 0x948   :  { %v3829_v29 = vsub.s32 %v3825_v43, %v3828_v8  ;;  %v3852_v57 = vsel %vm3729_vm5, %v3851_v41, %v3827_v53 }
 0x949   :  { %v3854_v51 = vsel %vm3728_vm12, 0, %v3852_v57 }
 0x94a   :  { %vm3830_vm11 = vcmp.lt.s32.totalorder %v3829_v29, 0  ;;  %v3831_v42 = vsub.s32 0, %v3829_v29  ;;  %v3871_v17 = vadd.s32 3, %v3854_v51 }
 0x94c   :  { %v3832_v11 = vsel %vm3830_vm11, %v3831_v42, %v3829_v29  ;;  %v3872_v60 = vand.u32 3, %v3871_v17 }
 0x94d   :  { %v3833_v12 = vclz %v3832_v11 }
 0x94e   :  { %vm3874_vm13 = vcmp.eq.s32.totalorder %v3872_v60, 0  ;;  %vm3877_vm1 = vcmp.eq.s32.totalorder %v3872_v60, 2  ;;  %vm3873_vm14 = vcmp.lt.s32.totalorder %v3872_v60, 2 }
 0x94f   :  { %v3956_v33 = vadd.s32 4294967294, %v3833_v12 }
 0x951   :  { %vm3957_vm2 = vcmp.lt.s32.totalorder %v3956_v33, 0 }
 0x952   :  { %v3836_v45 = vsel %vm3957_vm2, 0, %v3956_v33 }
 0x953   :  { %v3837_v50 = vsub.s32 32, %v3836_v45  ;;  %v3841_v0 = vsub.s32 4294967266, %v3836_v45  ;;  %v3838_v38 = vshll.u32 %v3829_v29, %v3836_v45 }
 0x955   :  { %v3839_v37 = vshrl.u32 %v3821_v48, %v3837_v50  ;;  %v3842_v27 = vadd.s32 127, %v3841_v0 }
 0x957   :  { %v3840_v4 = vor.u32 %v3839_v37, %v3838_v38  ;;  %v3843_v23 = vshll.u32 %v3842_v27, 23 }
 0x959   :  { %v3844_v63 = vor.u32 4788187, %v3843_v23  ;;  %v3847_v14 = vcvt.s32.f32 %v3840_v4 }
 0x95b   :  { %v3845_v6 = vand.u32 2147483647, %v3844_v63 }
 0x95d   :  { %v3848_v20 = vmul.f32 %v3847_v14, %v3845_v6 }
 0x95f   :  { %v3849_v46 = vxor.u32 2147483648, %v3848_v20 }
 0x961   :  { %v3850_v36 = vsel %vm3729_vm5, %v3849_v46, %v3848_v20 }
 0x962   :  { %v3853_v58 = vsel %vm3728_vm12, %v6425_v28, %v3850_v36 }
 0x963   :  { %v3855_v7 = vmul.f32 %v3853_v58, %v3853_v58 }
 0x965   :  { %v3856_v9 = vmul.f32 -0.001358992, %v3855_v7  ;;  %v3863_v25 = vmul.f32 -0.00019511016, %v3855_v7 }
 0x967   :  { %v3857_v15 = vadd.f32 0.041655596, %v3856_v9  ;;  %v3864_v22 = vadd.f32 0.008332121, %v3863_v25 }
 0x969   :  { %v3858_v26 = vmul.f32 %v3857_v15, %v3855_v7  ;;  %v3865_v44 = vmul.f32 %v3864_v22, %v3855_v7 }
 0x96b   :  { %v3859_v61 = vadd.f32 -0.4999988, %v3858_v26  ;;  %v3866_v3 = vadd.f32 -0.16666654, %v3865_v44 }
 0x96d   :  { %v3860_v32 = vmul.f32 %v3859_v61, %v3855_v7  ;;  %v3867_v30 = vmul.f32 %v3866_v3, %v3855_v7 }
 0x96f   :  { %v3861_v52 = vadd.f32 1.0, %v3860_v32  ;;  %v3868_v34 = vadd.f32 1.0, %v3867_v30 }
 0x971   :  { %v3869_v1 = vmul.f32 %v3868_v34, %v3853_v58  ;;  %v3878_v5 = vxor.u32 2147483648, %v3861_v52 }
 0x973   :  { %v3875_v49 = vxor.u32 2147483648, %v3869_v1  ;;  %v3879_v54 = vsel %vm3877_vm1, %v3878_v5, %v3869_v1 }
 0x975   :  { %v3876_v18 = vsel %vm3874_vm13, %v3861_v52, %v3875_v49 }
 0x976   :  { %v3880_v2 = vsel %vm3873_vm14, %v3876_v18, %v3879_v54 }
 0x977   :  { %v3881_v10 = vsel %vm3870_vm3, nan, %v3880_v2 }
 0x978   :  { %v3882_v39 = vsel %vm434_vm0, %v3881_v10, %v6425_v28 }
 0x979   :  { %v3884_v56 = vsel %vm4797_vm4, %v4006_v21, %v3882_v39 }
 0x97a   :  { %v3885_v59 = vmul.f32 %v6422_v62, %v3884_v56 }
 0x97c   :  { %3888 = vst [vmem:[#allocation13 + $0x38] sm:$0xff] %v3885_v59 }
 0x97d   :  { %3901 = dma.vmem_to_hbm [thread:$0]  %s3894_s15, 1024, %s3896_s18, [#allocation6], %s4166_s9, %s4166_s9, %s4167_s10  }
 0x97e   :  { %4163 = dma.done.wait [#allocation6], 1024  }
 0x97f   :  { %4164 = vsyncadd [#allocation6], 4294966272 }
 0x980   :  { %3906 = vsyncpa [#allocation5], 1 }
 0x981   :  { %3907 = vsyncpa [#allocation8], 1 }
 0x982   :  { %3908 = vsyncpa [#allocation11], 1 }
 0x983   :  { %3909 = vsyncpa [#allocation6], 1 }

</bundles_post_ra>
